<compile_context>
chip_gen: v7x
topology: tpu7x:2x2x1
jax: 0.10.0
libtpu: 0.0.40
codegen_flags: <defaults>
</compile_context>

<pallas_src>
import numpy as np
import jax
import jax.numpy as jnp
from jax.experimental import pallas as pl
from jax.experimental.pallas import tpu as pltpu

H = W = 8
HW = H * W            # 64 flattened spatial positions
C1 = 64               # conv1 output channels
F1 = C1 * HW          # 4096 flattened conv1 features (channel-major, torch order)
FC1 = 256             # fc1 hidden size
K_IN = 72             # 64 board cols + 1 ones col (bias) + 7 zero pad
N_OUT = 128           # fc2 output padded to a lane-dense 128 (true width 64)


def _round_up(n, m):
    return ((n + m - 1) // m) * m


def _build_shift_tensor():
    """S[t, j, i] = 1 iff output spatial i reads source spatial j for 3x3 tap
    t = dh*3+dw under padding=1; out-of-bounds source positions omit the 1."""
    S = np.zeros((9, HW, HW), np.float32)
    for t, (dh, dw) in enumerate((a, b) for a in range(3) for b in range(3)):
        for h in range(H):
            for w in range(W):
                hs, ws = h + dh - 1, w + dw - 1
                if 0 <= hs < H and 0 <= ws < W:
                    S[t, hs * W + ws, h * W + w] = 1.0
    return S


_SHIFT = _build_shift_tensor()   # (9, 64, 64) numpy constant


# ---------------------------------------------------------------------------
# Pallas kernel: whole forward for one batch tile (4 batched matmuls)
# ---------------------------------------------------------------------------
def reversi_kernel(x_ref, a1_ref, m2_ref, b2_ref,
                   wfc1_ref, bfc1_ref, wfc2_ref, bfc2_ref, out_ref):
    cd = a1_ref.dtype   # compute dtype of weights/activations (bf16 or f32)

    # conv1 folded (bias included via the ones column of x): (Bt,72)@(72,4096).
    h1 = jnp.dot(x_ref[...], a1_ref[...], preferred_element_type=jnp.float32)
    # ReLU in the compute dtype (bf16 on v6e/v7x packs 2 elems/lane and halves
    # h1's footprint/store traffic; relu and the cast commute so it's exact).
    h1 = jnp.maximum(h1.astype(cd), 0.0)                       # (Bt, 4096) cd

    # conv2 folded (9 taps + shift/zero-pad + channel reduction in one matrix).
    z = jnp.dot(h1, m2_ref[...], preferred_element_type=jnp.float32)
    z = jnp.maximum(z + b2_ref[...], 0.0)                      # (Bt, 64) f32

    # fc1 + ReLU
    y = jnp.dot(z.astype(cd), wfc1_ref[...], preferred_element_type=jnp.float32)
    y = jnp.maximum(y + bfc1_ref[...], 0.0)                    # (Bt, 256) f32

    # fc2 (N padded to 128 -> unmasked lane-dense store)
    o = jnp.dot(y.astype(cd), wfc2_ref[...], preferred_element_type=jnp.float32)
    out_ref[...] = (o + bfc2_ref[...]).astype(out_ref.dtype)   # (Bt, 128)


# ---------------------------------------------------------------------------
# Parameter folding (do once per parameter set; independent of batch)
# ---------------------------------------------------------------------------
def init_params(key):
    ks = jax.random.split(key, 8)
    scale = 0.1
    return dict(
        conv1_w=jax.random.normal(ks[0], (64, 1, 3, 3), jnp.float32) * scale,
        conv1_b=jax.random.normal(ks[1], (64,), jnp.float32) * scale,
        conv2_w=jax.random.normal(ks[2], (1, 64, 3, 3), jnp.float32) * scale,
        conv2_b=jax.random.normal(ks[3], (1,), jnp.float32) * scale,
        fc1_w=jax.random.normal(ks[4], (256, 64), jnp.float32) * scale,
        fc1_b=jax.random.normal(ks[5], (256,), jnp.float32) * scale,
        fc2_w=jax.random.normal(ks[6], (64, 256), jnp.float32) * scale,
        fc2_b=jax.random.normal(ks[7], (64,), jnp.float32) * scale,
    )


def fold_params(params, compute_dtype=jnp.bfloat16):
    """Fold both 3x3 'same' convs into dense matrices (torch channel-major
    flatten order) and lay out fc weights for the kernel.  Built in f32 and
    cast once to the compute dtype (no double rounding)."""
    cd = compute_dtype
    S = jnp.asarray(_SHIFT)                                     # (9, 64, 64)

    # conv1 -> A1 (K_IN, F1), with the bias as the K=64 row (ones column of x).
    w1 = params["conv1_w"].reshape(C1, 9)                       # (c, t)
    a1_core = jnp.einsum("ct,tsi->sci", w1, S).reshape(HW, F1)  # (64, 4096) f32
    b1_row = jnp.repeat(params["conv1_b"], HW).reshape(1, F1)   # (1, 4096) f32
    a1 = jnp.concatenate(
        [a1_core, b1_row, jnp.zeros((K_IN - HW - 1, F1), jnp.float32)],
        axis=0).astype(cd)                                      # (72, 4096)

    # conv2 -> M2 (F1, HW)
    w2 = params["conv2_w"][0].reshape(C1, 9)                    # (c, t)
    m2 = jnp.einsum("ct,tji->cji", w2, S).reshape(F1, HW).astype(cd)
    b2 = jnp.broadcast_to(params["conv2_b"].reshape(1, 1),
                          (1, HW)).astype(jnp.float32)

    wfc1 = params["fc1_w"].T.astype(cd)                         # (64, 256)
    bfc1 = params["fc1_b"].reshape(1, FC1).astype(jnp.float32)

    # fc2 padded to a lane-dense N=128 output slab.
    wfc2 = jnp.zeros((FC1, N_OUT), jnp.float32).at[:, :HW].set(
        params["fc2_w"].T).astype(cd)                           # (256, 128)
    bfc2 = jnp.zeros((1, N_OUT), jnp.float32).at[:, :HW].set(
        params["fc2_b"].reshape(1, HW))

    return dict(compute_dtype=cd, a1=a1, m2=m2, b2=b2,
                wfc1=wfc1, bfc1=bfc1, wfc2=wfc2, bfc2=bfc2)


# ---------------------------------------------------------------------------
# Forward wrappers
# ---------------------------------------------------------------------------
def reversi_forward_folded(x, folded, *, block_batch=512):
    """x: (B, 1, 8, 8) float32 NCHW -> (B, 64) float32 (folded weights)."""
    B = x.shape[0]
    cd = folded["compute_dtype"]

    # f32 compute path: cap the tile so the f32 h1 intermediate stays well
    # inside the v7x 64 MiB VMEM budget.
    if cd == jnp.float32:
        block_batch = min(block_batch, 256)

    # Pick batch tile; prefer >=2 grid steps when the batch allows it so the
    # "parallel" axis can be sharded across both v7x TensorCores.
    block_batch = max(8, _round_up(block_batch, 8))
    Bt = min(block_batch, _round_up(B, 8))
    if _round_up(B, Bt) == Bt and Bt >= 16:
        Bt = _round_up(Bt // 2, 8)
    Bp = _round_up(B, Bt)

    # Boards flattened + constant-1 column (for the folded conv1 bias) + pad.
    x_flat = x.reshape(B, HW)
    x_aug = jnp.concatenate(
        [x_flat, jnp.ones((B, 1), x_flat.dtype),
         jnp.zeros((B, K_IN - HW - 1), x_flat.dtype)], axis=1)  # (B, 72)
    if Bp != B:
        x_aug = jnp.pad(x_aug, ((0, Bp - B), (0, 0)))
    x_aug = x_aug.astype(cd)

    full = lambda shape: pl.BlockSpec(shape, lambda b: (0,) * len(shape))

    out = pl.pallas_call(
        reversi_kernel,
        out_shape=jax.ShapeDtypeStruct((Bp, N_OUT), jnp.float32),
        grid_spec=pltpu.PrefetchScalarGridSpec(
            num_scalar_prefetch=0,
            grid=(Bp // Bt,),
            in_specs=[
                pl.BlockSpec((Bt, K_IN), lambda b: (b, 0)),  # boards (+1 col)
                full((K_IN, F1)),                            # folded conv1 (+bias row)
                full((F1, HW)),                              # folded conv2
                full((1, HW)),                               # conv2 bias row
                full((HW, FC1)),                             # fc1 w^T
                full((1, FC1)),                              # fc1 bias
                full((FC1, N_OUT)),                          # fc2 w^T (padded N)
                full((1, N_OUT)),                            # fc2 bias (padded N)
            ],
            out_specs=pl.BlockSpec((Bt, N_OUT), lambda b: (b, 0)),
        ),
        compiler_params=pltpu.CompilerParams(
            dimension_semantics=("parallel",),
            vmem_limit_bytes=48 * 1024 * 1024),
    )(x_aug, folded["a1"], folded["m2"], folded["b2"],
      folded["wfc1"], folded["bfc1"], folded["wfc2"], folded["bfc2"])
    return out[:B, :HW]


def reversi_forward(x, params, *, block_batch=512, compute_dtype=jnp.bfloat16):
    """Convenience wrapper: folds params then runs the kernel.  For repeated
    inference, call fold_params() once and use reversi_forward_folded()."""
    return reversi_forward_folded(x, fold_params(params, compute_dtype),
                                  block_batch=block_batch)


# ---------------------------------------------------------------------------
# Pure-JAX reference (mirrors the PyTorch forward exactly)
# ---------------------------------------------------------------------------
def reversi_reference(x, params):
    dn = ("NCHW", "OIHW", "NCHW")
    h = jax.lax.conv_general_dilated(x, params["conv1_w"], (1, 1), "SAME",
                                     dimension_numbers=dn)
    h = jax.nn.relu(h + params["conv1_b"].reshape(1, 64, 1, 1))
    h = jax.lax.conv_general_dilated(h, params["conv2_w"], (1, 1), "SAME",
                                     dimension_numbers=dn)
    h = jax.nn.relu(h + params["conv2_b"].reshape(1, 1, 1, 1))
    f = h.reshape(x.shape[0], -1)
    y = jax.nn.relu(f @ params["fc1_w"].T + params["fc1_b"])
    return y @ params["fc2_w"].T + params["fc2_b"]


if __name__ == "__main__":
    key = jax.random.PRNGKey(0)
    pkey, xkey = jax.random.split(key)
    params = init_params(pkey)

    # Reversi board input: batch=2, 1 channel, 8x8 board (NCHW like PyTorch).
    x = jax.random.normal(xkey, (2, 1, 8, 8), jnp.float32)
    ref = jax.block_until_ready(reversi_reference(x, params))

    # Fold once per parameter set (hoisted out of the per-call path).
    folded_f32 = fold_params(params, jnp.float32)
    folded_bf16 = fold_params(params, jnp.bfloat16)

    # f32 compute path: tight tolerance.
    out = jax.block_until_ready(reversi_forward_folded(x, folded_f32))
    assert out.shape == (2, 64), out.shape
    np.testing.assert_allclose(np.asarray(out), np.asarray(ref),
                               rtol=1e-3, atol=1e-3)

    # Default bf16 compute path (f32 MXU accumulation): looser tolerance.
    out_bf16 = jax.block_until_ready(reversi_forward_folded(x, folded_bf16))
    np.testing.assert_allclose(np.asarray(out_bf16), np.asarray(ref),
                               rtol=5e-2, atol=5e-2)

    # Exercise the multi-tile batch grid (two 16-row tiles) on the f32 path.
    xb = jax.random.normal(jax.random.PRNGKey(1), (32, 1, 8, 8), jnp.float32)
    out_b = jax.block_until_ready(
        reversi_forward_folded(xb, folded_f32, block_batch=16))
    ref_b = jax.block_until_ready(reversi_reference(xb, params))
    np.testing.assert_allclose(np.asarray(out_b), np.asarray(ref_b),
                               rtol=1e-3, atol=1e-3)

    # And a larger batch on the default bf16 path (auto tile split, >=2 steps).
    xl = jax.random.normal(jax.random.PRNGKey(2), (96, 1, 8, 8), jnp.float32)
    out_l = jax.block_until_ready(reversi_forward(xl, params))
    ref_l = jax.block_until_ready(reversi_reference(xl, params))
    np.testing.assert_allclose(np.asarray(out_l), np.asarray(ref_l),
                               rtol=5e-2, atol=5e-2)

    print("KERNEL_OK")
</pallas_src>

<mosaic_0001>
module attributes {stable_mosaic.version = 11 : i64} {
  func.func @reversi_kernel(%arg0: i32, %arg1: memref<8x72xf32, #tpu.memory_space<vmem>>, %arg2: memref<72x4096xf32, #tpu.memory_space<vmem>>, %arg3: memref<4096x64xf32, #tpu.memory_space<vmem>>, %arg4: memref<1x64xf32, #tpu.memory_space<vmem>>, %arg5: memref<64x256xf32, #tpu.memory_space<vmem>>, %arg6: memref<1x256xf32, #tpu.memory_space<vmem>>, %arg7: memref<256x128xf32, #tpu.memory_space<vmem>>, %arg8: memref<1x128xf32, #tpu.memory_space<vmem>>, %arg9: memref<8x128xf32, #tpu.memory_space<vmem>>) attributes {dimension_semantics = [#tpu.dimension_semantics<parallel>], iteration_bounds = array<i64: 1>, scalar_prefetch = 0 : i64, scratch_operands = 0 : i64, tpu.core_type = #tpu.core_type<tc>, window_params = [{transform_indices = @transform_0, window_bounds = array<i64: 8, 72>}, {pipeline_mode = #tpu.pipeline_mode<synchronous>, transform_indices = @transform_1, window_bounds = array<i64: 72, 4096>}, {pipeline_mode = #tpu.pipeline_mode<synchronous>, transform_indices = @transform_2, window_bounds = array<i64: 4096, 64>}, {pipeline_mode = #tpu.pipeline_mode<synchronous>, transform_indices = @transform_3, window_bounds = array<i64: 1, 64>}, {pipeline_mode = #tpu.pipeline_mode<synchronous>, transform_indices = @transform_4, window_bounds = array<i64: 64, 256>}, {pipeline_mode = #tpu.pipeline_mode<synchronous>, transform_indices = @transform_5, window_bounds = array<i64: 1, 256>}, {pipeline_mode = #tpu.pipeline_mode<synchronous>, transform_indices = @transform_6, window_bounds = array<i64: 256, 128>}, {pipeline_mode = #tpu.pipeline_mode<synchronous>, transform_indices = @transform_7, window_bounds = array<i64: 1, 128>}, {transform_indices = @transform_8, window_bounds = array<i64: 8, 128>}]} {
    %c0 = arith.constant 0 : index
    %c0_0 = arith.constant 0 : index
    %0 = vector.load %arg1[%c0, %c0_0] : memref<8x72xf32, #tpu.memory_space<vmem>>, vector<8x72xf32>
    %c0_1 = arith.constant 0 : index
    %c0_2 = arith.constant 0 : index
    %1 = vector.load %arg2[%c0_1, %c0_2] : memref<72x4096xf32, #tpu.memory_space<vmem>>, vector<72x4096xf32>
    %cst = arith.constant dense<0.000000e+00> : vector<8x4096xf32>
    %2 = tpu.matmul %0, %1, %cst {dimension_numbers = #tpu.dot_dimension_numbers<[1], [0], [0], [1], [0, 0, 1, 1], [], []>} : vector<8x72xf32>, vector<72x4096xf32>, vector<8x4096xf32> -> vector<8x4096xf32>
    %cst_3 = arith.constant 0.000000e+00 : f32
    %3 = vector.broadcast %cst_3 : f32 to vector<8x4096xf32>
    %4 = arith.maximumf %2, %3 : vector<8x4096xf32>
    %c0_4 = arith.constant 0 : index
    %c0_5 = arith.constant 0 : index
    %5 = vector.load %arg3[%c0_4, %c0_5] : memref<4096x64xf32, #tpu.memory_space<vmem>>, vector<4096x64xf32>
    %cst_6 = arith.constant dense<0.000000e+00> : vector<8x64xf32>
    %6 = tpu.matmul %4, %5, %cst_6 {dimension_numbers = #tpu.dot_dimension_numbers<[1], [0], [0], [1], [0, 0, 1, 1], [], []>} : vector<8x4096xf32>, vector<4096x64xf32>, vector<8x64xf32> -> vector<8x64xf32>
    %c0_7 = arith.constant 0 : index
    %c0_8 = arith.constant 0 : index
    %7 = vector.load %arg4[%c0_7, %c0_8] : memref<1x64xf32, #tpu.memory_space<vmem>>, vector<1x64xf32>
    %8 = vector.broadcast %7 : vector<1x64xf32> to vector<8x64xf32>
    %9 = arith.addf %6, %8 : vector<8x64xf32>
    %cst_9 = arith.constant 0.000000e+00 : f32
    %10 = vector.broadcast %cst_9 : f32 to vector<8x64xf32>
    %11 = arith.maximumf %9, %10 : vector<8x64xf32>
    %c0_10 = arith.constant 0 : index
    %c0_11 = arith.constant 0 : index
    %12 = vector.load %arg5[%c0_10, %c0_11] : memref<64x256xf32, #tpu.memory_space<vmem>>, vector<64x256xf32>
    %cst_12 = arith.constant dense<0.000000e+00> : vector<8x256xf32>
    %13 = tpu.matmul %11, %12, %cst_12 {dimension_numbers = #tpu.dot_dimension_numbers<[1], [0], [0], [1], [0, 0, 1, 1], [], []>} : vector<8x64xf32>, vector<64x256xf32>, vector<8x256xf32> -> vector<8x256xf32>
    %c0_13 = arith.constant 0 : index
    %c0_14 = arith.constant 0 : index
    %14 = vector.load %arg6[%c0_13, %c0_14] : memref<1x256xf32, #tpu.memory_space<vmem>>, vector<1x256xf32>
    %15 = vector.broadcast %14 : vector<1x256xf32> to vector<8x256xf32>
    %16 = arith.addf %13, %15 : vector<8x256xf32>
    %cst_15 = arith.constant 0.000000e+00 : f32
    %17 = vector.broadcast %cst_15 : f32 to vector<8x256xf32>
    %18 = arith.maximumf %16, %17 : vector<8x256xf32>
    %c0_16 = arith.constant 0 : index
    %c0_17 = arith.constant 0 : index
    %19 = vector.load %arg7[%c0_16, %c0_17] : memref<256x128xf32, #tpu.memory_space<vmem>>, vector<256x128xf32>
    %cst_18 = arith.constant dense<0.000000e+00> : vector<8x128xf32>
    %20 = tpu.matmul %18, %19, %cst_18 {dimension_numbers = #tpu.dot_dimension_numbers<[1], [0], [0], [1], [0, 0, 1, 1], [], []>} : vector<8x256xf32>, vector<256x128xf32>, vector<8x128xf32> -> vector<8x128xf32>
    %c0_19 = arith.constant 0 : index
    %c0_20 = arith.constant 0 : index
    %21 = vector.load %arg8[%c0_19, %c0_20] : memref<1x128xf32, #tpu.memory_space<vmem>>, vector<1x128xf32>
    %22 = vector.broadcast %21 : vector<1x128xf32> to vector<8x128xf32>
    %23 = arith.addf %20, %22 : vector<8x128xf32>
    %c0_21 = arith.constant 0 : index
    %c0_22 = arith.constant 0 : index
    %24 = vector.load %arg9[%c0_21, %c0_22] : memref<8x128xf32, #tpu.memory_space<vmem>>, vector<8x128xf32>
    tpu.vector_store %arg9[%c0_21, %c0_22], %23 {strides = array<i32>} : memref<8x128xf32, #tpu.memory_space<vmem>>, vector<8x128xf32>,
    return
  }
  func.func @transform_0(%arg0: i32) -> (i32, i32) {
    %c0_i32 = arith.constant 0 : i32
    %c0_i32_0 = arith.constant 0 : i32
    return %arg0, %c0_i32 : i32, i32
  }
  func.func @transform_1(%arg0: i32) -> (i32, i32) {
    %c0_i32 = arith.constant 0 : i32
    %c0_i32_0 = arith.constant 0 : i32
    %c0_i32_1 = arith.constant 0 : i32
    return %c0_i32, %c0_i32_0 : i32, i32
  }
  func.func @transform_2(%arg0: i32) -> (i32, i32) {
    %c0_i32 = arith.constant 0 : i32
    %c0_i32_0 = arith.constant 0 : i32
    %c0_i32_1 = arith.constant 0 : i32
    return %c0_i32, %c0_i32_0 : i32, i32
  }
  func.func @transform_3(%arg0: i32) -> (i32, i32) {
    %c0_i32 = arith.constant 0 : i32
    %c0_i32_0 = arith.constant 0 : i32
    %c0_i32_1 = arith.constant 0 : i32
    return %c0_i32, %c0_i32_0 : i32, i32
  }
  func.func @transform_4(%arg0: i32) -> (i32, i32) {
    %c0_i32 = arith.constant 0 : i32
    %c0_i32_0 = arith.constant 0 : i32
    %c0_i32_1 = arith.constant 0 : i32
    return %c0_i32, %c0_i32_0 : i32, i32
  }
  func.func @transform_5(%arg0: i32) -> (i32, i32) {
    %c0_i32 = arith.constant 0 : i32
    %c0_i32_0 = arith.constant 0 : i32
    %c0_i32_1 = arith.constant 0 : i32
    return %c0_i32, %c0_i32_0 : i32, i32
  }
  func.func @transform_6(%arg0: i32) -> (i32, i32) {
    %c0_i32 = arith.constant 0 : i32
    %c0_i32_0 = arith.constant 0 : i32
    %c0_i32_1 = arith.constant 0 : i32
    return %c0_i32, %c0_i32_0 : i32, i32
  }
  func.func @transform_7(%arg0: i32) -> (i32, i32) {
    %c0_i32 = arith.constant 0 : i32
    %c0_i32_0 = arith.constant 0 : i32
    %c0_i32_1 = arith.constant 0 : i32
    return %c0_i32, %c0_i32_0 : i32, i32
  }
  func.func @transform_8(%arg0: i32) -> (i32, i32) {
    %c0_i32 = arith.constant 0 : i32
    %c0_i32_0 = arith.constant 0 : i32
    return %arg0, %c0_i32 : i32, i32
  }
}

</mosaic_0001>

<bundles_post_ra>
// kernel: tpu_custom_call.1
= control target key start
LH: loop header
LB: loop body
LE: loop exit
PB: predicated region body
PF: predicated region fallthrough
CT: control target
= control target key end

     0   :  { %v4817_v7 = vmov 0.0   ;;  %vm319_vm0 = vcmask 588800   ;;  %s7559_s0 = inlined_call_operand.vmem [shape: f32[8,72], index: 0, kind: input, shape index: {}]   ;;  %s7560_s1 = inlined_call_operand.vmem [shape: f32[72,4096], index: 1, kind: input, shape index: {}]   ;;  %s7561_s2 = inlined_call_operand.vmem [shape: f32[4096,64], index: 2, kind: input, shape index: {}]   ;;  %s7562_s3 = inlined_call_operand.vmem [shape: f32[1,64], index: 3, kind: input, shape index: {}]   ;;  %s7563_s4 = inlined_call_operand.vmem [shape: f32[64,256], index: 4, kind: input, shape index: {}]   ;;  %s7564_s5 = inlined_call_operand.vmem [shape: f32[1,256], index: 5, kind: input, shape index: {}]   ;;  %s7565_s6 = inlined_call_operand.vmem [shape: f32[256,128], index: 6, kind: input, shape index: {}]   ;;  %s7566_s7 = inlined_call_operand.vmem [shape: f32[1,128], index: 7, kind: input, shape index: {}]   ;;  %s7567_s8 = inlined_call_operand.hbm [shape: f32[8,128], index: 8, kind: output, shape index: {}]  }
   0x1   :  { %v32_v0 = vld [vmem:[%s7560_s1 + $0x8] sm:$0xff]  ;;  %v34_v2 = vld [vmem:[%s7560_s1 + $0x18] sm:$0xff]  ;;  %v31_v5 = vld [vmem:[%s7560_s1] sm:$0xff]  ;;  %387 = vmatprep.mubr.f32.mxu0 %v4817_v7  ;;  %458 = vmatprep.mubr.f32.mxu1 %v4817_v7 }
   0x2   :  { %v64_v1 = vld [vmem:[%s7560_s1 + $0x108] sm:$0xff]  ;;  %v66_v4 = vld [vmem:[%s7560_s1 + $0x118] sm:$0xff]  ;;  %v63_v6 = vld [vmem:[%s7560_s1 + $0x100] sm:$0xff] }
   0x3   :  { %v3974_v3 = vpack.c.bf16 %v64_v1, %v32_v0  ;;  %v3990_v8 = vpack.c.bf16 %v66_v4, %v34_v2  ;;  %v3976_v9 = vpack.c.bf16 %v63_v6, %v31_v5  ;;  %v33_v10 = vld [vmem:[%s7560_s1 + $0x10] sm:$0xff]  ;;  %v96_v12 = vld [vmem:[%s7560_s1 + $0x208] sm:$0xff]  ;;  %v98_v15 = vld [vmem:[%s7560_s1 + $0x218] sm:$0xff] }
   0x4   :  { %v65_v11 = vld [vmem:[%s7560_s1 + $0x110] sm:$0xff]  ;;  %v128_v14 = vld [vmem:[%s7560_s1 + $0x308] sm:$0xff]  ;;  %v130_v16 = vld [vmem:[%s7560_s1 + $0x318] sm:$0xff] }
   0x5   :  { %3975 = vmatprep.subr.bf16.mxu0 %v3974_v3  ;;  %v3992_v13 = vpack.c.bf16 %v65_v11, %v33_v10  ;;  %3991 = vmatprep.subr.bf16.mxu1 %v3990_v8  ;;  %v3978_v17 = vpack.c.bf16 %v128_v14, %v96_v12  ;;  %v3994_v18 = vpack.c.bf16 %v130_v16, %v98_v15  ;;  %v95_v19 = vld [vmem:[%s7560_s1 + $0x200] sm:$0xff]  ;;  %v97_v21 = vld [vmem:[%s7560_s1 + $0x210] sm:$0xff]  ;;  %v160_v24 = vld [vmem:[%s7560_s1 + $0x408] sm:$0xff] }
   0x6   :  { %3977 = vmatpush1.bf16.msra.mxu0 %v3976_v9  ;;  %v127_v20 = vld [vmem:[%s7560_s1 + $0x300] sm:$0xff]  ;;  %v129_v23 = vld [vmem:[%s7560_s1 + $0x310] sm:$0xff]  ;;  %v192_v25 = vld [vmem:[%s7560_s1 + $0x508] sm:$0xff] }
   0x7   :  { %3993 = vmatpush1.bf16.msra.mxu1 %v3992_v13  ;;  %v3980_v22 = vpack.c.bf16 %v127_v20, %v95_v19  ;;  %3979 = vmatprep.subr.bf16.mxu0 %v3978_v17  ;;  %v3996_v26 = vpack.c.bf16 %v129_v23, %v97_v21  ;;  %v3982_v27 = vpack.c.bf16 %v192_v25, %v160_v24  ;;  %v162_v28 = vld [vmem:[%s7560_s1 + $0x418] sm:$0xff]  ;;  %v159_v30 = vld [vmem:[%s7560_s1 + $0x400] sm:$0xff]  ;;  %v161_v33 = vld [vmem:[%s7560_s1 + $0x410] sm:$0xff] }
   0x8   :  { %3995 = vmatprep.subr.bf16.mxu1 %v3994_v18  ;;  %v194_v29 = vld [vmem:[%s7560_s1 + $0x518] sm:$0xff]  ;;  %v191_v32 = vld [vmem:[%s7560_s1 + $0x500] sm:$0xff]  ;;  %v193_v34 = vld [vmem:[%s7560_s1 + $0x510] sm:$0xff] }
   0x9   :  { %v3998_v31 = vpack.c.bf16 %v194_v29, %v162_v28  ;;  %v3984_v35 = vpack.c.bf16 %v191_v32, %v159_v30  ;;  %v224_v36 = vld [vmem:[%s7560_s1 + $0x608] sm:$0xff]  ;;  %v226_v38 = vld [vmem:[%s7560_s1 + $0x618] sm:$0xff]  ;;  %v4000_v39 = vpack.c.bf16 %v193_v34, %v161_v33  ;;  %v223_v42 = vld [vmem:[%s7560_s1 + $0x600] sm:$0xff] }
   0xa   :  { %3981 = vmatpush1.bf16.msra.mxu0 %v3980_v22  ;;  %v256_v37 = vld [vmem:[%s7560_s1 + $0x708] sm:$0xff]  ;;  %v258_v41 = vld [vmem:[%s7560_s1 + $0x718] sm:$0xff]  ;;  %v255_v43 = vld [vmem:[%s7560_s1 + $0x700] sm:$0xff] }
   0xb   :  { %3997 = vmatpush1.bf16.msra.mxu1 %v3996_v26  ;;  %3983 = vmatprep.subr.bf16.mxu0 %v3982_v27  ;;  %v3986_v40 = vpack.c.bf16 %v256_v37, %v224_v36  ;;  %v4002_v44 = vpack.c.bf16 %v258_v41, %v226_v38  ;;  %v225_v45 = vld [vmem:[%s7560_s1 + $0x610] sm:$0xff]  ;;  %v3988_v47 = vpack.c.bf16 %v255_v43, %v223_v42  ;;  %v288_v49 = vld [vmem:[%s7560_s1 + $0x808] sm:$0xff]  ;;  %v290_v50 = vld [vmem:[%s7560_s1 + $0x818] sm:$0xff] }
   0xc   :  { %3999 = vmatprep.subr.bf16.mxu1 %v3998_v31  ;;  %v257_v46 = vld [vmem:[%s7560_s1 + $0x710] sm:$0xff]  ;;  %v36_v51 = vld [vmem:[%s7560_s1 + $0x28] sm:$0xff]  ;;  %v287_v52 = vld [vmem:[%s7560_s1 + $0x800] sm:$0xff] }
   0xd   :  { %v4004_v48 = vpack.c.bf16 %v257_v46, %v225_v45  ;;  %v68_v53 = vld [vmem:[%s7560_s1 + $0x128] sm:$0xff]  ;;  %v38_v54 = vld [vmem:[%s7560_s1 + $0x38] sm:$0xff]  ;;  %v289_v56 = vld [vmem:[%s7560_s1 + $0x810] sm:$0xff] }
   0xe   :  { %3985 = vmatpush1.bf16.msra.mxu0 %v3984_v35  ;;  %v70_v55 = vld [vmem:[%s7560_s1 + $0x138] sm:$0xff]  ;;  %v35_v57 = vld [vmem:[%s7560_s1 + $0x20] sm:$0xff]  ;;  %v37_v59 = vld [vmem:[%s7560_s1 + $0x30] sm:$0xff]  ;;  %v4006_v0 = vpack.c.bf16 %v68_v53, %v36_v51 }
   0xf   :  { %4001 = vmatpush1.bf16.msra.mxu1 %v4000_v39  ;;  %3987 = vmatprep.subr.bf16.mxu0 %v3986_v40  ;;  %v67_v58 = vld [vmem:[%s7560_s1 + $0x120] sm:$0xff]  ;;  %v69_v60 = vld [vmem:[%s7560_s1 + $0x130] sm:$0xff]  ;;  %v100_v61 = vld [vmem:[%s7560_s1 + $0x228] sm:$0xff]  ;;  %v4022_v3 = vpack.c.bf16 %v70_v55, %v38_v54 }
  0x10   :  { %4003 = vmatprep.subr.bf16.mxu1 %v4002_v44  ;;  %v132_v62 = vld [vmem:[%s7560_s1 + $0x328] sm:$0xff]  ;;  %v5007_v63 = vld [vmem:[%s7559_s0] sm:$0xff]  ;;  %v102_v1 = vld [vmem:[%s7560_s1 + $0x238] sm:$0xff]  ;;  %v4008_v4 = vpack.c.bf16 %v67_v58, %v35_v57  ;;  %v4024_v5 = vpack.c.bf16 %v69_v60, %v37_v59 }
  0x11   :  { %v134_v2 = vld [vmem:[%s7560_s1 + $0x338] sm:$0xff]  ;;  %v4010_v6 = vpack.c.bf16 %v132_v62, %v100_v61  ;;  %v99_v8 = vld [vmem:[%s7560_s1 + $0x220] sm:$0xff]  ;;  %v101_v10 = vld [vmem:[%s7560_s1 + $0x230] sm:$0xff] }
  0x12   :  { %3989 = vmatpush1.bf16.msra.mxu0 %v3988_v47  ;;  %v131_v9 = vld [vmem:[%s7560_s1 + $0x320] sm:$0xff]  ;;  %v4026_v11 = vpack.c.bf16 %v134_v2, %v102_v1  ;;  %v133_v12 = vld [vmem:[%s7560_s1 + $0x330] sm:$0xff]  ;;  %v164_v13 = vld [vmem:[%s7560_s1 + $0x428] sm:$0xff] }
  0x13   :  { %4005 = vmatpush1.bf16.msra.mxu1 %v4004_v48  ;;  %339 = vmatprep.subr.mxu0 %v288_v49  ;;  %v196_v14 = vld [vmem:[%s7560_s1 + $0x528] sm:$0xff]  ;;  %v166_v15 = vld [vmem:[%s7560_s1 + $0x438] sm:$0xff]  ;;  %v4012_v17 = vpack.c.bf16 %v131_v9, %v99_v8  ;;  %v4028_v18 = vpack.c.bf16 %v133_v12, %v101_v10  ;;  %v163_v20 = vld [vmem:[%s7560_s1 + $0x420] sm:$0xff] }
  0x14   :  { %410 = vmatprep.subr.mxu1 %v290_v50  ;;  %v198_v16 = vld [vmem:[%s7560_s1 + $0x538] sm:$0xff]  ;;  %v4014_v19 = vpack.c.bf16 %v196_v14, %v164_v13  ;;  %v195_v21 = vld [vmem:[%s7560_s1 + $0x520] sm:$0xff]  ;;  %v165_v22 = vld [vmem:[%s7560_s1 + $0x430] sm:$0xff] }
  0x15   :  { %v4030_v23 = vpack.c.bf16 %v198_v16, %v166_v15  ;;  %v197_v24 = vld [vmem:[%s7560_s1 + $0x530] sm:$0xff]  ;;  %v228_v25 = vld [vmem:[%s7560_s1 + $0x628] sm:$0xff]  ;;  %v230_v27 = vld [vmem:[%s7560_s1 + $0x638] sm:$0xff]  ;;  %v4016_v29 = vpack.c.bf16 %v195_v21, %v163_v20 }
  0x16   :  { %340 = vmatpush1.msra.mxu0 %v287_v52  ;;  %v260_v26 = vld [vmem:[%s7560_s1 + $0x728] sm:$0xff]  ;;  %v262_v28 = vld [vmem:[%s7560_s1 + $0x738] sm:$0xff]  ;;  %v4032_v30 = vpack.c.bf16 %v197_v24, %v165_v22  ;;  %v227_v32 = vld [vmem:[%s7560_s1 + $0x620] sm:$0xff] }
  0x17   :  { %411 = vmatpush1.msra.mxu1 %v289_v56  ;;  %3360 = vmatmul.mubr.msk.f32.vlgmr.msra.gmra.mrb[0].mxu0 %vm319_vm0, %v5007_v63  ;;  %v4018_v31 = vpack.c.bf16 %v260_v26, %v228_v25  ;;  %v259_v33 = vld [vmem:[%s7560_s1 + $0x720] sm:$0xff]  ;;  %v4034_v34 = vpack.c.bf16 %v262_v28, %v230_v27  ;;  %v229_v35 = vld [vmem:[%s7560_s1 + $0x630] sm:$0xff]  ;;  %v292_v39 = vld [vmem:[%s7560_s1 + $0x828] sm:$0xff] }
  0x18   :  { %3361 = vmatmul.mubr.msk.f32.vlgmr.msra.gmra.mrb[0].mxu1 %vm319_vm0, %v5007_v63  ;;  %4007 = vmatprep.subr.bf16.mxu0 %v4006_v0  ;;  %v261_v36 = vld [vmem:[%s7560_s1 + $0x730] sm:$0xff]  ;;  %v4020_v37 = vpack.c.bf16 %v259_v33, %v227_v32  ;;  %v294_v40 = vld [vmem:[%s7560_s1 + $0x838] sm:$0xff]  ;;  %v40_v41 = vld [vmem:[%s7560_s1 + $0x48] sm:$0xff] }
  0x19   :  { %4023 = vmatprep.subr.bf16.mxu1 %v4022_v3  ;;  %4009 = vmatpush1.bf16.msra.mxu0 %v4008_v4  ;;  %v4036_v38 = vpack.c.bf16 %v261_v36, %v229_v35  ;;  %v291_v42 = vld [vmem:[%s7560_s1 + $0x820] sm:$0xff]  ;;  %v72_v43 = vld [vmem:[%s7560_s1 + $0x148] sm:$0xff]  ;;  %v42_v44 = vld [vmem:[%s7560_s1 + $0x58] sm:$0xff] }
  0x1a   :  { %4025 = vmatpush1.bf16.msra.mxu1 %v4024_v5  ;;  %4011 = vmatprep.subr.bf16.mxu0 %v4010_v6  ;;  %v74_v45 = vld [vmem:[%s7560_s1 + $0x158] sm:$0xff]  ;;  %v39_v46 = vld [vmem:[%s7560_s1 + $0x40] sm:$0xff]  ;;  %v41_v48 = vld [vmem:[%s7560_s1 + $0x50] sm:$0xff]  ;;  %v4038_v53 = vpack.c.bf16 %v72_v43, %v40_v41 }
  0x1b   :  { %4027 = vmatprep.subr.bf16.mxu1 %v4026_v11  ;;  %529 = vmatprep.mubr.f32.mxu0 %v4817_v7  ;;  %v71_v47 = vld [vmem:[%s7560_s1 + $0x140] sm:$0xff]  ;;  %v73_v49 = vld [vmem:[%s7560_s1 + $0x150] sm:$0xff]  ;;  %v104_v50 = vld [vmem:[%s7560_s1 + $0x248] sm:$0xff]  ;;  %v4054_v56 = vpack.c.bf16 %v74_v45, %v42_v44 }
  0x1c   :  { %600 = vmatprep.mubr.f32.mxu1 %v4817_v7  ;;  %v136_v51 = vld [vmem:[%s7560_s1 + $0x348] sm:$0xff]  ;;  %v293_v52 = vld [vmem:[%s7560_s1 + $0x830] sm:$0xff]  ;;  %v106_v54 = vld [vmem:[%s7560_s1 + $0x258] sm:$0xff]  ;;  %v4040_v57 = vpack.c.bf16 %v71_v47, %v39_v46  ;;  %v4056_v58 = vpack.c.bf16 %v73_v49, %v41_v48 }
  0x1d   :  { %4013 = vmatpush1.bf16.msra.mxu0 %v4012_v17  ;;  %v138_v55 = vld [vmem:[%s7560_s1 + $0x358] sm:$0xff]  ;;  %v4042_v59 = vpack.c.bf16 %v136_v51, %v104_v50  ;;  %v103_v60 = vld [vmem:[%s7560_s1 + $0x240] sm:$0xff]  ;;  %v105_v62 = vld [vmem:[%s7560_s1 + $0x250] sm:$0xff] }
  0x1e   :  { %4029 = vmatpush1.bf16.msra.mxu1 %v4028_v18  ;;  %4015 = vmatprep.subr.bf16.mxu0 %v4014_v19  ;;  %v135_v61 = vld [vmem:[%s7560_s1 + $0x340] sm:$0xff]  ;;  %v4058_v0 = vpack.c.bf16 %v138_v55, %v106_v54  ;;  %v137_v1 = vld [vmem:[%s7560_s1 + $0x350] sm:$0xff]  ;;  %v168_v2 = vld [vmem:[%s7560_s1 + $0x448] sm:$0xff] }
  0x1f   :  { %4031 = vmatprep.subr.bf16.mxu1 %v4030_v23  ;;  %v200_v3 = vld [vmem:[%s7560_s1 + $0x548] sm:$0xff]  ;;  %v170_v4 = vld [vmem:[%s7560_s1 + $0x458] sm:$0xff]  ;;  %v4044_v6 = vpack.c.bf16 %v135_v61, %v103_v60  ;;  %v4060_v8 = vpack.c.bf16 %v137_v1, %v105_v62  ;;  %v167_v10 = vld [vmem:[%s7560_s1 + $0x440] sm:$0xff] }
  0x20   :  { %v202_v5 = vld [vmem:[%s7560_s1 + $0x558] sm:$0xff]  ;;  %v4046_v9 = vpack.c.bf16 %v200_v3, %v168_v2  ;;  %v199_v11 = vld [vmem:[%s7560_s1 + $0x540] sm:$0xff]  ;;  %v169_v12 = vld [vmem:[%s7560_s1 + $0x450] sm:$0xff] }
  0x21   :  { %4017 = vmatpush1.bf16.msra.mxu0 %v4016_v29  ;;  %v4062_v13 = vpack.c.bf16 %v202_v5, %v170_v4  ;;  %v201_v14 = vld [vmem:[%s7560_s1 + $0x550] sm:$0xff]  ;;  %v232_v15 = vld [vmem:[%s7560_s1 + $0x648] sm:$0xff]  ;;  %v234_v17 = vld [vmem:[%s7560_s1 + $0x658] sm:$0xff]  ;;  %v4048_v19 = vpack.c.bf16 %v199_v11, %v167_v10 }
  0x22   :  { %4033 = vmatpush1.bf16.msra.mxu1 %v4032_v30  ;;  %4019 = vmatprep.subr.bf16.mxu0 %v4018_v31  ;;  %v264_v16 = vld [vmem:[%s7560_s1 + $0x748] sm:$0xff]  ;;  %v266_v18 = vld [vmem:[%s7560_s1 + $0x758] sm:$0xff]  ;;  %v4064_v20 = vpack.c.bf16 %v201_v14, %v169_v12  ;;  %v231_v22 = vld [vmem:[%s7560_s1 + $0x640] sm:$0xff] }
  0x23   :  { %4035 = vmatprep.subr.bf16.mxu1 %v4034_v34  ;;  %v4050_v21 = vpack.c.bf16 %v264_v16, %v232_v15  ;;  %v263_v23 = vld [vmem:[%s7560_s1 + $0x740] sm:$0xff]  ;;  %v4066_v24 = vpack.c.bf16 %v266_v18, %v234_v17  ;;  %v233_v25 = vld [vmem:[%s7560_s1 + $0x650] sm:$0xff]  ;;  %v296_v29 = vld [vmem:[%s7560_s1 + $0x848] sm:$0xff] }
  0x24   :  { %v265_v26 = vld [vmem:[%s7560_s1 + $0x750] sm:$0xff]  ;;  %v4052_v27 = vpack.c.bf16 %v263_v23, %v231_v22  ;;  %v298_v30 = vld [vmem:[%s7560_s1 + $0x858] sm:$0xff]  ;;  %v44_v31 = vld [vmem:[%s7560_s1 + $0x68] sm:$0xff] }
  0x25   :  { %4021 = vmatpush1.bf16.msra.mxu0 %v4020_v37  ;;  %v4068_v28 = vpack.c.bf16 %v265_v26, %v233_v25  ;;  %v295_v32 = vld [vmem:[%s7560_s1 + $0x840] sm:$0xff]  ;;  %v76_v33 = vld [vmem:[%s7560_s1 + $0x168] sm:$0xff]  ;;  %v46_v34 = vld [vmem:[%s7560_s1 + $0x78] sm:$0xff] }
  0x26   :  { %4037 = vmatpush1.bf16.msra.mxu1 %v4036_v38  ;;  %481 = vmatprep.subr.mxu0 %v292_v39  ;;  %v78_v35 = vld [vmem:[%s7560_s1 + $0x178] sm:$0xff]  ;;  %v43_v36 = vld [vmem:[%s7560_s1 + $0x60] sm:$0xff]  ;;  %v45_v38 = vld [vmem:[%s7560_s1 + $0x70] sm:$0xff]  ;;  %v4070_v43 = vpack.c.bf16 %v76_v33, %v44_v31 }
  0x27   :  { %552 = vmatprep.subr.mxu1 %v294_v40  ;;  %v75_v37 = vld [vmem:[%s7560_s1 + $0x160] sm:$0xff]  ;;  %v77_v39 = vld [vmem:[%s7560_s1 + $0x170] sm:$0xff]  ;;  %v108_v40 = vld [vmem:[%s7560_s1 + $0x268] sm:$0xff]  ;;  %v4086_v46 = vpack.c.bf16 %v78_v35, %v46_v34 }
  0x28   :  { %v140_v41 = vld [vmem:[%s7560_s1 + $0x368] sm:$0xff]  ;;  %v110_v44 = vld [vmem:[%s7560_s1 + $0x278] sm:$0xff]  ;;  %v4072_v47 = vpack.c.bf16 %v75_v37, %v43_v36  ;;  %v4088_v48 = vpack.c.bf16 %v77_v39, %v45_v38  ;;  %v107_v50 = vld [vmem:[%s7560_s1 + $0x260] sm:$0xff] }
  0x29   :  { %482 = vmatpush1.msra.mxu0 %v291_v42  ;;  %v297_v42 = vld [vmem:[%s7560_s1 + $0x850] sm:$0xff]  ;;  %v142_v45 = vld [vmem:[%s7560_s1 + $0x378] sm:$0xff]  ;;  %v4074_v49 = vpack.c.bf16 %v140_v41, %v108_v40  ;;  %v139_v51 = vld [vmem:[%s7560_s1 + $0x360] sm:$0xff] }
  0x2a   :  { %553 = vmatpush1.msra.mxu1 %v293_v52  ;;  %3362 = vmatmul.mubr.msk.f32.vlgmr.msra.gmra.mrb[2].mxu0 %vm319_vm0, %v5007_v63  ;;  %v109_v52 = vld [vmem:[%s7560_s1 + $0x270] sm:$0xff]  ;;  %v172_v55 = vld [vmem:[%s7560_s1 + $0x468] sm:$0xff]  ;;  %v171_v62 = vld [vmem:[%s7560_s1 + $0x460] sm:$0xff] }
  0x2b   :  { %3363 = vmatmul.mubr.msk.f32.vlgmr.msra.gmra.mrb[2].mxu1 %vm319_vm0, %v5007_v63  ;;  %4039 = vmatprep.subr.bf16.mxu0 %v4038_v53  ;;  %v4090_v53 = vpack.c.bf16 %v142_v45, %v110_v44  ;;  %v141_v54 = vld [vmem:[%s7560_s1 + $0x370] sm:$0xff]  ;;  %v236_v4 = vld [vmem:[%s7560_s1 + $0x668] sm:$0xff]  ;;  %v235_v12 = vld [vmem:[%s7560_s1 + $0x660] sm:$0xff] }
  0x2c   :  { %4055 = vmatprep.subr.bf16.mxu1 %v4054_v56  ;;  %4041 = vmatpush1.bf16.msra.mxu0 %v4040_v57  ;;  %v204_v56 = vld [vmem:[%s7560_s1 + $0x568] sm:$0xff]  ;;  %v174_v57 = vld [vmem:[%s7560_s1 + $0x478] sm:$0xff]  ;;  %v4092_v60 = vpack.c.bf16 %v141_v54, %v109_v52  ;;  %v173_v1 = vld [vmem:[%s7560_s1 + $0x470] sm:$0xff] }
  0x2d   :  { %4057 = vmatpush1.bf16.msra.mxu1 %v4056_v58  ;;  %4043 = vmatprep.subr.bf16.mxu0 %v4042_v59  ;;  %v206_v58 = vld [vmem:[%s7560_s1 + $0x578] sm:$0xff]  ;;  %v4076_v59 = vpack.c.bf16 %v139_v51, %v107_v50  ;;  %v4078_v61 = vpack.c.bf16 %v204_v56, %v172_v55  ;;  %v205_v3 = vld [vmem:[%s7560_s1 + $0x570] sm:$0xff]  ;;  %v268_v5 = vld [vmem:[%s7560_s1 + $0x768] sm:$0xff] }
  0x2e   :  { %4059 = vmatprep.subr.bf16.mxu1 %v4058_v0  ;;  %671 = vmatprep.mubr.f32.mxu0 %v4817_v7  ;;  %v203_v0 = vld [vmem:[%s7560_s1 + $0x560] sm:$0xff]  ;;  %v4094_v2 = vpack.c.bf16 %v206_v58, %v174_v57  ;;  %v4096_v10 = vpack.c.bf16 %v205_v3, %v173_v1  ;;  %v4082_v11 = vpack.c.bf16 %v268_v5, %v236_v4  ;;  %v237_v15 = vld [vmem:[%s7560_s1 + $0x670] sm:$0xff]  ;;  %v80_v23 = vld [vmem:[%s7560_s1 + $0x188] sm:$0xff] }
  0x2f   :  { %742 = vmatprep.mubr.f32.mxu1 %v4817_v7  ;;  %v269_v16 = vld [vmem:[%s7560_s1 + $0x770] sm:$0xff]  ;;  %v299_v22 = vld [vmem:[%s7560_s1 + $0x860] sm:$0xff]  ;;  %v82_v25 = vld [vmem:[%s7560_s1 + $0x198] sm:$0xff] }
  0x30   :  { %4045 = vmatpush1.bf16.msra.mxu0 %v4044_v6  ;;  %v238_v6 = vld [vmem:[%s7560_s1 + $0x678] sm:$0xff]  ;;  %v4100_v18 = vpack.c.bf16 %v269_v16, %v237_v15  ;;  %v47_v26 = vld [vmem:[%s7560_s1 + $0x80] sm:$0xff]  ;;  %v144_v31 = vld [vmem:[%s7560_s1 + $0x388] sm:$0xff] }
  0x31   :  { %4061 = vmatpush1.bf16.msra.mxu1 %v4060_v8  ;;  %4047 = vmatprep.subr.bf16.mxu0 %v4046_v9  ;;  %v270_v8 = vld [vmem:[%s7560_s1 + $0x778] sm:$0xff]  ;;  %v4080_v9 = vpack.c.bf16 %v203_v0, %v171_v62  ;;  %v111_v40 = vld [vmem:[%s7560_s1 + $0x280] sm:$0xff]  ;;  %v145_v44 = vld [vmem:[%s7560_s1 + $0x390] sm:$0xff] }
  0x32   :  { %4063 = vmatprep.subr.bf16.mxu1 %v4062_v13  ;;  %v267_v13 = vld [vmem:[%s7560_s1 + $0x760] sm:$0xff]  ;;  %v4098_v14 = vpack.c.bf16 %v270_v8, %v238_v6  ;;  %v114_v34 = vld [vmem:[%s7560_s1 + $0x298] sm:$0xff]  ;;  %v176_v45 = vld [vmem:[%s7560_s1 + $0x488] sm:$0xff] }
  0x33   :  { %v4084_v17 = vpack.c.bf16 %v267_v13, %v235_v12  ;;  %v146_v35 = vld [vmem:[%s7560_s1 + $0x398] sm:$0xff]  ;;  %v143_v41 = vld [vmem:[%s7560_s1 + $0x380] sm:$0xff]  ;;  %v177_v54 = vld [vmem:[%s7560_s1 + $0x490] sm:$0xff] }
  0x34   :  { %4049 = vmatpush1.bf16.msra.mxu0 %v4048_v19  ;;  %v300_v19 = vld [vmem:[%s7560_s1 + $0x868] sm:$0xff]  ;;  %v175_v52 = vld [vmem:[%s7560_s1 + $0x480] sm:$0xff]  ;;  %v209_v56 = vld [vmem:[%s7560_s1 + $0x590] sm:$0xff] }
  0x35   :  { %4065 = vmatpush1.bf16.msra.mxu1 %v4064_v20  ;;  %4051 = vmatprep.subr.bf16.mxu0 %v4050_v21  ;;  %v302_v20 = vld [vmem:[%s7560_s1 + $0x878] sm:$0xff]  ;;  %v48_v21 = vld [vmem:[%s7560_s1 + $0x88] sm:$0xff]  ;;  %v4128_v62 = vpack.c.bf16 %v209_v56, %v177_v54  ;;  %v239_v1 = vld [vmem:[%s7560_s1 + $0x680] sm:$0xff] }
  0x36   :  { %4067 = vmatprep.subr.bf16.mxu1 %v4066_v24  ;;  %v50_v24 = vld [vmem:[%s7560_s1 + $0x98] sm:$0xff]  ;;  %v4102_v33 = vpack.c.bf16 %v80_v23, %v48_v21  ;;  %v240_v57 = vld [vmem:[%s7560_s1 + $0x688] sm:$0xff]  ;;  %v241_v4 = vld [vmem:[%s7560_s1 + $0x690] sm:$0xff] }
  0x37   :  { %v4118_v36 = vpack.c.bf16 %v82_v25, %v50_v24  ;;  %v272_v58 = vld [vmem:[%s7560_s1 + $0x788] sm:$0xff]  ;;  %v273_v5 = vld [vmem:[%s7560_s1 + $0x790] sm:$0xff]  ;;  %v303_v12 = vld [vmem:[%s7560_s1 + $0x880] sm:$0xff] }
  0x38   :  { %4053 = vmatpush1.bf16.msra.mxu0 %v4052_v27  ;;  %v79_v27 = vld [vmem:[%s7560_s1 + $0x180] sm:$0xff]  ;;  %v4114_v0 = vpack.c.bf16 %v272_v58, %v240_v57  ;;  %v4132_v8 = vpack.c.bf16 %v273_v5, %v241_v4  ;;  %v84_v13 = vld [vmem:[%s7560_s1 + $0x1a8] sm:$0xff]  ;;  %v86_v15 = vld [vmem:[%s7560_s1 + $0x1b8] sm:$0xff] }
  0x39   :  { %4069 = vmatpush1.bf16.msra.mxu1 %v4068_v28  ;;  %623 = vmatprep.subr.mxu0 %v296_v29  ;;  %v49_v28 = vld [vmem:[%s7560_s1 + $0x90] sm:$0xff]  ;;  %v4104_v37 = vpack.c.bf16 %v79_v27, %v47_v26  ;;  %v51_v16 = vld [vmem:[%s7560_s1 + $0xa0] sm:$0xff]  ;;  %v148_v21 = vld [vmem:[%s7560_s1 + $0x3a8] sm:$0xff] }
  0x3a   :  { %694 = vmatprep.subr.mxu1 %v298_v30  ;;  %v81_v29 = vld [vmem:[%s7560_s1 + $0x190] sm:$0xff]  ;;  %v112_v30 = vld [vmem:[%s7560_s1 + $0x288] sm:$0xff]  ;;  %v118_v24 = vld [vmem:[%s7560_s1 + $0x2b8] sm:$0xff] }
  0x3b   :  { %v4120_v38 = vpack.c.bf16 %v81_v29, %v49_v28  ;;  %v4106_v39 = vpack.c.bf16 %v144_v31, %v112_v30  ;;  %v150_v25 = vld [vmem:[%s7560_s1 + $0x3b8] sm:$0xff]  ;;  %v115_v30 = vld [vmem:[%s7560_s1 + $0x2a0] sm:$0xff]  ;;  %v245_v57 = vld [vmem:[%s7560_s1 + $0x6b0] sm:$0xff] }
  0x3c   :  { %624 = vmatpush1.msra.mxu0 %v295_v32  ;;  %v301_v32 = vld [vmem:[%s7560_s1 + $0x870] sm:$0xff]  ;;  %v147_v31 = vld [vmem:[%s7560_s1 + $0x3a0] sm:$0xff]  ;;  %v90_v4 = vld [vmem:[%s7560_s1 + $0x1d8] sm:$0xff] }
  0x3d   :  { %695 = vmatpush1.msra.mxu1 %v297_v42  ;;  %3364 = vmatmul.mubr.msk.f32.vlgmr.msra.gmra.mrb[4].mxu0 %vm319_vm0, %v5007_v63  ;;  %v113_v42 = vld [vmem:[%s7560_s1 + $0x290] sm:$0xff]  ;;  %v243_v54 = vld [vmem:[%s7560_s1 + $0x6a0] sm:$0xff] }
  0x3e   :  { %3365 = vmatmul.mubr.msk.f32.vlgmr.msra.gmra.mrb[4].mxu1 %vm319_vm0, %v5007_v63  ;;  %4071 = vmatprep.subr.bf16.mxu0 %v4070_v43  ;;  %v4122_v43 = vpack.c.bf16 %v146_v35, %v114_v34  ;;  %v4124_v50 = vpack.c.bf16 %v145_v44, %v113_v42  ;;  %v149_v34 = vld [vmem:[%s7560_s1 + $0x3b0] sm:$0xff]  ;;  %v180_v35 = vld [vmem:[%s7560_s1 + $0x4a8] sm:$0xff]  ;;  %v179_v42 = vld [vmem:[%s7560_s1 + $0x4a0] sm:$0xff] }
  0x3f   :  { %4087 = vmatprep.subr.bf16.mxu1 %v4086_v46  ;;  %4073 = vmatpush1.bf16.msra.mxu0 %v4072_v47  ;;  %v208_v46 = vld [vmem:[%s7560_s1 + $0x588] sm:$0xff]  ;;  %v178_v47 = vld [vmem:[%s7560_s1 + $0x498] sm:$0xff]  ;;  %v181_v44 = vld [vmem:[%s7560_s1 + $0x4b0] sm:$0xff] }
  0x40   :  { %4089 = vmatpush1.bf16.msra.mxu1 %v4088_v48  ;;  %4075 = vmatprep.subr.bf16.mxu0 %v4074_v49  ;;  %v210_v48 = vld [vmem:[%s7560_s1 + $0x598] sm:$0xff]  ;;  %v4108_v49 = vpack.c.bf16 %v143_v41, %v111_v40  ;;  %v4110_v51 = vpack.c.bf16 %v208_v46, %v176_v45  ;;  %v213_v46 = vld [vmem:[%s7560_s1 + $0x5b0] sm:$0xff]  ;;  %v55_v5 = vld [vmem:[%s7560_s1 + $0xc0] sm:$0xff] }
  0x41   :  { %4091 = vmatprep.subr.bf16.mxu1 %v4090_v53  ;;  %813 = vmatprep.mubr.f32.mxu0 %v4817_v7  ;;  %v207_v53 = vld [vmem:[%s7560_s1 + $0x580] sm:$0xff]  ;;  %v4126_v55 = vpack.c.bf16 %v210_v48, %v178_v47  ;;  %v244_v47 = vld [vmem:[%s7560_s1 + $0x6a8] sm:$0xff]  ;;  %v277_v58 = vld [vmem:[%s7560_s1 + $0x7b0] sm:$0xff] }
  0x42   :  { %884 = vmatprep.mubr.f32.mxu1 %v4817_v7  ;;  %v276_v48 = vld [vmem:[%s7560_s1 + $0x7a8] sm:$0xff] }
  0x43   :  { %4077 = vmatpush1.bf16.msra.mxu0 %v4076_v59  ;;  %v242_v59 = vld [vmem:[%s7560_s1 + $0x698] sm:$0xff] }
  0x44   :  { %4093 = vmatpush1.bf16.msra.mxu1 %v4092_v60  ;;  %4079 = vmatprep.subr.bf16.mxu0 %v4078_v61  ;;  %v274_v60 = vld [vmem:[%s7560_s1 + $0x798] sm:$0xff]  ;;  %v4112_v61 = vpack.c.bf16 %v207_v53, %v175_v52  ;;  %v4160_v52 = vpack.c.bf16 %v213_v46, %v181_v44  ;;  %v4146_v53 = vpack.c.bf16 %v276_v48, %v244_v47  ;;  %v247_v44 = vld [vmem:[%s7560_s1 + $0x6c0] sm:$0xff]  ;;  %v249_v47 = vld [vmem:[%s7560_s1 + $0x6d0] sm:$0xff] }
  0x45   :  { %4095 = vmatprep.subr.bf16.mxu1 %v4094_v2  ;;  %v271_v2 = vld [vmem:[%s7560_s1 + $0x780] sm:$0xff]  ;;  %v4130_v3 = vpack.c.bf16 %v274_v60, %v242_v59  ;;  %v4164_v60 = vpack.c.bf16 %v277_v58, %v245_v57  ;;  %v281_v48 = vld [vmem:[%s7560_s1 + $0x7d0] sm:$0xff]  ;;  %v94_v57 = vld [vmem:[%s7560_s1 + $0x1f8] sm:$0xff] }
  0x46   :  { %v4116_v6 = vpack.c.bf16 %v271_v2, %v239_v1  ;;  %v307_v1 = vld [vmem:[%s7560_s1 + $0x8a0] sm:$0xff]  ;;  %v88_v2 = vld [vmem:[%s7560_s1 + $0x1c8] sm:$0xff] }
  0x47   :  { %4081 = vmatpush1.bf16.msra.mxu0 %v4080_v9  ;;  %v304_v9 = vld [vmem:[%s7560_s1 + $0x888] sm:$0xff]  ;;  %v59_v58 = vld [vmem:[%s7560_s1 + $0xe0] sm:$0xff] }
  0x48   :  { %4097 = vmatpush1.bf16.msra.mxu1 %v4096_v10  ;;  %4083 = vmatprep.subr.bf16.mxu0 %v4082_v11  ;;  %v306_v10 = vld [vmem:[%s7560_s1 + $0x898] sm:$0xff]  ;;  %v52_v11 = vld [vmem:[%s7560_s1 + $0xa8] sm:$0xff] }
  0x49   :  { %4099 = vmatprep.subr.bf16.mxu1 %v4098_v14  ;;  %v54_v14 = vld [vmem:[%s7560_s1 + $0xb8] sm:$0xff]  ;;  %v4134_v23 = vpack.c.bf16 %v84_v13, %v52_v11  ;;  %v152_v11 = vld [vmem:[%s7560_s1 + $0x3c8] sm:$0xff] }
  0x4a   :  { %v4150_v26 = vpack.c.bf16 %v86_v15, %v54_v14  ;;  %v122_v15 = vld [vmem:[%s7560_s1 + $0x2d8] sm:$0xff] }
  0x4b   :  { %4085 = vmatpush1.bf16.msra.mxu0 %v4084_v17  ;;  %v83_v17 = vld [vmem:[%s7560_s1 + $0x1a0] sm:$0xff] }
  0x4c   :  { %4101 = vmatpush1.bf16.msra.mxu1 %v4100_v18  ;;  %765 = vmatprep.subr.mxu0 %v300_v19  ;;  %v53_v18 = vld [vmem:[%s7560_s1 + $0xb0] sm:$0xff]  ;;  %v4136_v27 = vpack.c.bf16 %v83_v17, %v51_v16  ;;  %v154_v16 = vld [vmem:[%s7560_s1 + $0x3d8] sm:$0xff] }
  0x4d   :  { %836 = vmatprep.subr.mxu1 %v302_v20  ;;  %v85_v19 = vld [vmem:[%s7560_s1 + $0x1b0] sm:$0xff]  ;;  %v116_v20 = vld [vmem:[%s7560_s1 + $0x2a8] sm:$0xff] }
  0x4e   :  { %v4152_v28 = vpack.c.bf16 %v85_v19, %v53_v18  ;;  %v4138_v29 = vpack.c.bf16 %v148_v21, %v116_v20  ;;  %v119_v20 = vld [vmem:[%s7560_s1 + $0x2c0] sm:$0xff] }
  0x4f   :  { %766 = vmatpush1.msra.mxu0 %v299_v22  ;;  %v305_v22 = vld [vmem:[%s7560_s1 + $0x890] sm:$0xff]  ;;  %v151_v21 = vld [vmem:[%s7560_s1 + $0x3c0] sm:$0xff] }
  0x50   :  { %837 = vmatpush1.msra.mxu1 %v301_v32  ;;  %3366 = vmatmul.mubr.msk.f32.vlgmr.msra.gmra.mrb[6].mxu0 %vm319_vm0, %v5007_v63  ;;  %v117_v32 = vld [vmem:[%s7560_s1 + $0x2b0] sm:$0xff] }
  0x51   :  { %3367 = vmatmul.mubr.msk.f32.vlgmr.msra.gmra.mrb[6].mxu1 %vm319_vm0, %v5007_v63  ;;  %4103 = vmatprep.subr.bf16.mxu0 %v4102_v33  ;;  %v4154_v33 = vpack.c.bf16 %v150_v25, %v118_v24  ;;  %v4156_v40 = vpack.c.bf16 %v149_v34, %v117_v32  ;;  %v153_v24 = vld [vmem:[%s7560_s1 + $0x3d0] sm:$0xff]  ;;  %v184_v25 = vld [vmem:[%s7560_s1 + $0x4c8] sm:$0xff]  ;;  %v183_v32 = vld [vmem:[%s7560_s1 + $0x4c0] sm:$0xff] }
  0x52   :  { %4119 = vmatprep.subr.bf16.mxu1 %v4118_v36  ;;  %4105 = vmatpush1.bf16.msra.mxu0 %v4104_v37  ;;  %v212_v36 = vld [vmem:[%s7560_s1 + $0x5a8] sm:$0xff]  ;;  %v182_v37 = vld [vmem:[%s7560_s1 + $0x4b8] sm:$0xff]  ;;  %v185_v34 = vld [vmem:[%s7560_s1 + $0x4d0] sm:$0xff] }
  0x53   :  { %4121 = vmatpush1.bf16.msra.mxu1 %v4120_v38  ;;  %4107 = vmatprep.subr.bf16.mxu0 %v4106_v39  ;;  %v214_v38 = vld [vmem:[%s7560_s1 + $0x5b8] sm:$0xff]  ;;  %v4140_v39 = vpack.c.bf16 %v147_v31, %v115_v30  ;;  %v4142_v41 = vpack.c.bf16 %v212_v36, %v180_v35  ;;  %v217_v36 = vld [vmem:[%s7560_s1 + $0x5d0] sm:$0xff] }
  0x54   :  { %4123 = vmatprep.subr.bf16.mxu1 %v4122_v43  ;;  %955 = vmatprep.mubr.f32.mxu0 %v4817_v7  ;;  %v211_v43 = vld [vmem:[%s7560_s1 + $0x5a0] sm:$0xff]  ;;  %v4158_v45 = vpack.c.bf16 %v214_v38, %v182_v37  ;;  %v248_v37 = vld [vmem:[%s7560_s1 + $0x6c8] sm:$0xff] }
  0x55   :  { %1026 = vmatprep.mubr.f32.mxu1 %v4817_v7  ;;  %v280_v38 = vld [vmem:[%s7560_s1 + $0x7c8] sm:$0xff] }
  0x56   :  { %4109 = vmatpush1.bf16.msra.mxu0 %v4108_v49  ;;  %v246_v49 = vld [vmem:[%s7560_s1 + $0x6b8] sm:$0xff] }
  0x57   :  { %4125 = vmatpush1.bf16.msra.mxu1 %v4124_v50  ;;  %4111 = vmatprep.subr.bf16.mxu0 %v4110_v51  ;;  %v278_v50 = vld [vmem:[%s7560_s1 + $0x7b8] sm:$0xff]  ;;  %v4144_v51 = vpack.c.bf16 %v211_v43, %v179_v42  ;;  %v4192_v42 = vpack.c.bf16 %v217_v36, %v185_v34  ;;  %v4178_v43 = vpack.c.bf16 %v280_v38, %v248_v37 }
  0x58   :  { %4127 = vmatprep.subr.bf16.mxu1 %v4126_v55  ;;  %v275_v55 = vld [vmem:[%s7560_s1 + $0x7a0] sm:$0xff]  ;;  %v4162_v56 = vpack.c.bf16 %v278_v50, %v246_v49  ;;  %v4196_v50 = vpack.c.bf16 %v281_v48, %v249_v47 }
  0x59   :  { %v4148_v59 = vpack.c.bf16 %v275_v55, %v243_v54  ;;  %v311_v54 = vld [vmem:[%s7560_s1 + $0x8c0] sm:$0xff]  ;;  %v92_v55 = vld [vmem:[%s7560_s1 + $0x1e8] sm:$0xff] }
  0x5a   :  { %4113 = vmatpush1.bf16.msra.mxu0 %v4112_v61  ;;  %v308_v61 = vld [vmem:[%s7560_s1 + $0x8a8] sm:$0xff] }
  0x5b   :  { %4129 = vmatpush1.bf16.msra.mxu1 %v4128_v62  ;;  %4115 = vmatprep.subr.bf16.mxu0 %v4114_v0  ;;  %v310_v62 = vld [vmem:[%s7560_s1 + $0x8b8] sm:$0xff]  ;;  %v56_v0 = vld [vmem:[%s7560_s1 + $0xc8] sm:$0xff] }
  0x5c   :  { %4131 = vmatprep.subr.bf16.mxu1 %v4130_v3  ;;  %v58_v3 = vld [vmem:[%s7560_s1 + $0xd8] sm:$0xff]  ;;  %v4166_v13 = vpack.c.bf16 %v88_v2, %v56_v0  ;;  %v156_v0 = vld [vmem:[%s7560_s1 + $0x3e8] sm:$0xff] }
  0x5d   :  { %v4182_v14 = vpack.c.bf16 %v90_v4, %v58_v3  ;;  %v126_v4 = vld [vmem:[%s7560_s1 + $0x2f8] sm:$0xff] }
  0x5e   :  { %4117 = vmatpush1.bf16.msra.mxu0 %v4116_v6  ;;  %v87_v6 = vld [vmem:[%s7560_s1 + $0x1c0] sm:$0xff] }
  0x5f   :  { %4133 = vmatpush1.bf16.msra.mxu1 %v4132_v8  ;;  %907 = vmatprep.subr.mxu0 %v304_v9  ;;  %v57_v8 = vld [vmem:[%s7560_s1 + $0xd0] sm:$0xff]  ;;  %v4168_v17 = vpack.c.bf16 %v87_v6, %v55_v5  ;;  %v158_v5 = vld [vmem:[%s7560_s1 + $0x3f8] sm:$0xff] }
  0x60   :  { %978 = vmatprep.subr.mxu1 %v306_v10  ;;  %v89_v9 = vld [vmem:[%s7560_s1 + $0x1d0] sm:$0xff]  ;;  %v120_v10 = vld [vmem:[%s7560_s1 + $0x2c8] sm:$0xff] }
  0x61   :  { %v4184_v18 = vpack.c.bf16 %v89_v9, %v57_v8  ;;  %v4170_v19 = vpack.c.bf16 %v152_v11, %v120_v10  ;;  %v123_v10 = vld [vmem:[%s7560_s1 + $0x2e0] sm:$0xff] }
  0x62   :  { %908 = vmatpush1.msra.mxu0 %v303_v12  ;;  %v309_v12 = vld [vmem:[%s7560_s1 + $0x8b0] sm:$0xff]  ;;  %v155_v11 = vld [vmem:[%s7560_s1 + $0x3e0] sm:$0xff] }
  0x63   :  { %979 = vmatpush1.msra.mxu1 %v305_v22  ;;  %3368 = vmatmul.mubr.msk.f32.vlgmr.msra.gmra.mrb[8].mxu0 %vm319_vm0, %v5007_v63  ;;  %v121_v22 = vld [vmem:[%s7560_s1 + $0x2d0] sm:$0xff] }
  0x64   :  { %3369 = vmatmul.mubr.msk.f32.vlgmr.msra.gmra.mrb[8].mxu1 %vm319_vm0, %v5007_v63  ;;  %4135 = vmatprep.subr.bf16.mxu0 %v4134_v23  ;;  %v4186_v23 = vpack.c.bf16 %v154_v16, %v122_v15  ;;  %v4188_v30 = vpack.c.bf16 %v153_v24, %v121_v22  ;;  %v188_v15 = vld [vmem:[%s7560_s1 + $0x4e8] sm:$0xff]  ;;  %v187_v22 = vld [vmem:[%s7560_s1 + $0x4e0] sm:$0xff]  ;;  %v189_v24 = vld [vmem:[%s7560_s1 + $0x4f0] sm:$0xff] }
  0x65   :  { %4151 = vmatprep.subr.bf16.mxu1 %v4150_v26  ;;  %4137 = vmatpush1.bf16.msra.mxu0 %v4136_v27  ;;  %v216_v26 = vld [vmem:[%s7560_s1 + $0x5c8] sm:$0xff]  ;;  %v186_v27 = vld [vmem:[%s7560_s1 + $0x4d8] sm:$0xff] }
  0x66   :  { %4153 = vmatpush1.bf16.msra.mxu1 %v4152_v28  ;;  %4139 = vmatprep.subr.bf16.mxu0 %v4138_v29  ;;  %v218_v28 = vld [vmem:[%s7560_s1 + $0x5d8] sm:$0xff]  ;;  %v4172_v29 = vpack.c.bf16 %v151_v21, %v119_v20  ;;  %v4174_v31 = vpack.c.bf16 %v216_v26, %v184_v25  ;;  %v220_v16 = vld [vmem:[%s7560_s1 + $0x5e8] sm:$0xff]  ;;  %v221_v25 = vld [vmem:[%s7560_s1 + $0x5f0] sm:$0xff] }
  0x67   :  { %4155 = vmatprep.subr.bf16.mxu1 %v4154_v33  ;;  %1097 = vmatprep.mubr.f32.mxu0 %v4817_v7  ;;  %v215_v33 = vld [vmem:[%s7560_s1 + $0x5c0] sm:$0xff]  ;;  %v4190_v35 = vpack.c.bf16 %v218_v28, %v186_v27  ;;  %v4206_v21 = vpack.c.bf16 %v220_v16, %v188_v15  ;;  %v252_v26 = vld [vmem:[%s7560_s1 + $0x6e8] sm:$0xff]  ;;  %v254_v28 = vld [vmem:[%s7560_s1 + $0x6f8] sm:$0xff] }
  0x68   :  { %1168 = vmatprep.mubr.f32.mxu1 %v4817_v7  ;;  %v284_v27 = vld [vmem:[%s7560_s1 + $0x7e8] sm:$0xff] }
  0x69   :  { %4141 = vmatpush1.bf16.msra.mxu0 %v4140_v39  ;;  %v250_v39 = vld [vmem:[%s7560_s1 + $0x6d8] sm:$0xff] }
  0x6a   :  { %4157 = vmatpush1.bf16.msra.mxu1 %v4156_v40  ;;  %4143 = vmatprep.subr.bf16.mxu0 %v4142_v41  ;;  %v282_v40 = vld [vmem:[%s7560_s1 + $0x7d8] sm:$0xff]  ;;  %v4176_v41 = vpack.c.bf16 %v215_v33, %v183_v32 }
  0x6b   :  { %4159 = vmatprep.subr.bf16.mxu1 %v4158_v45  ;;  %v279_v45 = vld [vmem:[%s7560_s1 + $0x7c0] sm:$0xff]  ;;  %v4194_v46 = vpack.c.bf16 %v282_v40, %v250_v39 }
  0x6c   :  { %v4180_v49 = vpack.c.bf16 %v279_v45, %v247_v44 }
  0x6d   :  { %4145 = vmatpush1.bf16.msra.mxu0 %v4144_v51  ;;  %v312_v51 = vld [vmem:[%s7560_s1 + $0x8c8] sm:$0xff] }
  0x6e   :  { %4161 = vmatpush1.bf16.msra.mxu1 %v4160_v52  ;;  %4147 = vmatprep.subr.bf16.mxu0 %v4146_v53  ;;  %v314_v52 = vld [vmem:[%s7560_s1 + $0x8d8] sm:$0xff]  ;;  %v60_v53 = vld [vmem:[%s7560_s1 + $0xe8] sm:$0xff] }
  0x6f   :  { %4163 = vmatprep.subr.bf16.mxu1 %v4162_v56  ;;  %v62_v56 = vld [vmem:[%s7560_s1 + $0xf8] sm:$0xff]  ;;  %v4198_v2 = vpack.c.bf16 %v92_v55, %v60_v53 }
  0x70   :  { %v4214_v3 = vpack.c.bf16 %v94_v57, %v62_v56 }
  0x71   :  { %4149 = vmatpush1.bf16.msra.mxu0 %v4148_v59  ;;  %v91_v59 = vld [vmem:[%s7560_s1 + $0x1e0] sm:$0xff] }
  0x72   :  { %4165 = vmatpush1.bf16.msra.mxu1 %v4164_v60  ;;  %1049 = vmatprep.subr.mxu0 %v308_v61  ;;  %v61_v60 = vld [vmem:[%s7560_s1 + $0xf0] sm:$0xff]  ;;  %v4200_v6 = vpack.c.bf16 %v91_v59, %v59_v58 }
  0x73   :  { %1120 = vmatprep.subr.mxu1 %v310_v62  ;;  %v93_v61 = vld [vmem:[%s7560_s1 + $0x1f0] sm:$0xff]  ;;  %v124_v62 = vld [vmem:[%s7560_s1 + $0x2e8] sm:$0xff] }
  0x74   :  { %v4216_v8 = vpack.c.bf16 %v93_v61, %v61_v60  ;;  %v4202_v9 = vpack.c.bf16 %v156_v0, %v124_v62 }
  0x75   :  { %1050 = vmatpush1.msra.mxu0 %v307_v1  ;;  %v313_v1 = vld [vmem:[%s7560_s1 + $0x8d0] sm:$0xff] }
  0x76   :  { %1121 = vmatpush1.msra.mxu1 %v309_v12  ;;  %3370 = vmatmul.mubr.msk.f32.vlgmr.msra.gmra.mrb[10].mxu0 %vm319_vm0, %v5007_v63  ;;  %v125_v12 = vld [vmem:[%s7560_s1 + $0x2f0] sm:$0xff] }
  0x77   :  { %4167 = vmatprep.subr.bf16.mxu0 %v4166_v13  ;;  %4183 = vmatprep.subr.bf16.mxu1 %v4182_v14  ;;  %v4218_v13 = vpack.c.bf16 %v158_v5, %v126_v4  ;;  %v157_v14 = vld [vmem:[%s7560_s1 + $0x3f0] sm:$0xff] }
  0x78   :  { %3371 = vmatmul.mubr.msk.f32.vlgmr.msra.gmra.mrb[10].mxu1 %vm319_vm0, %v5007_v63  ;;  %4169 = vmatpush1.bf16.msra.mxu0 %v4168_v17  ;;  %v190_v17 = vld [vmem:[%s7560_s1 + $0x4f8] sm:$0xff]  ;;  %v4220_v20 = vpack.c.bf16 %v157_v14, %v125_v12 }
  0x79   :  { %4185 = vmatpush1.bf16.msra.mxu1 %v4184_v18  ;;  %4171 = vmatprep.subr.bf16.mxu0 %v4170_v19  ;;  %v222_v18 = vld [vmem:[%s7560_s1 + $0x5f8] sm:$0xff]  ;;  %v4204_v19 = vpack.c.bf16 %v155_v11, %v123_v10 }
  0x7a   :  { %4187 = vmatprep.subr.bf16.mxu1 %v4186_v23  ;;  %1239 = vmatprep.mubr.f32.mxu0 %v4817_v7  ;;  %v219_v23 = vld [vmem:[%s7560_s1 + $0x5e0] sm:$0xff] }
  0x7b   :  { %1310 = vmatprep.mubr.f32.mxu1 %v4817_v7 }
  0x7c   :  { %4173 = vmatpush1.bf16.msra.mxu0 %v4172_v29  ;;  %v286_v29 = vld [vmem:[%s7560_s1 + $0x7f8] sm:$0xff] }
  0x7d   :  { %4189 = vmatpush1.bf16.msra.mxu1 %v4188_v30  ;;  %4175 = vmatprep.subr.bf16.mxu0 %v4174_v31  ;;  %v4208_v30 = vpack.c.bf16 %v219_v23, %v187_v22 }
  0x7e   :  { %4191 = vmatprep.subr.bf16.mxu1 %v4190_v35 }
  0x80   :  { %4177 = vmatpush1.bf16.msra.mxu0 %v4176_v41 }
  0x81   :  { %4193 = vmatpush1.bf16.msra.mxu1 %v4192_v42  ;;  %4179 = vmatprep.subr.bf16.mxu0 %v4178_v43 }
  0x82   :  { %4195 = vmatprep.subr.bf16.mxu1 %v4194_v46 }
  0x84   :  { %4181 = vmatpush1.bf16.msra.mxu0 %v4180_v49 }
  0x85   :  { %4197 = vmatpush1.bf16.msra.mxu1 %v4196_v50  ;;  %1191 = vmatprep.subr.mxu0 %v312_v51 }
  0x86   :  { %1262 = vmatprep.subr.mxu1 %v314_v52 }
  0x88   :  { %1192 = vmatpush1.msra.mxu0 %v311_v54 }
  0x89   :  { %1263 = vmatpush1.msra.mxu1 %v313_v1  ;;  %3372 = vmatmul.mubr.msk.f32.vlgmr.msra.gmra.mrb[12].mxu0 %vm319_vm0, %v5007_v63 }
  0x8a   :  { %4199 = vmatprep.subr.bf16.mxu0 %v4198_v2  ;;  %4215 = vmatprep.subr.bf16.mxu1 %v4214_v3 }
  0x8b   :  { %3373 = vmatmul.mubr.msk.f32.vlgmr.msra.gmra.mrb[12].mxu1 %vm319_vm0, %v5007_v63  ;;  %4201 = vmatpush1.bf16.msra.mxu0 %v4200_v6  ;;  %v4222_v63 = vpack.c.bf16 %v222_v18, %v190_v17 }
  0x8c   :  { %4217 = vmatpush1.bf16.msra.mxu1 %v4216_v8  ;;  %4203 = vmatprep.subr.bf16.mxu0 %v4202_v9 }
  0x8d   :  { %4219 = vmatprep.subr.bf16.mxu1 %v4218_v13  ;;  %1381 = vmatprep.mubr.f32.mxu0 %v4817_v7 }
  0x8e   :  { %1452 = vmatprep.mubr.f32.mxu1 %v4817_v7 }
  0x8f   :  { %4205 = vmatpush1.bf16.msra.mxu0 %v4204_v19 }
  0x90   :  { %13 = vsyncpa [#allocation3], 0  ;;  %4221 = vmatpush1.bf16.msra.mxu1 %v4220_v20  ;;  %4207 = vmatprep.subr.bf16.mxu0 %v4206_v21  ;;  %v4224_v31 = vpack.c.bf16 %v221_v25, %v189_v24  ;;  %v4210_v32 = vpack.c.bf16 %v284_v27, %v252_v26  ;;  %v251_v33 = vld [vmem:[%s7560_s1 + $0x6e0] sm:$0xff]  ;;  %v4226_v35 = vpack.c.bf16 %v286_v29, %v254_v28  ;;  %v253_v36 = vld [vmem:[%s7560_s1 + $0x6f0] sm:$0xff]  ;;  %vm3159_vm1 = vcmask 523264   ;;  %s4818_s24 = smov [#allocation2]  }
  0x91   :  { %v283_v34 = vld [vmem:[%s7560_s1 + $0x7e0] sm:$0xff]  ;;  %4223 = vmatprep.subr.bf16.mxu1 %v4222_v63  ;;  %v285_v37 = vld [vmem:[%s7560_s1 + $0x7f0] sm:$0xff]  ;;  %v316_v40 = vld [vmem:[%s7560_s1 + $0x8e8] sm:$0xff] }
  0x92   :  { %v4212_v38 = vpack.c.bf16 %v283_v34, %v251_v33  ;;  %v4228_v39 = vpack.c.bf16 %v285_v37, %v253_v36  ;;  %v318_v41 = vld [vmem:[%s7560_s1 + $0x8f8] sm:$0xff]  ;;  %v1507_v42 = vld [vmem:[%s7561_s2 + $0x80] sm:$0xff]  ;;  %v1508_v44 = vld [vmem:[%s7561_s2 + $0x88] sm:$0xff] }
  0x93   :  { %4209 = vmatpush1.bf16.msra.mxu0 %v4208_v30  ;;  %v315_v43 = vld [vmem:[%s7560_s1 + $0x8e0] sm:$0xff]  ;;  %v1540_v46 = vld [vmem:[%s7561_s2 + $0x188] sm:$0xff]  ;;  %v1509_v51 = vld [vmem:[%s7561_s2 + $0x90] sm:$0xff]  ;;  %v4230_v54 = vpack.c.bf16 %v1508_v44, %v1507_v42 }
  0x94   :  { %4225 = vmatpush1.bf16.msra.mxu1 %v4224_v31  ;;  %4211 = vmatprep.subr.bf16.mxu0 %v4210_v32  ;;  %v1539_v45 = vld [vmem:[%s7561_s2 + $0x180] sm:$0xff]  ;;  %v1492_v48 = vld [vmem:[%s7561_s2 + $0x8] sm:$0xff]  ;;  %v1510_v52 = vld [vmem:[%s7561_s2 + $0x98] sm:$0xff] }
  0x95   :  { %4227 = vmatprep.subr.bf16.mxu1 %v4226_v35  ;;  %v1491_v47 = vld [vmem:[%s7561_s2] sm:$0xff]  ;;  %v1524_v50 = vld [vmem:[%s7561_s2 + $0x108] sm:$0xff]  ;;  %v317_v53 = vld [vmem:[%s7560_s1 + $0x8f0] sm:$0xff]  ;;  %v4262_v55 = vpack.c.bf16 %v1540_v46, %v1539_v45  ;;  %v4234_v60 = vpack.c.bf16 %v1510_v52, %v1509_v51 }
  0x96   :  { %v1523_v49 = vld [vmem:[%s7561_s2 + $0x100] sm:$0xff]  ;;  %v1541_v56 = vld [vmem:[%s7561_s2 + $0x190] sm:$0xff]  ;;  %v1542_v57 = vld [vmem:[%s7561_s2 + $0x198] sm:$0xff]  ;;  %v4232_v58 = vpack.c.bf16 %v1492_v48, %v1491_v47 }
  0x97   :  { %4213 = vmatpush1.bf16.msra.mxu0 %v4212_v38  ;;  %v4264_v59 = vpack.c.bf16 %v1524_v50, %v1523_v49  ;;  %v1493_v61 = vld [vmem:[%s7561_s2 + $0x10] sm:$0xff]  ;;  %v1494_v62 = vld [vmem:[%s7561_s2 + $0x18] sm:$0xff]  ;;  %v4792_v1 = vld [vmem:[%s7559_s0] sm:$0xff]  ;;  %v4266_v2 = vpack.c.bf16 %v1542_v57, %v1541_v56 }
  0x98   :  { %4229 = vmatpush1.bf16.msra.mxu1 %v4228_v39  ;;  %1333 = vmatprep.subr.mxu0 %v316_v40  ;;  %v1525_v0 = vld [vmem:[%s7561_s2 + $0x110] sm:$0xff]  ;;  %v1526_v3 = vld [vmem:[%s7561_s2 + $0x118] sm:$0xff]  ;;  %v1511_v4 = vld [vmem:[%s7561_s2 + $0xa0] sm:$0xff]  ;;  %v4236_v9 = vpack.c.bf16 %v1494_v62, %v1493_v61 }
  0x99   :  { %1404 = vmatprep.subr.mxu1 %v318_v41  ;;  %v1512_v5 = vld [vmem:[%s7561_s2 + $0xa8] sm:$0xff]  ;;  %v1543_v6 = vld [vmem:[%s7561_s2 + $0x1a0] sm:$0xff]  ;;  %v4268_v10 = vpack.c.bf16 %v1526_v3, %v1525_v0  ;;  %v1513_v17 = vld [vmem:[%s7561_s2 + $0xb0] sm:$0xff] }
  0x9a   :  { %v1544_v8 = vld [vmem:[%s7561_s2 + $0x1a8] sm:$0xff]  ;;  %v4238_v11 = vpack.c.bf16 %v1512_v5, %v1511_v4  ;;  %v1495_v12 = vld [vmem:[%s7561_s2 + $0x20] sm:$0xff]  ;;  %v1514_v18 = vld [vmem:[%s7561_s2 + $0xb8] sm:$0xff] }
  0x9b   :  { %1334 = vmatpush1.msra.mxu0 %v315_v43  ;;  %v1496_v13 = vld [vmem:[%s7561_s2 + $0x28] sm:$0xff]  ;;  %v1527_v14 = vld [vmem:[%s7561_s2 + $0x120] sm:$0xff]  ;;  %v4270_v15 = vpack.c.bf16 %v1544_v8, %v1543_v6  ;;  %v1545_v19 = vld [vmem:[%s7561_s2 + $0x1b0] sm:$0xff]  ;;  %v4242_v23 = vpack.c.bf16 %v1514_v18, %v1513_v17 }
  0x9c   :  { %1405 = vmatpush1.msra.mxu1 %v317_v53  ;;  %3374 = vmatmul.mubr.msk.f32.vlgmr.msra.gmra.mrb[14].mxu0 %vm319_vm0, %v4792_v1  ;;  %v1528_v16 = vld [vmem:[%s7561_s2 + $0x128] sm:$0xff]  ;;  %v1546_v20 = vld [vmem:[%s7561_s2 + $0x1b8] sm:$0xff]  ;;  %v4240_v21 = vpack.c.bf16 %v1496_v13, %v1495_v12  ;;  %v1497_v24 = vld [vmem:[%s7561_s2 + $0x30] sm:$0xff] }
  0x9d   :  { %4231 = vmatprep.subr.bf16.mxu0 %v4230_v54  ;;  %4263 = vmatprep.subr.bf16.mxu1 %v4262_v55  ;;  %v4272_v22 = vpack.c.bf16 %v1528_v16, %v1527_v14  ;;  %v1498_v63 = vld [vmem:[%s7561_s2 + $0x38] sm:$0xff]  ;;  %v1529_v25 = vld [vmem:[%s7561_s2 + $0x130] sm:$0xff]  ;;  %v4274_v26 = vpack.c.bf16 %v1546_v20, %v1545_v19  ;;  %v1515_v28 = vld [vmem:[%s7561_s2 + $0xc0] sm:$0xff] }
  0x9e   :  { %3375 = vmatmul.mubr.msk.f32.vlgmr.msra.gmra.mrb[14].mxu1 %vm319_vm0, %v4792_v1  ;;  %4233 = vmatpush3.bf16.msra.mxu0 %v4232_v58  ;;  %v1530_v27 = vld [vmem:[%s7561_s2 + $0x138] sm:$0xff]  ;;  %v1516_v29 = vld [vmem:[%s7561_s2 + $0xc8] sm:$0xff]  ;;  %v1547_v30 = vld [vmem:[%s7561_s2 + $0x1c0] sm:$0xff]  ;;  %v4244_v32 = vpack.c.bf16 %v1498_v63, %v1497_v24 }
  0x9f   :  { %4265 = vmatpush3.bf16.msra.mxu1 %v4264_v59  ;;  %4235 = vmatprep.subr.bf16.mxu0 %v4234_v60  ;;  %v1548_v31 = vld [vmem:[%s7561_s2 + $0x1c8] sm:$0xff]  ;;  %v4276_v33 = vpack.c.bf16 %v1530_v27, %v1529_v25  ;;  %v4246_v34 = vpack.c.bf16 %v1516_v29, %v1515_v28  ;;  %v1499_v35 = vld [vmem:[%s7561_s2 + $0x40] sm:$0xff]  ;;  %v1517_v40 = vld [vmem:[%s7561_s2 + $0xd0] sm:$0xff] }
  0xa0   :  { %4267 = vmatprep.subr.bf16.mxu1 %v4266_v2  ;;  %v1500_v36 = vld [vmem:[%s7561_s2 + $0x48] sm:$0xff]  ;;  %v1531_v37 = vld [vmem:[%s7561_s2 + $0x140] sm:$0xff]  ;;  %v4278_v38 = vpack.c.bf16 %v1548_v31, %v1547_v30  ;;  %v1518_v41 = vld [vmem:[%s7561_s2 + $0xd8] sm:$0xff] }
  0xa1   :  { %v1532_v39 = vld [vmem:[%s7561_s2 + $0x148] sm:$0xff]  ;;  %v1549_v42 = vld [vmem:[%s7561_s2 + $0x1d0] sm:$0xff]  ;;  %v1550_v43 = vld [vmem:[%s7561_s2 + $0x1d8] sm:$0xff]  ;;  %v4248_v44 = vpack.c.bf16 %v1500_v36, %v1499_v35  ;;  %v4250_v46 = vpack.c.bf16 %v1518_v41, %v1517_v40 }
  0xa2   :  { %4237 = vmatpush3.bf16.msra.mxu0 %v4236_v9  ;;  %v4280_v45 = vpack.c.bf16 %v1532_v39, %v1531_v37  ;;  %v1501_v47 = vld [vmem:[%s7561_s2 + $0x50] sm:$0xff]  ;;  %v1502_v48 = vld [vmem:[%s7561_s2 + $0x58] sm:$0xff]  ;;  %v4282_v50 = vpack.c.bf16 %v1550_v43, %v1549_v42  ;;  %v1519_v52 = vld [vmem:[%s7561_s2 + $0xe0] sm:$0xff] }
  0xa3   :  { %4269 = vmatpush3.bf16.msra.mxu1 %v4268_v10  ;;  %4239 = vmatprep.subr.bf16.mxu0 %v4238_v11  ;;  %v1533_v49 = vld [vmem:[%s7561_s2 + $0x150] sm:$0xff]  ;;  %v1534_v51 = vld [vmem:[%s7561_s2 + $0x158] sm:$0xff]  ;;  %v1520_v53 = vld [vmem:[%s7561_s2 + $0xe8] sm:$0xff]  ;;  %v4252_v56 = vpack.c.bf16 %v1502_v48, %v1501_v47 }
  0xa4   :  { %4271 = vmatprep.subr.bf16.mxu1 %v4270_v15  ;;  %v1551_v54 = vld [vmem:[%s7561_s2 + $0x1e0] sm:$0xff]  ;;  %v1552_v55 = vld [vmem:[%s7561_s2 + $0x1e8] sm:$0xff]  ;;  %v4284_v57 = vpack.c.bf16 %v1534_v51, %v1533_v49  ;;  %v4254_v58 = vpack.c.bf16 %v1520_v53, %v1519_v52  ;;  %v1521_v1 = vld [vmem:[%s7561_s2 + $0xf0] sm:$0xff] }
  0xa5   :  { %v1503_v59 = vld [vmem:[%s7561_s2 + $0x60] sm:$0xff]  ;;  %v1504_v60 = vld [vmem:[%s7561_s2 + $0x68] sm:$0xff]  ;;  %v4286_v62 = vpack.c.bf16 %v1552_v55, %v1551_v54  ;;  %v1522_v2 = vld [vmem:[%s7561_s2 + $0xf8] sm:$0xff] }
  0xa6   :  { %4241 = vmatpush3.bf16.msra.mxu0 %v4240_v21  ;;  %v1535_v61 = vld [vmem:[%s7561_s2 + $0x160] sm:$0xff]  ;;  %v1536_v0 = vld [vmem:[%s7561_s2 + $0x168] sm:$0xff]  ;;  %v1553_v3 = vld [vmem:[%s7561_s2 + $0x1f0] sm:$0xff]  ;;  %v4256_v5 = vpack.c.bf16 %v1504_v60, %v1503_v59  ;;  %v4258_v8 = vpack.c.bf16 %v1522_v2, %v1521_v1 }
  0xa7   :  { %4273 = vmatpush3.bf16.msra.mxu1 %v4272_v22  ;;  %4243 = vmatprep.subr.bf16.mxu0 %v4242_v23  ;;  %v1554_v4 = vld [vmem:[%s7561_s2 + $0x1f8] sm:$0xff]  ;;  %v4288_v6 = vpack.c.bf16 %v1536_v0, %v1535_v61  ;;  %v1505_v9 = vld [vmem:[%s7561_s2 + $0x70] sm:$0xff]  ;;  %v1571_v14 = vld [vmem:[%s7561_s2 + $0x280] sm:$0xff] }
  0xa8   :  { %4275 = vmatprep.subr.bf16.mxu1 %v4274_v26  ;;  %v1506_v10 = vld [vmem:[%s7561_s2 + $0x78] sm:$0xff]  ;;  %v1537_v11 = vld [vmem:[%s7561_s2 + $0x170] sm:$0xff]  ;;  %v4290_v12 = vpack.c.bf16 %v1554_v4, %v1553_v3  ;;  %v1572_v15 = vld [vmem:[%s7561_s2 + $0x288] sm:$0xff] }
  0xa9   :  { %v1538_v13 = vld [vmem:[%s7561_s2 + $0x178] sm:$0xff]  ;;  %v1603_v16 = vld [vmem:[%s7561_s2 + $0x380] sm:$0xff]  ;;  %v1604_v17 = vld [vmem:[%s7561_s2 + $0x388] sm:$0xff]  ;;  %v4260_v18 = vpack.c.bf16 %v1506_v10, %v1505_v9  ;;  %v4294_v20 = vpack.c.bf16 %v1572_v15, %v1571_v14 }
  0xaa   :  { %4245 = vmatpush3.bf16.msra.mxu0 %v4244_v32  ;;  %v4292_v19 = vpack.c.bf16 %v1538_v13, %v1537_v11  ;;  %v4326_v21 = vpack.c.bf16 %v1604_v17, %v1603_v16  ;;  %v1555_v22 = vld [vmem:[%s7561_s2 + $0x200] sm:$0xff]  ;;  %v1556_v23 = vld [vmem:[%s7561_s2 + $0x208] sm:$0xff]  ;;  %v1573_v26 = vld [vmem:[%s7561_s2 + $0x290] sm:$0xff] }
  0xab   :  { %4277 = vmatpush3.bf16.msra.mxu1 %v4276_v33  ;;  %4247 = vmatprep.subr.bf16.mxu0 %v4246_v34  ;;  %v1587_v24 = vld [vmem:[%s7561_s2 + $0x300] sm:$0xff]  ;;  %v1588_v25 = vld [vmem:[%s7561_s2 + $0x308] sm:$0xff]  ;;  %v1574_v27 = vld [vmem:[%s7561_s2 + $0x298] sm:$0xff]  ;;  %v4296_v35 = vpack.c.bf16 %v1556_v23, %v1555_v22 }
  0xac   :  { %4279 = vmatprep.subr.bf16.mxu1 %v4278_v38  ;;  %v1605_v30 = vld [vmem:[%s7561_s2 + $0x390] sm:$0xff]  ;;  %v1606_v31 = vld [vmem:[%s7561_s2 + $0x398] sm:$0xff]  ;;  %v4328_v38 = vpack.c.bf16 %v1588_v25, %v1587_v24  ;;  %v4298_v39 = vpack.c.bf16 %v1574_v27, %v1573_v26  ;;  %v1607_v47 = vld [vmem:[%s7561_s2 + $0x3a0] sm:$0xff] }
  0xad   :  { %v1557_v40 = vld [vmem:[%s7561_s2 + $0x210] sm:$0xff]  ;;  %v1558_v41 = vld [vmem:[%s7561_s2 + $0x218] sm:$0xff]  ;;  %v4330_v43 = vpack.c.bf16 %v1606_v31, %v1605_v30  ;;  %v1608_v48 = vld [vmem:[%s7561_s2 + $0x3a8] sm:$0xff] }
  0xae   :  { %4249 = vmatpush3.bf16.msra.mxu0 %v4248_v44  ;;  %v1589_v42 = vld [vmem:[%s7561_s2 + $0x310] sm:$0xff]  ;;  %v1590_v44 = vld [vmem:[%s7561_s2 + $0x318] sm:$0xff]  ;;  %v4300_v49 = vpack.c.bf16 %v1558_v41, %v1557_v40  ;;  %v1559_v52 = vld [vmem:[%s7561_s2 + $0x220] sm:$0xff]  ;;  %v4334_v55 = vpack.c.bf16 %v1608_v48, %v1607_v47 }
  0xaf   :  { %4281 = vmatpush3.bf16.msra.mxu1 %v4280_v45  ;;  %4251 = vmatprep.subr.bf16.mxu0 %v4250_v46  ;;  %v1575_v45 = vld [vmem:[%s7561_s2 + $0x2a0] sm:$0xff]  ;;  %v1576_v46 = vld [vmem:[%s7561_s2 + $0x2a8] sm:$0xff]  ;;  %v1609_v59 = vld [vmem:[%s7561_s2 + $0x3b0] sm:$0xff] }
  0xb0   :  { %4283 = vmatprep.subr.bf16.mxu1 %v4282_v50  ;;  %v4332_v50 = vpack.c.bf16 %v1590_v44, %v1589_v42  ;;  %v4302_v51 = vpack.c.bf16 %v1576_v46, %v1575_v45  ;;  %v1560_v53 = vld [vmem:[%s7561_s2 + $0x228] sm:$0xff]  ;;  %v1591_v54 = vld [vmem:[%s7561_s2 + $0x320] sm:$0xff]  ;;  %v1610_v60 = vld [vmem:[%s7561_s2 + $0x3b8] sm:$0xff] }
  0xb1   :  { %v4304_v61 = vpack.c.bf16 %v1560_v53, %v1559_v52  ;;  %v1561_v1 = vld [vmem:[%s7561_s2 + $0x230] sm:$0xff]  ;;  %v1562_v2 = vld [vmem:[%s7561_s2 + $0x238] sm:$0xff]  ;;  %v4338_v4 = vpack.c.bf16 %v1610_v60, %v1609_v59  ;;  %v1611_v9 = vld [vmem:[%s7561_s2 + $0x3c0] sm:$0xff] }
  0xb2   :  { %4253 = vmatpush3.bf16.msra.mxu0 %v4252_v56  ;;  %v1592_v56 = vld [vmem:[%s7561_s2 + $0x328] sm:$0xff]  ;;  %v1593_v3 = vld [vmem:[%s7561_s2 + $0x330] sm:$0xff]  ;;  %v4308_v11 = vpack.c.bf16 %v1562_v2, %v1561_v1  ;;  %v1563_v14 = vld [vmem:[%s7561_s2 + $0x240] sm:$0xff] }
  0xb3   :  { %4285 = vmatpush3.bf16.msra.mxu1 %v4284_v57  ;;  %4255 = vmatprep.subr.bf16.mxu0 %v4254_v58  ;;  %v1577_v57 = vld [vmem:[%s7561_s2 + $0x2b0] sm:$0xff]  ;;  %v1578_v58 = vld [vmem:[%s7561_s2 + $0x2b8] sm:$0xff]  ;;  %v1612_v10 = vld [vmem:[%s7561_s2 + $0x3c8] sm:$0xff] }
  0xb4   :  { %4287 = vmatprep.subr.bf16.mxu1 %v4286_v62  ;;  %v4336_v62 = vpack.c.bf16 %v1592_v56, %v1591_v54  ;;  %v4306_v0 = vpack.c.bf16 %v1578_v58, %v1577_v57  ;;  %v1564_v15 = vld [vmem:[%s7561_s2 + $0x248] sm:$0xff]  ;;  %v1595_v16 = vld [vmem:[%s7561_s2 + $0x340] sm:$0xff]  ;;  %v4342_v17 = vpack.c.bf16 %v1612_v10, %v1611_v9  ;;  %v1614_v22 = vld [vmem:[%s7561_s2 + $0x3d8] sm:$0xff] }
  0xb5   :  { %v4312_v23 = vpack.c.bf16 %v1564_v15, %v1563_v14  ;;  %v1565_v25 = vld [vmem:[%s7561_s2 + $0x250] sm:$0xff]  ;;  %v1566_v26 = vld [vmem:[%s7561_s2 + $0x258] sm:$0xff]  ;;  %v1583_v31 = vld [vmem:[%s7561_s2 + $0x2e0] sm:$0xff] }
  0xb6   :  { %4257 = vmatpush3.bf16.msra.mxu0 %v4256_v5  ;;  %v1594_v5 = vld [vmem:[%s7561_s2 + $0x338] sm:$0xff]  ;;  %v1597_v27 = vld [vmem:[%s7561_s2 + $0x350] sm:$0xff]  ;;  %v1568_v44 = vld [vmem:[%s7561_s2 + $0x268] sm:$0xff] }
  0xb7   :  { %4289 = vmatpush3.bf16.msra.mxu1 %v4288_v6  ;;  %4259 = vmatprep.subr.bf16.mxu0 %v4258_v8  ;;  %v1579_v6 = vld [vmem:[%s7561_s2 + $0x2c0] sm:$0xff]  ;;  %v1580_v8 = vld [vmem:[%s7561_s2 + $0x2c8] sm:$0xff]  ;;  %v1598_v30 = vld [vmem:[%s7561_s2 + $0x358] sm:$0xff] }
  0xb8   :  { %4291 = vmatprep.subr.bf16.mxu1 %v4290_v12  ;;  %v4340_v12 = vpack.c.bf16 %v1594_v5, %v1593_v3  ;;  %v4310_v13 = vpack.c.bf16 %v1580_v8, %v1579_v6  ;;  %v4348_v41 = vpack.c.bf16 %v1598_v30, %v1597_v27  ;;  %v1599_v45 = vld [vmem:[%s7561_s2 + $0x360] sm:$0xff]  ;;  %v1600_v47 = vld [vmem:[%s7561_s2 + $0x368] sm:$0xff]  ;;  %v1585_v48 = vld [vmem:[%s7561_s2 + $0x2f0] sm:$0xff] }
  0xb9   :  { %v4352_v53 = vpack.c.bf16 %v1600_v47, %v1599_v45  ;;  %v1570_v56 = vld [vmem:[%s7561_s2 + $0x278] sm:$0xff]  ;;  %v1601_v57 = vld [vmem:[%s7561_s2 + $0x370] sm:$0xff]  ;;  %v1635_v60 = vld [vmem:[%s7561_s2 + $0x480] sm:$0xff] }
  0xba   :  { %4261 = vmatpush3.bf16.msra.mxu0 %v4260_v18  ;;  %v1596_v18 = vld [vmem:[%s7561_s2 + $0x348] sm:$0xff]  ;;  %v1602_v59 = vld [vmem:[%s7561_s2 + $0x378] sm:$0xff]  ;;  %v1651_v6 = vld [vmem:[%s7561_s2 + $0x500] sm:$0xff] }
  0xbb   :  { %4293 = vmatpush3.bf16.msra.mxu1 %v4292_v19  ;;  %4295 = vmatprep.subr.bf16.mxu0 %v4294_v20  ;;  %v1581_v19 = vld [vmem:[%s7561_s2 + $0x2d0] sm:$0xff]  ;;  %v1582_v20 = vld [vmem:[%s7561_s2 + $0x2d8] sm:$0xff]  ;;  %v4344_v24 = vpack.c.bf16 %v1596_v18, %v1595_v16  ;;  %v4356_v2 = vpack.c.bf16 %v1602_v59, %v1601_v57  ;;  %v1620_v5 = vld [vmem:[%s7561_s2 + $0x408] sm:$0xff] }
  0xbc   :  { %4327 = vmatprep.subr.bf16.mxu1 %v4326_v21  ;;  %v1613_v21 = vld [vmem:[%s7561_s2 + $0x3d0] sm:$0xff]  ;;  %v1652_v9 = vld [vmem:[%s7561_s2 + $0x508] sm:$0xff]  ;;  %v1670_v14 = vld [vmem:[%s7561_s2 + $0x598] sm:$0xff] }
  0xbd   :  { %v1637_v10 = vld [vmem:[%s7561_s2 + $0x490] sm:$0xff] }
  0xea   :  { %v389_v63 = vpop.f32.mrb[0].mxu0 }
  0xeb   :  { %v460_v28 = vpop.f32.mrb[0].mxu1  ;;  %v391_v29 = vpop.f32.mrb[1].mxu0  ;;  %v1459_v36 = vmax.f32 %v389_v63, 0.0  ;;  %v4314_v63 = vpack.c.bf16 %v1582_v20, %v1581_v19  ;;  %v1621_v19 = vld [vmem:[%s7561_s2 + $0x410] sm:$0xff]  ;;  %v1622_v20 = vld [vmem:[%s7561_s2 + $0x418] sm:$0xff] }
  0xec   :  { %v1461_v32 = vmax.f32 %v460_v28, 0.0  ;;  %v1460_v33 = vmax.f32 %v391_v29, 0.0  ;;  %v462_v34 = vpop.f32.mrb[1].mxu1  ;;  %v4346_v29 = vpack.c.bf16 %v1614_v22, %v1613_v21  ;;  %v1653_v21 = vld [vmem:[%s7561_s2 + $0x510] sm:$0xff]  ;;  %v4364_v27 = vpack.c.bf16 %v1622_v20, %v1621_v19 }
  0xed   :  { %v1462_v37 = vmax.f32 %v462_v34, 0.0 }
  0xee   :  { %2074 = vmatprep.mubr.f32.mxu0 %v1460_v33 }
  0xef   :  { %2144 = vmatprep.mubr.f32.mxu1 %v1462_v37  ;;  %2075 = vmatmul.mubr.f32.vlgmr.msra.gmra.mrb[16].mxu0 %v1459_v36  ;;  %v1616_v36 = vld [vmem:[%s7561_s2 + $0x3e8] sm:$0xff] }
  0xf0   :  { %2145 = vmatmul.mubr.f32.vlgmr.msra.gmra.mrb[16].mxu1 %v1461_v32  ;;  %4297 = vmatpush3.bf16.msra.mxu0 %v4296_v35  ;;  %v1584_v32 = vld [vmem:[%s7561_s2 + $0x2e8] sm:$0xff]  ;;  %v1615_v35 = vld [vmem:[%s7561_s2 + $0x3e0] sm:$0xff] }
  0xf1   :  { %4329 = vmatpush3.bf16.msra.mxu1 %v4328_v38  ;;  %4299 = vmatprep.subr.bf16.mxu0 %v4298_v39  ;;  %v4316_v39 = vpack.c.bf16 %v1566_v26, %v1565_v25  ;;  %v4318_v42 = vpack.c.bf16 %v1584_v32, %v1583_v31  ;;  %v4350_v46 = vpack.c.bf16 %v1616_v36, %v1615_v35  ;;  %v1671_v25 = vld [vmem:[%s7561_s2 + $0x5a0] sm:$0xff]  ;;  %v1672_v26 = vld [vmem:[%s7561_s2 + $0x5a8] sm:$0xff] }
  0xf2   :  { %4331 = vmatprep.subr.bf16.mxu1 %v4330_v43  ;;  %v1567_v43 = vld [vmem:[%s7561_s2 + $0x260] sm:$0xff]  ;;  %v1624_v32 = vld [vmem:[%s7561_s2 + $0x428] sm:$0xff]  ;;  %v4398_v36 = vpack.c.bf16 %v1672_v26, %v1671_v25  ;;  %v1649_v26 = vld [vmem:[%s7561_s2 + $0x4f0] sm:$0xff] }
  0xf3   :  { %v4320_v52 = vpack.c.bf16 %v1568_v44, %v1567_v43  ;;  %v1623_v31 = vld [vmem:[%s7561_s2 + $0x420] sm:$0xff]  ;;  %v1674_v43 = vld [vmem:[%s7561_s2 + $0x5b8] sm:$0xff]  ;;  %v1664_v25 = vld [vmem:[%s7561_s2 + $0x568] sm:$0xff] }
  0xf4   :  { %4301 = vmatpush3.bf16.msra.mxu0 %v4300_v49  ;;  %v1586_v49 = vld [vmem:[%s7561_s2 + $0x2f8] sm:$0xff]  ;;  %v4368_v45 = vpack.c.bf16 %v1624_v32, %v1623_v31 }
  0xf5   :  { %4333 = vmatpush3.bf16.msra.mxu1 %v4332_v50  ;;  %4303 = vmatprep.subr.bf16.mxu0 %v4302_v51  ;;  %v1617_v50 = vld [vmem:[%s7561_s2 + $0x3f0] sm:$0xff]  ;;  %v1618_v51 = vld [vmem:[%s7561_s2 + $0x3f8] sm:$0xff]  ;;  %v4322_v54 = vpack.c.bf16 %v1586_v49, %v1585_v48 }
  0xf6   :  { %4335 = vmatprep.subr.bf16.mxu1 %v4334_v55  ;;  %v1569_v55 = vld [vmem:[%s7561_s2 + $0x270] sm:$0xff]  ;;  %v4354_v58 = vpack.c.bf16 %v1618_v51, %v1617_v50  ;;  %v1626_v49 = vld [vmem:[%s7561_s2 + $0x438] sm:$0xff] }
  0xf7   :  { %v4324_v1 = vpack.c.bf16 %v1570_v56, %v1569_v55  ;;  %v1625_v48 = vld [vmem:[%s7561_s2 + $0x430] sm:$0xff]  ;;  %v1675_v55 = vld [vmem:[%s7561_s2 + $0x5c0] sm:$0xff]  ;;  %v1676_v56 = vld [vmem:[%s7561_s2 + $0x5c8] sm:$0xff] }
  0xf8   :  { %4305 = vmatpush3.bf16.msra.mxu0 %v4304_v61  ;;  %v1636_v61 = vld [vmem:[%s7561_s2 + $0x488] sm:$0xff]  ;;  %v1657_v50 = vld [vmem:[%s7561_s2 + $0x530] sm:$0xff]  ;;  %v4372_v57 = vpack.c.bf16 %v1626_v49, %v1625_v48 }
  0xf9   :  { %4337 = vmatpush3.bf16.msra.mxu1 %v4336_v62  ;;  %4307 = vmatprep.subr.bf16.mxu0 %v4306_v0  ;;  %v1667_v62 = vld [vmem:[%s7561_s2 + $0x580] sm:$0xff]  ;;  %v1668_v0 = vld [vmem:[%s7561_s2 + $0x588] sm:$0xff]  ;;  %v4358_v3 = vpack.c.bf16 %v1636_v61, %v1635_v60 }
  0xfa   :  { %4339 = vmatprep.subr.bf16.mxu1 %v4338_v4  ;;  %v1619_v4 = vld [vmem:[%s7561_s2 + $0x400] sm:$0xff]  ;;  %v4390_v8 = vpack.c.bf16 %v1668_v0, %v1667_v62  ;;  %v1628_v61 = vld [vmem:[%s7561_s2 + $0x448] sm:$0xff]  ;;  %v4406_v0 = vpack.c.bf16 %v1676_v56, %v1675_v55  ;;  %v1701_v56 = vld [vmem:[%s7561_s2 + $0x690] sm:$0xff] }
  0xfb   :  { %v4360_v16 = vpack.c.bf16 %v1620_v5, %v1619_v4  ;;  %v1627_v60 = vld [vmem:[%s7561_s2 + $0x440] sm:$0xff]  ;;  %v1677_v4 = vld [vmem:[%s7561_s2 + $0x5d0] sm:$0xff]  ;;  %v1678_v5 = vld [vmem:[%s7561_s2 + $0x5d8] sm:$0xff] }
  0xfc   :  { %4309 = vmatpush3.bf16.msra.mxu0 %v4308_v11  ;;  %v1638_v11 = vld [vmem:[%s7561_s2 + $0x498] sm:$0xff]  ;;  %v1659_v62 = vld [vmem:[%s7561_s2 + $0x540] sm:$0xff]  ;;  %v1716_v55 = vld [vmem:[%s7561_s2 + $0x708] sm:$0xff] }
  0xfd   :  { %4341 = vmatpush3.bf16.msra.mxu1 %v4340_v12  ;;  %4311 = vmatprep.subr.bf16.mxu0 %v4310_v13  ;;  %v6115_v28 = vpop.f32.mrb[2].mxu0  ;;  %v1669_v13 = vld [vmem:[%s7561_s2 + $0x590] sm:$0xff]  ;;  %v4362_v18 = vpack.c.bf16 %v1638_v11, %v1637_v10  ;;  %v1630_v11 = vld [vmem:[%s7561_s2 + $0x458] sm:$0xff] }
  0xfe   :  { %4343 = vmatprep.subr.bf16.mxu1 %v4342_v17  ;;  %v6126_v33 = vpop.f32.mrb[2].mxu1  ;;  %v533_v34 = vpop.f32.mrb[3].mxu0  ;;  %v1463_v12 = vmax.f32 %v6115_v28, 0.0  ;;  %v4392_v17 = vpack.c.bf16 %v1652_v9, %v1651_v6  ;;  %v4394_v22 = vpack.c.bf16 %v1670_v14, %v1669_v13  ;;  %v4376_v6 = vpack.c.bf16 %v1628_v61, %v1627_v60  ;;  %v1629_v10 = vld [vmem:[%s7561_s2 + $0x450] sm:$0xff]  ;;  %v1662_v14 = vld [vmem:[%s7561_s2 + $0x558] sm:$0xff] }
  0xff   :  { %v1464_v37 = vmax.f32 %v533_v34, 0.0  ;;  %v604_v38 = vpop.f32.mrb[3].mxu1  ;;  %v1465_v15 = vmax.f32 %v6126_v33, 0.0  ;;  %v1655_v33 = vld [vmem:[%s7561_s2 + $0x520] sm:$0xff]  ;;  %v4410_v13 = vpack.c.bf16 %v1678_v5, %v1677_v4  ;;  %v4380_v19 = vpack.c.bf16 %v1630_v11, %v1629_v10  ;;  %v1734_v60 = vld [vmem:[%s7561_s2 + $0x798] sm:$0xff]  ;;  %v1736_v10 = vld [vmem:[%s7561_s2 + $0x7a8] sm:$0xff] }
 0x100   :  { %4313 = vmatpush3.bf16.msra.mxu0 %v4312_v23  ;;  %v1466_v40 = vmax.f32 %v604_v38, 0.0  ;;  %v1654_v23 = vld [vmem:[%s7561_s2 + $0x518] sm:$0xff]  ;;  %v1641_v38 = vld [vmem:[%s7561_s2 + $0x4b0] sm:$0xff]  ;;  %v1703_v5 = vld [vmem:[%s7561_s2 + $0x6a0] sm:$0xff] }
 0x101   :  { %4345 = vmatpush3.bf16.msra.mxu1 %v4344_v24  ;;  %4315 = vmatprep.subr.bf16.mxu0 %v4314_v63  ;;  %v1639_v24 = vld [vmem:[%s7561_s2 + $0x4a0] sm:$0xff]  ;;  %v1640_v63 = vld [vmem:[%s7561_s2 + $0x4a8] sm:$0xff]  ;;  %v1718_v4 = vld [vmem:[%s7561_s2 + $0x718] sm:$0xff] }
 0x102   :  { %4347 = vmatprep.subr.bf16.mxu1 %v4346_v29  ;;  %2214 = vmatprep.mubr.f32.mxu0 %v1464_v37  ;;  %v4396_v29 = vpack.c.bf16 %v1654_v23, %v1653_v21  ;;  %v4366_v30 = vpack.c.bf16 %v1640_v63, %v1639_v24  ;;  %v1656_v37 = vld [vmem:[%s7561_s2 + $0x528] sm:$0xff]  ;;  %v1663_v24 = vld [vmem:[%s7561_s2 + $0x560] sm:$0xff] }
 0x103   :  { %2284 = vmatprep.mubr.f32.mxu1 %v1466_v40  ;;  %v1632_v23 = vld [vmem:[%s7561_s2 + $0x468] sm:$0xff] }
 0x104   :  { %4317 = vmatpush3.bf16.msra.mxu0 %v4316_v39  ;;  %v1642_v39 = vld [vmem:[%s7561_s2 + $0x4b8] sm:$0xff] }
 0x105   :  { %4349 = vmatpush3.bf16.msra.mxu1 %v4348_v41  ;;  %4319 = vmatprep.subr.bf16.mxu0 %v4318_v42  ;;  %v1673_v42 = vld [vmem:[%s7561_s2 + $0x5b0] sm:$0xff]  ;;  %v4370_v47 = vpack.c.bf16 %v1642_v39, %v1641_v38  ;;  %v1634_v39 = vld [vmem:[%s7561_s2 + $0x478] sm:$0xff] }
 0x106   :  { %4351 = vmatprep.subr.bf16.mxu1 %v4350_v46  ;;  %v4400_v46 = vpack.c.bf16 %v1656_v37, %v1655_v33  ;;  %v4402_v51 = vpack.c.bf16 %v1674_v43, %v1673_v42  ;;  %v1633_v38 = vld [vmem:[%s7561_s2 + $0x470] sm:$0xff]  ;;  %v1666_v43 = vld [vmem:[%s7561_s2 + $0x578] sm:$0xff] }
 0x107   :  { %v4388_v48 = vpack.c.bf16 %v1634_v39, %v1633_v38  ;;  %v1739_v38 = vld [vmem:[%s7561_s2 + $0x7c0] sm:$0xff]  ;;  %v1740_v39 = vld [vmem:[%s7561_s2 + $0x7c8] sm:$0xff] }
 0x108   :  { %4321 = vmatpush3.bf16.msra.mxu0 %v4320_v52  ;;  %v1658_v52 = vld [vmem:[%s7561_s2 + $0x538] sm:$0xff] }
 0x109   :  { %4353 = vmatpush3.bf16.msra.mxu1 %v4352_v53  ;;  %4323 = vmatprep.subr.bf16.mxu0 %v4322_v54  ;;  %v1643_v53 = vld [vmem:[%s7561_s2 + $0x4c0] sm:$0xff]  ;;  %v1644_v54 = vld [vmem:[%s7561_s2 + $0x4c8] sm:$0xff] }
 0x10a   :  { %4355 = vmatprep.subr.bf16.mxu1 %v4354_v58  ;;  %v4404_v58 = vpack.c.bf16 %v1658_v52, %v1657_v50  ;;  %v4374_v59 = vpack.c.bf16 %v1644_v54, %v1643_v53  ;;  %v1684_v52 = vld [vmem:[%s7561_s2 + $0x608] sm:$0xff]  ;;  %v1715_v53 = vld [vmem:[%s7561_s2 + $0x700] sm:$0xff] }
 0x10c   :  { %4325 = vmatpush3.bf16.msra.mxu0 %v4324_v1  ;;  %v1660_v1 = vld [vmem:[%s7561_s2 + $0x548] sm:$0xff] }
 0x10d   :  { %4357 = vmatpush3.bf16.msra.mxu1 %v4356_v2  ;;  %4359 = vmatprep.subr.bf16.mxu0 %v4358_v3  ;;  %v1645_v2 = vld [vmem:[%s7561_s2 + $0x4d0] sm:$0xff]  ;;  %v1646_v3 = vld [vmem:[%s7561_s2 + $0x4d8] sm:$0xff] }
 0x10e   :  { %4391 = vmatprep.subr.bf16.mxu1 %v4390_v8  ;;  %v4408_v8 = vpack.c.bf16 %v1660_v1, %v1659_v62  ;;  %v4378_v9 = vpack.c.bf16 %v1646_v3, %v1645_v2  ;;  %v1686_v2 = vld [vmem:[%s7561_s2 + $0x618] sm:$0xff]  ;;  %v1717_v3 = vld [vmem:[%s7561_s2 + $0x710] sm:$0xff] }
 0x10f   :  { %2215 = vmatmul.mubr.f32.vlgmr.msra.gmra.mrb[18].mxu0 %v1463_v12  ;;  %v1661_v12 = vld [vmem:[%s7561_s2 + $0x550] sm:$0xff] }
 0x110   :  { %2285 = vmatmul.mubr.f32.vlgmr.msra.gmra.mrb[18].mxu1 %v1465_v15  ;;  %4361 = vmatpush3.bf16.msra.mxu0 %v4360_v16  ;;  %v6232_v28 = vpop.f32.mrb[4].mxu0  ;;  %v1647_v15 = vld [vmem:[%s7561_s2 + $0x4e0] sm:$0xff]  ;;  %v1648_v16 = vld [vmem:[%s7561_s2 + $0x4e8] sm:$0xff]  ;;  %v4412_v20 = vpack.c.bf16 %v1662_v14, %v1661_v12 }
 0x111   :  { %4393 = vmatpush3.bf16.msra.mxu1 %v4392_v17  ;;  %4363 = vmatprep.subr.bf16.mxu0 %v4362_v18  ;;  %v6243_v34 = vpop.f32.mrb[4].mxu1  ;;  %v675_v35 = vpop.f32.mrb[5].mxu0  ;;  %v1679_v17 = vld [vmem:[%s7561_s2 + $0x5e0] sm:$0xff]  ;;  %v1680_v18 = vld [vmem:[%s7561_s2 + $0x5e8] sm:$0xff]  ;;  %v4382_v21 = vpack.c.bf16 %v1648_v16, %v1647_v15 }
 0x112   :  { %4395 = vmatprep.subr.bf16.mxu1 %v4394_v22  ;;  %v1468_v40 = vmax.f32 %v675_v35, 0.0  ;;  %v746_v41 = vpop.f32.mrb[5].mxu1  ;;  %v1631_v22 = vld [vmem:[%s7561_s2 + $0x460] sm:$0xff]  ;;  %v4414_v63 = vpack.c.bf16 %v1680_v18, %v1679_v17  ;;  %v1469_v61 = vmax.f32 %v6243_v34, 0.0  ;;  %v1688_v16 = vld [vmem:[%s7561_s2 + $0x628] sm:$0xff] }
 0x113   :  { %v1470_v44 = vmax.f32 %v746_v41, 0.0  ;;  %v4384_v32 = vpack.c.bf16 %v1632_v23, %v1631_v22  ;;  %v1687_v15 = vld [vmem:[%s7561_s2 + $0x620] sm:$0xff]  ;;  %v1737_v22 = vld [vmem:[%s7561_s2 + $0x7b0] sm:$0xff]  ;;  %v1738_v23 = vld [vmem:[%s7561_s2 + $0x7b8] sm:$0xff] }
 0x114   :  { %4365 = vmatpush3.bf16.msra.mxu0 %v4364_v27  ;;  %2354 = vmatprep.mubr.f32.mxu0 %v1468_v40  ;;  %v1650_v27 = vld [vmem:[%s7561_s2 + $0x4f8] sm:$0xff]  ;;  %v1665_v40 = vld [vmem:[%s7561_s2 + $0x570] sm:$0xff]  ;;  %v1719_v17 = vld [vmem:[%s7561_s2 + $0x720] sm:$0xff] }
 0x115   :  { %4397 = vmatpush3.bf16.msra.mxu1 %v4396_v29  ;;  %4367 = vmatprep.subr.bf16.mxu0 %v4366_v30  ;;  %v1681_v29 = vld [vmem:[%s7561_s2 + $0x5f0] sm:$0xff]  ;;  %v1682_v30 = vld [vmem:[%s7561_s2 + $0x5f8] sm:$0xff]  ;;  %v4386_v37 = vpack.c.bf16 %v1650_v27, %v1649_v26  ;;  %v4420_v49 = vpack.c.bf16 %v1666_v43, %v1665_v40 }
 0x116   :  { %4399 = vmatprep.subr.bf16.mxu1 %v4398_v36  ;;  %2424 = vmatprep.mubr.f32.mxu1 %v1470_v44  ;;  %v4416_v36 = vpack.c.bf16 %v1664_v25, %v1663_v24  ;;  %v4418_v42 = vpack.c.bf16 %v1682_v30, %v1681_v29  ;;  %v1699_v44 = vld [vmem:[%s7561_s2 + $0x680] sm:$0xff]  ;;  %v4432_v24 = vpack.c.bf16 %v1688_v16, %v1687_v15  ;;  %v1689_v26 = vld [vmem:[%s7561_s2 + $0x630] sm:$0xff]  ;;  %v1690_v27 = vld [vmem:[%s7561_s2 + $0x638] sm:$0xff] }
 0x117   :  { %v1721_v29 = vld [vmem:[%s7561_s2 + $0x730] sm:$0xff]  ;;  %v4466_v30 = vpack.c.bf16 %v1738_v23, %v1737_v22  ;;  %v1730_v22 = vld [vmem:[%s7561_s2 + $0x778] sm:$0xff]  ;;  %v1763_v23 = vld [vmem:[%s7561_s2 + $0x880] sm:$0xff] }
 0x118   :  { %4369 = vmatpush3.bf16.msra.mxu0 %v4368_v45  ;;  %v1700_v45 = vld [vmem:[%s7561_s2 + $0x688] sm:$0xff] }
 0x119   :  { %4401 = vmatpush3.bf16.msra.mxu1 %v4400_v46  ;;  %4371 = vmatprep.subr.bf16.mxu0 %v4370_v47  ;;  %v1731_v46 = vld [vmem:[%s7561_s2 + $0x780] sm:$0xff]  ;;  %v1732_v47 = vld [vmem:[%s7561_s2 + $0x788] sm:$0xff]  ;;  %v4422_v50 = vpack.c.bf16 %v1700_v45, %v1699_v44 }
 0x11a   :  { %4403 = vmatprep.subr.bf16.mxu1 %v4402_v51  ;;  %v1683_v51 = vld [vmem:[%s7561_s2 + $0x600] sm:$0xff]  ;;  %v4454_v54 = vpack.c.bf16 %v1732_v47, %v1731_v46  ;;  %v1692_v47 = vld [vmem:[%s7561_s2 + $0x648] sm:$0xff] }
 0x11b   :  { %v4424_v62 = vpack.c.bf16 %v1684_v52, %v1683_v51  ;;  %v1691_v46 = vld [vmem:[%s7561_s2 + $0x640] sm:$0xff]  ;;  %v1709_v51 = vld [vmem:[%s7561_s2 + $0x6d0] sm:$0xff]  ;;  %v1710_v52 = vld [vmem:[%s7561_s2 + $0x6d8] sm:$0xff] }
 0x11c   :  { %4373 = vmatpush3.bf16.msra.mxu0 %v4372_v57  ;;  %v1702_v57 = vld [vmem:[%s7561_s2 + $0x698] sm:$0xff] }
 0x11d   :  { %4405 = vmatpush3.bf16.msra.mxu1 %v4404_v58  ;;  %4375 = vmatprep.subr.bf16.mxu0 %v4374_v59  ;;  %v1467_v58 = vmax.f32 %v6232_v28, 0.0  ;;  %v1733_v59 = vld [vmem:[%s7561_s2 + $0x790] sm:$0xff]  ;;  %v4426_v1 = vpack.c.bf16 %v1702_v57, %v1701_v56  ;;  %v4442_v57 = vpack.c.bf16 %v1710_v52, %v1709_v51 }
 0x11e   :  { %4407 = vmatprep.subr.bf16.mxu1 %v4406_v0  ;;  %v4456_v0 = vpack.c.bf16 %v1716_v55, %v1715_v53  ;;  %v1685_v28 = vld [vmem:[%s7561_s2 + $0x610] sm:$0xff]  ;;  %v4458_v34 = vpack.c.bf16 %v1734_v60, %v1733_v59  ;;  %v4440_v55 = vpack.c.bf16 %v1692_v47, %v1691_v46  ;;  %v1694_v59 = vld [vmem:[%s7561_s2 + $0x658] sm:$0xff] }
 0x11f   :  { %v4428_v12 = vpack.c.bf16 %v1686_v2, %v1685_v28  ;;  %v1741_v53 = vld [vmem:[%s7561_s2 + $0x7d0] sm:$0xff]  ;;  %v1743_v28 = vld [vmem:[%s7561_s2 + $0x7e0] sm:$0xff]  ;;  %v1744_v2 = vld [vmem:[%s7561_s2 + $0x7e8] sm:$0xff] }
 0x120   :  { %4377 = vmatpush3.bf16.msra.mxu0 %v4376_v6  ;;  %v1704_v6 = vld [vmem:[%s7561_s2 + $0x6a8] sm:$0xff]  ;;  %v1725_v60 = vld [vmem:[%s7561_s2 + $0x750] sm:$0xff] }
 0x121   :  { %4409 = vmatpush3.bf16.msra.mxu1 %v4408_v8  ;;  %4379 = vmatprep.subr.bf16.mxu0 %v4378_v9  ;;  %v1735_v9 = vld [vmem:[%s7561_s2 + $0x7a0] sm:$0xff]  ;;  %v4430_v14 = vpack.c.bf16 %v1704_v6, %v1703_v5  ;;  %v1696_v6 = vld [vmem:[%s7561_s2 + $0x668] sm:$0xff]  ;;  %v1797_v47 = vld [vmem:[%s7561_s2 + $0x990] sm:$0xff] }
 0x122   :  { %4411 = vmatprep.subr.bf16.mxu1 %v4410_v13  ;;  %v4460_v13 = vpack.c.bf16 %v1718_v4, %v1717_v3  ;;  %v4462_v18 = vpack.c.bf16 %v1736_v10, %v1735_v9  ;;  %v1695_v5 = vld [vmem:[%s7561_s2 + $0x660] sm:$0xff]  ;;  %v4478_v9 = vpack.c.bf16 %v1744_v2, %v1743_v28  ;;  %v1728_v10 = vld [vmem:[%s7561_s2 + $0x768] sm:$0xff] }
 0x123   :  { %v6356_v31 = vpop.f32.mrb[6].mxu0  ;;  %v4448_v15 = vpack.c.bf16 %v1696_v6, %v1695_v5  ;;  %v1769_v5 = vld [vmem:[%s7561_s2 + $0x8b0] sm:$0xff]  ;;  %v1770_v6 = vld [vmem:[%s7561_s2 + $0x8b8] sm:$0xff] }
 0x124   :  { %4381 = vmatpush3.bf16.msra.mxu0 %v4380_v19  ;;  %v6358_v33 = vpop.f32.mrb[6].mxu1  ;;  %v6360_v35 = vpop.f32.mrb[7].mxu0  ;;  %v1720_v19 = vld [vmem:[%s7561_s2 + $0x728] sm:$0xff]  ;;  %v1471_v46 = vmax.f32 %v6356_v31, 0.0 }
 0x125   :  { %4413 = vmatpush3.bf16.msra.mxu1 %v4412_v20  ;;  %4383 = vmatprep.subr.bf16.mxu0 %v4382_v21  ;;  %v6371_v41 = vpop.f32.mrb[7].mxu1  ;;  %v1472_v8 = vmax.f32 %v6360_v35, 0.0  ;;  %v1705_v20 = vld [vmem:[%s7561_s2 + $0x6b0] sm:$0xff]  ;;  %v1706_v21 = vld [vmem:[%s7561_s2 + $0x6b8] sm:$0xff]  ;;  %v1707_v35 = vld [vmem:[%s7561_s2 + $0x6c0] sm:$0xff] }
 0x126   :  { %4415 = vmatprep.subr.bf16.mxu1 %v4414_v63  ;;  %v1474_v11 = vmax.f32 %v6371_v41, 0.0  ;;  %v4464_v63 = vpack.c.bf16 %v1720_v19, %v1719_v17  ;;  %v4434_v25 = vpack.c.bf16 %v1706_v21, %v1705_v20  ;;  %v1698_v19 = vld [vmem:[%s7561_s2 + $0x678] sm:$0xff]  ;;  %v1729_v20 = vld [vmem:[%s7561_s2 + $0x770] sm:$0xff] }
 0x128   :  { %4385 = vmatpush3.bf16.msra.mxu0 %v4384_v32  ;;  %v1722_v32 = vld [vmem:[%s7561_s2 + $0x738] sm:$0xff] }
 0x129   :  { %4417 = vmatpush3.bf16.msra.mxu1 %v4416_v36  ;;  %4387 = vmatprep.subr.bf16.mxu0 %v4386_v37  ;;  %v1708_v36 = vld [vmem:[%s7561_s2 + $0x6c8] sm:$0xff]  ;;  %v4468_v44 = vpack.c.bf16 %v1722_v32, %v1721_v29 }
 0x12a   :  { %4419 = vmatprep.subr.bf16.mxu1 %v4418_v42  ;;  %v4436_v42 = vpack.c.bf16 %v1690_v27, %v1689_v26  ;;  %v4438_v45 = vpack.c.bf16 %v1708_v36, %v1707_v35  ;;  %v4484_v27 = vpack.c.bf16 %v1730_v22, %v1729_v20  ;;  %v1748_v32 = vld [vmem:[%s7561_s2 + $0x808] sm:$0xff]  ;;  %v1779_v35 = vld [vmem:[%s7561_s2 + $0x900] sm:$0xff] }
 0x12b   :  { %v1803_v20 = vld [vmem:[%s7561_s2 + $0x9c0] sm:$0xff] }
 0x12c   :  { %4389 = vmatpush3.bf16.msra.mxu0 %v4388_v48  ;;  %v1723_v48 = vld [vmem:[%s7561_s2 + $0x740] sm:$0xff] }
 0x12d   :  { %4421 = vmatpush3.bf16.msra.mxu1 %v4420_v49  ;;  %4423 = vmatprep.subr.bf16.mxu0 %v4422_v50  ;;  %v4470_v49 = vpack.c.bf16 %v1740_v39, %v1739_v38  ;;  %v1724_v50 = vld [vmem:[%s7561_s2 + $0x748] sm:$0xff] }
 0x12e   :  { %4455 = vmatprep.subr.bf16.mxu1 %v4454_v54  ;;  %v1742_v54 = vld [vmem:[%s7561_s2 + $0x7d8] sm:$0xff]  ;;  %v4472_v56 = vpack.c.bf16 %v1724_v50, %v1723_v48  ;;  %v1780_v39 = vld [vmem:[%s7561_s2 + $0x908] sm:$0xff]  ;;  %v1473_v50 = vmax.f32 %v6358_v33, 0.0  ;;  %v1781_v33 = vld [vmem:[%s7561_s2 + $0x910] sm:$0xff] }
 0x12f   :  { %2355 = vmatmul.mubr.f32.vlgmr.msra.gmra.mrb[20].mxu0 %v1467_v58  ;;  %v1693_v58 = vld [vmem:[%s7561_s2 + $0x650] sm:$0xff]  ;;  %v1798_v48 = vld [vmem:[%s7561_s2 + $0x998] sm:$0xff] }
 0x130   :  { %2425 = vmatmul.mubr.f32.vlgmr.msra.gmra.mrb[20].mxu1 %v1469_v61  ;;  %4425 = vmatpush3.bf16.msra.mxu0 %v4424_v62  ;;  %v4474_v61 = vpack.c.bf16 %v1742_v54, %v1741_v53  ;;  %v1726_v62 = vld [vmem:[%s7561_s2 + $0x758] sm:$0xff]  ;;  %v4444_v3 = vpack.c.bf16 %v1694_v59, %v1693_v58  ;;  %v4520_v53 = vpack.c.bf16 %v1780_v39, %v1779_v35  ;;  %v1749_v54 = vld [vmem:[%s7561_s2 + $0x810] sm:$0xff]  ;;  %v1767_v58 = vld [vmem:[%s7561_s2 + $0x8a0] sm:$0xff] }
 0x131   :  { %4457 = vmatpush3.bf16.msra.mxu1 %v4456_v0  ;;  %4427 = vmatprep.subr.bf16.mxu0 %v4426_v1  ;;  %v1711_v0 = vld [vmem:[%s7561_s2 + $0x6e0] sm:$0xff]  ;;  %v1712_v1 = vld [vmem:[%s7561_s2 + $0x6e8] sm:$0xff]  ;;  %v1805_v35 = vld [vmem:[%s7561_s2 + $0x9d0] sm:$0xff] }
 0x132   :  { %4459 = vmatprep.subr.bf16.mxu1 %v4458_v34  ;;  %2494 = vmatprep.mubr.f32.mxu0 %v1472_v8  ;;  %v4476_v34 = vpack.c.bf16 %v1726_v62, %v1725_v60  ;;  %v4446_v4 = vpack.c.bf16 %v1712_v1, %v1711_v0  ;;  %v1727_v8 = vld [vmem:[%s7561_s2 + $0x760] sm:$0xff]  ;;  %v1768_v59 = vld [vmem:[%s7561_s2 + $0x8a8] sm:$0xff] }
 0x133   :  { %2564 = vmatprep.mubr.f32.mxu1 %v1474_v11  ;;  %v1713_v11 = vld [vmem:[%s7561_s2 + $0x6f0] sm:$0xff]  ;;  %v4480_v16 = vpack.c.bf16 %v1728_v10, %v1727_v8  ;;  %v1800_v62 = vld [vmem:[%s7561_s2 + $0x9a8] sm:$0xff]  ;;  %v4494_v2 = vpack.c.bf16 %v1768_v59, %v1767_v58 }
 0x134   :  { %4429 = vmatpush3.bf16.msra.mxu0 %v4428_v12  ;;  %v1714_v12 = vld [vmem:[%s7561_s2 + $0x6f8] sm:$0xff]  ;;  %v1801_v8 = vld [vmem:[%s7561_s2 + $0x9b0] sm:$0xff] }
 0x135   :  { %4461 = vmatpush3.bf16.msra.mxu1 %v4460_v13  ;;  %4431 = vmatprep.subr.bf16.mxu0 %v4430_v14  ;;  %v1745_v13 = vld [vmem:[%s7561_s2 + $0x7f0] sm:$0xff]  ;;  %v1746_v14 = vld [vmem:[%s7561_s2 + $0x7f8] sm:$0xff]  ;;  %v4450_v17 = vpack.c.bf16 %v1714_v12, %v1713_v11  ;;  %v4498_v12 = vpack.c.bf16 %v1770_v6, %v1769_v5 }
 0x136   :  { %4463 = vmatprep.subr.bf16.mxu1 %v4462_v18  ;;  %v6482_v37 = vpop.f32.mrb[8].mxu0  ;;  %v1697_v18 = vld [vmem:[%s7561_s2 + $0x670] sm:$0xff]  ;;  %v4482_v21 = vpack.c.bf16 %v1746_v14, %v1745_v13  ;;  %v1754_v14 = vld [vmem:[%s7561_s2 + $0x838] sm:$0xff] }
 0x137   :  { %v6490_v40 = vpop.f32.mrb[8].mxu1  ;;  %v6492_v41 = vpop.f32.mrb[9].mxu0  ;;  %v4452_v26 = vpack.c.bf16 %v1698_v19, %v1697_v18  ;;  %v1753_v13 = vld [vmem:[%s7561_s2 + $0x830] sm:$0xff]  ;;  %v1771_v18 = vld [vmem:[%s7561_s2 + $0x8c0] sm:$0xff]  ;;  %v1772_v19 = vld [vmem:[%s7561_s2 + $0x8c8] sm:$0xff] }
 0x138   :  { %4433 = vmatpush3.bf16.msra.mxu0 %v4432_v24  ;;  %v6494_v43 = vpop.f32.mrb[9].mxu1  ;;  %v1764_v24 = vld [vmem:[%s7561_s2 + $0x888] sm:$0xff]  ;;  %v1476_v60 = vmax.f32 %v6492_v41, 0.0  ;;  %v1751_v41 = vld [vmem:[%s7561_s2 + $0x820] sm:$0xff]  ;;  %v4500_v22 = vpack.c.bf16 %v1754_v14, %v1753_v13 }
 0x139   :  { %4465 = vmatpush3.bf16.msra.mxu1 %v4464_v63  ;;  %4435 = vmatprep.subr.bf16.mxu0 %v4434_v25  ;;  %v1795_v63 = vld [vmem:[%s7561_s2 + $0x980] sm:$0xff]  ;;  %v1796_v25 = vld [vmem:[%s7561_s2 + $0x988] sm:$0xff]  ;;  %v4486_v29 = vpack.c.bf16 %v1764_v24, %v1763_v23  ;;  %v1478_v0 = vmax.f32 %v6494_v43, 0.0  ;;  %v4502_v24 = vpack.c.bf16 %v1772_v19, %v1771_v18 }
 0x13a   :  { %4467 = vmatprep.subr.bf16.mxu1 %v4466_v30  ;;  %v1747_v30 = vld [vmem:[%s7561_s2 + $0x800] sm:$0xff]  ;;  %v4518_v38 = vpack.c.bf16 %v1796_v25, %v1795_v63  ;;  %v1756_v25 = vld [vmem:[%s7561_s2 + $0x848] sm:$0xff] }
 0x13b   :  { %v4488_v51 = vpack.c.bf16 %v1748_v32, %v1747_v30  ;;  %v1755_v63 = vld [vmem:[%s7561_s2 + $0x840] sm:$0xff]  ;;  %v1773_v30 = vld [vmem:[%s7561_s2 + $0x8d0] sm:$0xff]  ;;  %v1774_v32 = vld [vmem:[%s7561_s2 + $0x8d8] sm:$0xff] }
 0x13c   :  { %4437 = vmatpush3.bf16.msra.mxu0 %v4436_v42  ;;  %v1765_v42 = vld [vmem:[%s7561_s2 + $0x890] sm:$0xff]  ;;  %v4504_v39 = vpack.c.bf16 %v1756_v25, %v1755_v63  ;;  %v1827_v13 = vld [vmem:[%s7561_s2 + $0xa80] sm:$0xff]  ;;  %v1828_v14 = vld [vmem:[%s7561_s2 + $0xa88] sm:$0xff] }
 0x13d   :  { %4469 = vmatpush3.bf16.msra.mxu1 %v4468_v44  ;;  %4439 = vmatprep.subr.bf16.mxu0 %v4438_v45  ;;  %v1766_v44 = vld [vmem:[%s7561_s2 + $0x898] sm:$0xff]  ;;  %v4550_v19 = vpack.c.bf16 %v1828_v14, %v1827_v13  ;;  %v1829_v63 = vld [vmem:[%s7561_s2 + $0xa90] sm:$0xff]  ;;  %v1836_v13 = vld [vmem:[%s7561_s2 + $0xac8] sm:$0xff] }
 0x13e   :  { %4471 = vmatprep.subr.bf16.mxu1 %v4470_v49  ;;  %v4490_v31 = vpack.c.bf16 %v1766_v44, %v1765_v42  ;;  %v1830_v25 = vld [vmem:[%s7561_s2 + $0xa98] sm:$0xff]  ;;  %v1867_v14 = vld [vmem:[%s7561_s2 + $0xbc0] sm:$0xff] }
 0x140   :  { %4441 = vmatpush3.bf16.msra.mxu0 %v4440_v55  ;;  %v1750_v55 = vld [vmem:[%s7561_s2 + $0x818] sm:$0xff] }
 0x141   :  { %4473 = vmatpush3.bf16.msra.mxu1 %v4472_v56  ;;  %4443 = vmatprep.subr.bf16.mxu0 %v4442_v57  ;;  %v4522_v56 = vpack.c.bf16 %v1798_v48, %v1797_v47  ;;  %v1782_v57 = vld [vmem:[%s7561_s2 + $0x918] sm:$0xff]  ;;  %v4492_v1 = vpack.c.bf16 %v1750_v55, %v1749_v54  ;;  %v1757_v47 = vld [vmem:[%s7561_s2 + $0x850] sm:$0xff]  ;;  %v1775_v54 = vld [vmem:[%s7561_s2 + $0x8e0] sm:$0xff] }
 0x142   :  { %4475 = vmatprep.subr.bf16.mxu1 %v4474_v61  ;;  %v1799_v61 = vld [vmem:[%s7561_s2 + $0x9a0] sm:$0xff]  ;;  %v4524_v28 = vpack.c.bf16 %v1782_v57, %v1781_v33  ;;  %v1758_v48 = vld [vmem:[%s7561_s2 + $0x858] sm:$0xff]  ;;  %v1776_v55 = vld [vmem:[%s7561_s2 + $0x8e8] sm:$0xff] }
 0x143   :  { %v4526_v43 = vpack.c.bf16 %v1800_v62, %v1799_v61  ;;  %v1808_v57 = vld [vmem:[%s7561_s2 + $0x9e8] sm:$0xff]  ;;  %v4508_v59 = vpack.c.bf16 %v1758_v48, %v1757_v47  ;;  %v4510_v61 = vpack.c.bf16 %v1776_v55, %v1775_v54  ;;  %v1759_v62 = vld [vmem:[%s7561_s2 + $0x860] sm:$0xff] }
 0x144   :  { %4445 = vmatpush3.bf16.msra.mxu0 %v4444_v3  ;;  %v1752_v3 = vld [vmem:[%s7561_s2 + $0x828] sm:$0xff]  ;;  %v1831_v47 = vld [vmem:[%s7561_s2 + $0xaa0] sm:$0xff] }
 0x145   :  { %4477 = vmatpush3.bf16.msra.mxu1 %v4476_v34  ;;  %4447 = vmatprep.subr.bf16.mxu0 %v4446_v4  ;;  %v1783_v34 = vld [vmem:[%s7561_s2 + $0x920] sm:$0xff]  ;;  %v1784_v4 = vld [vmem:[%s7561_s2 + $0x928] sm:$0xff]  ;;  %v4496_v10 = vpack.c.bf16 %v1752_v3, %v1751_v41  ;;  %v1777_v41 = vld [vmem:[%s7561_s2 + $0x8f0] sm:$0xff] }
 0x146   :  { %4479 = vmatprep.subr.bf16.mxu1 %v4478_v9  ;;  %v1802_v9 = vld [vmem:[%s7561_s2 + $0x9b8] sm:$0xff]  ;;  %v4528_v11 = vpack.c.bf16 %v1784_v4, %v1783_v34  ;;  %v1809_v34 = vld [vmem:[%s7561_s2 + $0x9f0] sm:$0xff]  ;;  %v1832_v48 = vld [vmem:[%s7561_s2 + $0xaa8] sm:$0xff] }
 0x147   :  { %v1778_v3 = vld [vmem:[%s7561_s2 + $0x8f8] sm:$0xff] }
 0x148   :  { %4449 = vmatpush3.bf16.msra.mxu0 %v4448_v15  ;;  %v1785_v15 = vld [vmem:[%s7561_s2 + $0x930] sm:$0xff]  ;;  %v4514_v6 = vpack.c.bf16 %v1778_v3, %v1777_v41 }
 0x149   :  { %4481 = vmatpush3.bf16.msra.mxu1 %v4480_v16  ;;  %4451 = vmatprep.subr.bf16.mxu0 %v4450_v17  ;;  %v6601_v36 = vpop.f32.mrb[10].mxu0  ;;  %v4530_v16 = vpack.c.bf16 %v1802_v9, %v1801_v8  ;;  %v1786_v17 = vld [vmem:[%s7561_s2 + $0x938] sm:$0xff]  ;;  %v1761_v8 = vld [vmem:[%s7561_s2 + $0x870] sm:$0xff] }
 0x14a   :  { %4483 = vmatprep.subr.bf16.mxu1 %v4482_v21  ;;  %v6612_v45 = vpop.f32.mrb[11].mxu0  ;;  %v1804_v21 = vld [vmem:[%s7561_s2 + $0x9c8] sm:$0xff]  ;;  %v4532_v23 = vpack.c.bf16 %v1786_v17, %v1785_v15  ;;  %v1762_v9 = vld [vmem:[%s7561_s2 + $0x878] sm:$0xff]  ;;  %v1859_v15 = vld [vmem:[%s7561_s2 + $0xb80] sm:$0xff] }
 0x14b   :  { %v6621_v49 = vpop.f32.mrb[10].mxu1  ;;  %v4516_v17 = vpack.c.bf16 %v1762_v9, %v1761_v8  ;;  %v1865_v3 = vld [vmem:[%s7561_s2 + $0xbb0] sm:$0xff]  ;;  %v1818_v8 = vld [vmem:[%s7561_s2 + $0xa38] sm:$0xff] }
 0x14c   :  { %4453 = vmatpush3.bf16.msra.mxu0 %v4452_v26  ;;  %v6624_v52 = vpop.f32.mrb[11].mxu1  ;;  %v1787_v26 = vld [vmem:[%s7561_s2 + $0x940] sm:$0xff]  ;;  %v1849_v9 = vld [vmem:[%s7561_s2 + $0xb30] sm:$0xff] }
 0x14d   :  { %4485 = vmatpush3.bf16.msra.mxu1 %v4484_v27  ;;  %4487 = vmatprep.subr.bf16.mxu0 %v4486_v29  ;;  %v4534_v27 = vpack.c.bf16 %v1804_v21, %v1803_v20  ;;  %v1788_v29 = vld [vmem:[%s7561_s2 + $0x948] sm:$0xff]  ;;  %v1811_v20 = vld [vmem:[%s7561_s2 + $0xa00] sm:$0xff]  ;;  %v1482_v54 = vmax.f32 %v6624_v52, 0.0 }
 0x14e   :  { %4519 = vmatprep.subr.bf16.mxu1 %v4518_v38  ;;  %v1806_v38 = vld [vmem:[%s7561_s2 + $0x9d8] sm:$0xff]  ;;  %v4536_v44 = vpack.c.bf16 %v1788_v29, %v1787_v26  ;;  %v1812_v21 = vld [vmem:[%s7561_s2 + $0xa08] sm:$0xff]  ;;  %v1475_v26 = vmax.f32 %v6482_v37, 0.0  ;;  %v1813_v37 = vld [vmem:[%s7561_s2 + $0xa10] sm:$0xff] }
 0x14f   :  { %2495 = vmatmul.mubr.f32.vlgmr.msra.gmra.mrb[22].mxu0 %v1471_v46  ;;  %v4506_v46 = vpack.c.bf16 %v1774_v32, %v1773_v30  ;;  %v1862_v29 = vld [vmem:[%s7561_s2 + $0xb98] sm:$0xff]  ;;  %v1477_v30 = vmax.f32 %v6490_v40, 0.0  ;;  %v4552_v32 = vpack.c.bf16 %v1812_v21, %v1811_v20  ;;  %v1847_v52 = vld [vmem:[%s7561_s2 + $0xb20] sm:$0xff]  ;;  %v1820_v20 = vld [vmem:[%s7561_s2 + $0xa48] sm:$0xff] }
 0x150   :  { %2565 = vmatmul.mubr.f32.vlgmr.msra.gmra.mrb[22].mxu1 %v1473_v50  ;;  %4489 = vmatpush3.bf16.msra.mxu0 %v4488_v51  ;;  %v1789_v50 = vld [vmem:[%s7561_s2 + $0x950] sm:$0xff]  ;;  %v1851_v21 = vld [vmem:[%s7561_s2 + $0xb40] sm:$0xff] }
 0x151   :  { %4521 = vmatpush3.bf16.msra.mxu1 %v4520_v53  ;;  %4491 = vmatprep.subr.bf16.mxu0 %v4490_v31  ;;  %v4538_v53 = vpack.c.bf16 %v1806_v38, %v1805_v35  ;;  %v1790_v31 = vld [vmem:[%s7561_s2 + $0x958] sm:$0xff]  ;;  %v4554_v38 = vpack.c.bf16 %v1830_v25, %v1829_v63  ;;  %v1869_v25 = vld [vmem:[%s7561_s2 + $0xbd0] sm:$0xff] }
 0x152   :  { %4523 = vmatprep.subr.bf16.mxu1 %v4522_v56  ;;  %2634 = vmatprep.mubr.f32.mxu0 %v1476_v60  ;;  %v1807_v56 = vld [vmem:[%s7561_s2 + $0x9e0] sm:$0xff]  ;;  %v4540_v60 = vpack.c.bf16 %v1790_v31, %v1789_v50  ;;  %v1480_v50 = vmax.f32 %v6612_v45, 0.0  ;;  %v1864_v31 = vld [vmem:[%s7561_s2 + $0xba8] sm:$0xff]  ;;  %v1838_v63 = vld [vmem:[%s7561_s2 + $0xad8] sm:$0xff] }
 0x153   :  { %2704 = vmatprep.mubr.f32.mxu1 %v1478_v0  ;;  %v1760_v0 = vld [vmem:[%s7561_s2 + $0x868] sm:$0xff] }
 0x154   :  { %4493 = vmatpush3.bf16.msra.mxu0 %v4492_v1  ;;  %v1791_v1 = vld [vmem:[%s7561_s2 + $0x960] sm:$0xff]  ;;  %v4512_v4 = vpack.c.bf16 %v1760_v0, %v1759_v62 }
 0x155   :  { %4525 = vmatpush3.bf16.msra.mxu1 %v4524_v28  ;;  %4495 = vmatprep.subr.bf16.mxu0 %v4494_v2  ;;  %v4542_v28 = vpack.c.bf16 %v1808_v57, %v1807_v56  ;;  %v1792_v2 = vld [vmem:[%s7561_s2 + $0x968] sm:$0xff] }
 0x156   :  { %4527 = vmatprep.subr.bf16.mxu1 %v4526_v43  ;;  %v1810_v43 = vld [vmem:[%s7561_s2 + $0x9f8] sm:$0xff]  ;;  %v4544_v5 = vpack.c.bf16 %v1792_v2, %v1791_v1  ;;  %v1848_v1 = vld [vmem:[%s7561_s2 + $0xb28] sm:$0xff] }
 0x157   :  { %v1834_v2 = vld [vmem:[%s7561_s2 + $0xab8] sm:$0xff] }
 0x158   :  { %4497 = vmatpush3.bf16.msra.mxu0 %v4496_v10  ;;  %v1793_v10 = vld [vmem:[%s7561_s2 + $0x970] sm:$0xff] }
 0x159   :  { %4529 = vmatpush3.bf16.msra.mxu1 %v4528_v11  ;;  %4499 = vmatprep.subr.bf16.mxu0 %v4498_v12  ;;  %v4546_v11 = vpack.c.bf16 %v1810_v43, %v1809_v34  ;;  %v1794_v12 = vld [vmem:[%s7561_s2 + $0x978] sm:$0xff] }
 0x15a   :  { %4531 = vmatprep.subr.bf16.mxu1 %v4530_v16  ;;  %v1860_v16 = vld [vmem:[%s7561_s2 + $0xb88] sm:$0xff]  ;;  %v4548_v18 = vpack.c.bf16 %v1794_v12, %v1793_v10  ;;  %v1866_v34 = vld [vmem:[%s7561_s2 + $0xbb8] sm:$0xff]  ;;  %v1835_v12 = vld [vmem:[%s7561_s2 + $0xac0] sm:$0xff] }
 0x15b   :  { %v4594_v10 = vpack.c.bf16 %v1866_v34, %v1865_v3  ;;  %v1825_v3 = vld [vmem:[%s7561_s2 + $0xa70] sm:$0xff]  ;;  %v1826_v34 = vld [vmem:[%s7561_s2 + $0xa78] sm:$0xff] }
 0x15c   :  { %4501 = vmatpush3.bf16.msra.mxu0 %v4500_v22  ;;  %v6724_v42 = vpop.f32.mrb[12].mxu0  ;;  %v1843_v22 = vld [vmem:[%s7561_s2 + $0xb00] sm:$0xff] }
 0x15d   :  { %4533 = vmatpush3.bf16.msra.mxu1 %v4532_v23  ;;  %4503 = vmatprep.subr.bf16.mxu0 %v4502_v24  ;;  %v6735_v51 = vpop.f32.mrb[13].mxu0  ;;  %v4582_v23 = vpack.c.bf16 %v1860_v16, %v1859_v15  ;;  %v1844_v24 = vld [vmem:[%s7561_s2 + $0xb08] sm:$0xff] }
 0x15e   :  { %4535 = vmatprep.subr.bf16.mxu1 %v4534_v27  ;;  %v6746_v33 = vpop.f32.mrb[12].mxu1  ;;  %v1861_v27 = vld [vmem:[%s7561_s2 + $0xb90] sm:$0xff]  ;;  %v4584_v35 = vpack.c.bf16 %v1844_v24, %v1843_v22  ;;  %v1868_v15 = vld [vmem:[%s7561_s2 + $0xbc8] sm:$0xff] }
 0x15f   :  { %v6754_v58 = vpop.f32.mrb[13].mxu1  ;;  %v4586_v40 = vpack.c.bf16 %v1862_v29, %v1861_v27  ;;  %v4598_v22 = vpack.c.bf16 %v1868_v15, %v1867_v14  ;;  %v1837_v24 = vld [vmem:[%s7561_s2 + $0xad0] sm:$0xff]  ;;  %v1875_v14 = vld [vmem:[%s7561_s2 + $0xc00] sm:$0xff]  ;;  %v1876_v15 = vld [vmem:[%s7561_s2 + $0xc08] sm:$0xff] }
 0x160   :  { %4505 = vmatpush3.bf16.msra.mxu0 %v4504_v39  ;;  %v1814_v39 = vld [vmem:[%s7561_s2 + $0xa18] sm:$0xff] }
 0x161   :  { %4537 = vmatpush3.bf16.msra.mxu1 %v4536_v44  ;;  %4507 = vmatprep.subr.bf16.mxu0 %v4506_v46  ;;  %v1845_v44 = vld [vmem:[%s7561_s2 + $0xb10] sm:$0xff]  ;;  %v1846_v46 = vld [vmem:[%s7561_s2 + $0xb18] sm:$0xff]  ;;  %v4556_v56 = vpack.c.bf16 %v1814_v39, %v1813_v37 }
 0x162   :  { %4539 = vmatprep.subr.bf16.mxu1 %v4538_v53  ;;  %v1863_v53 = vld [vmem:[%s7561_s2 + $0xba0] sm:$0xff]  ;;  %v4588_v45 = vpack.c.bf16 %v1846_v46, %v1845_v44  ;;  %v1854_v39 = vld [vmem:[%s7561_s2 + $0xb58] sm:$0xff] }
 0x163   :  { %v4590_v0 = vpack.c.bf16 %v1864_v31, %v1863_v53  ;;  %v1839_v44 = vld [vmem:[%s7561_s2 + $0xae0] sm:$0xff] }
 0x164   :  { %4509 = vmatpush3.bf16.msra.mxu0 %v4508_v59  ;;  %v4558_v59 = vpack.c.bf16 %v1832_v48, %v1831_v47  ;;  %v1871_v46 = vld [vmem:[%s7561_s2 + $0xbe0] sm:$0xff]  ;;  %v1872_v47 = vld [vmem:[%s7561_s2 + $0xbe8] sm:$0xff] }
 0x165   :  { %4541 = vmatpush3.bf16.msra.mxu1 %v4540_v60  ;;  %4511 = vmatprep.subr.bf16.mxu0 %v4510_v61  ;;  %v1815_v60 = vld [vmem:[%s7561_s2 + $0xa20] sm:$0xff]  ;;  %v1816_v61 = vld [vmem:[%s7561_s2 + $0xa28] sm:$0xff] }
 0x166   :  { %4543 = vmatprep.subr.bf16.mxu1 %v4542_v28  ;;  %v1833_v28 = vld [vmem:[%s7561_s2 + $0xab0] sm:$0xff]  ;;  %v4560_v43 = vpack.c.bf16 %v1816_v61, %v1815_v60  ;;  %v1823_v31 = vld [vmem:[%s7561_s2 + $0xa60] sm:$0xff]  ;;  %v1842_v61 = vld [vmem:[%s7561_s2 + $0xaf8] sm:$0xff] }
 0x167   :  { %v1841_v60 = vld [vmem:[%s7561_s2 + $0xaf0] sm:$0xff] }
 0x168   :  { %4513 = vmatpush3.bf16.msra.mxu0 %v4512_v4  ;;  %v4592_v4 = vpack.c.bf16 %v1848_v1, %v1847_v52  ;;  %v1873_v52 = vld [vmem:[%s7561_s2 + $0xbf0] sm:$0xff] }
 0x169   :  { %4545 = vmatpush3.bf16.msra.mxu1 %v4544_v5  ;;  %4515 = vmatprep.subr.bf16.mxu0 %v4514_v6  ;;  %v4562_v5 = vpack.c.bf16 %v1834_v2, %v1833_v28  ;;  %v1817_v6 = vld [vmem:[%s7561_s2 + $0xa30] sm:$0xff]  ;;  %v4578_v2 = vpack.c.bf16 %v1842_v61, %v1841_v60 }
 0x16a   :  { %4547 = vmatprep.subr.bf16.mxu1 %v4546_v11  ;;  %v1850_v11 = vld [vmem:[%s7561_s2 + $0xb38] sm:$0xff]  ;;  %v4564_v16 = vpack.c.bf16 %v1818_v8, %v1817_v6  ;;  %v1891_v6 = vld [vmem:[%s7561_s2 + $0xc80] sm:$0xff]  ;;  %v1892_v8 = vld [vmem:[%s7561_s2 + $0xc88] sm:$0xff] }
 0x16c   :  { %4517 = vmatpush3.bf16.msra.mxu0 %v4516_v17  ;;  %v4596_v17 = vpack.c.bf16 %v1850_v11, %v1849_v9  ;;  %v1923_v9 = vld [vmem:[%s7561_s2 + $0xd80] sm:$0xff]  ;;  %v4580_v11 = vpack.c.bf16 %v1826_v34, %v1825_v3  ;;  %v1900_v34 = vld [vmem:[%s7561_s2 + $0xcc8] sm:$0xff] }
 0x16d   :  { %4549 = vmatpush3.bf16.msra.mxu1 %v4548_v18  ;;  %4551 = vmatprep.subr.bf16.mxu0 %v4550_v19  ;;  %v4566_v18 = vpack.c.bf16 %v1836_v13, %v1835_v12  ;;  %v1819_v19 = vld [vmem:[%s7561_s2 + $0xa40] sm:$0xff]  ;;  %v4614_v13 = vpack.c.bf16 %v1892_v8, %v1891_v6 }
 0x16e   :  { %4583 = vmatprep.subr.bf16.mxu1 %v4582_v23  ;;  %v1852_v23 = vld [vmem:[%s7561_s2 + $0xb48] sm:$0xff]  ;;  %v4568_v27 = vpack.c.bf16 %v1820_v20, %v1819_v19  ;;  %v1893_v19 = vld [vmem:[%s7561_s2 + $0xc90] sm:$0xff]  ;;  %v1894_v20 = vld [vmem:[%s7561_s2 + $0xc98] sm:$0xff] }
 0x16f   :  { %2635 = vmatmul.mubr.f32.vlgmr.msra.gmra.mrb[24].mxu0 %v1475_v26  ;;  %v6856_v55 = vpop.f32.mrb[14].mxu0  ;;  %v1870_v26 = vld [vmem:[%s7561_s2 + $0xbd8] sm:$0xff]  ;;  %v4600_v29 = vpack.c.bf16 %v1852_v23, %v1851_v21  ;;  %v1925_v21 = vld [vmem:[%s7561_s2 + $0xd90] sm:$0xff]  ;;  %v4616_v23 = vpack.c.bf16 %v1876_v15, %v1875_v14  ;;  %v1899_v3 = vld [vmem:[%s7561_s2 + $0xcc0] sm:$0xff] }
 0x170   :  { %2705 = vmatmul.mubr.f32.vlgmr.msra.gmra.mrb[24].mxu1 %v1477_v30  ;;  %4553 = vmatpush3.bf16.msra.mxu0 %v4552_v32  ;;  %v6858_v57 = vpop.f32.mrb[15].mxu0  ;;  %v4570_v30 = vpack.c.bf16 %v1838_v63, %v1837_v24  ;;  %v1821_v32 = vld [vmem:[%s7561_s2 + $0xa50] sm:$0xff]  ;;  %v4602_v37 = vpack.c.bf16 %v1870_v26, %v1869_v25  ;;  %v1479_v24 = vmax.f32 %v6601_v36, 0.0  ;;  %v4618_v25 = vpack.c.bf16 %v1894_v20, %v1893_v19  ;;  %v1902_v15 = vld [vmem:[%s7561_s2 + $0xcd8] sm:$0xff] }
 0x171   :  { %4585 = vmatpush3.bf16.msra.mxu1 %v4584_v35  ;;  %4555 = vmatprep.subr.bf16.mxu0 %v4554_v38  ;;  %v6869_v62 = vpop.f32.mrb[14].mxu1  ;;  %v1822_v35 = vld [vmem:[%s7561_s2 + $0xa58] sm:$0xff]  ;;  %v1853_v38 = vld [vmem:[%s7561_s2 + $0xb50] sm:$0xff]  ;;  %v1484_v36 = vmax.f32 %v6735_v51, 0.0  ;;  %v1928_v51 = vld [vmem:[%s7561_s2 + $0xda8] sm:$0xff]  ;;  %v4630_v8 = vpack.c.bf16 %v1900_v34, %v1899_v3 }
 0x172   :  { %4587 = vmatprep.subr.bf16.mxu1 %v4586_v40  ;;  %2774 = vmatprep.mubr.f32.mxu0 %v1480_v50  ;;  %v6880_v41 = vpop.f32.mrb[15].mxu1  ;;  %v1840_v40 = vld [vmem:[%s7561_s2 + $0xae8] sm:$0xff]  ;;  %v4572_v48 = vpack.c.bf16 %v1822_v35, %v1821_v32  ;;  %v4604_v50 = vpack.c.bf16 %v1854_v39, %v1853_v38  ;;  %v1877_v26 = vld [vmem:[%s7561_s2 + $0xc10] sm:$0xff]  ;;  %v1910_v35 = vld [vmem:[%s7561_s2 + $0xd18] sm:$0xff]  ;;  %v1486_v39 = vmax.f32 %v6754_v58, 0.0 }
 0x173   :  { %2844 = vmatprep.mubr.f32.mxu1 %v1482_v54  ;;  %v4574_v53 = vpack.c.bf16 %v1840_v40, %v1839_v44  ;;  %v1824_v54 = vld [vmem:[%s7561_s2 + $0xa68] sm:$0xff]  ;;  %v1895_v38 = vld [vmem:[%s7561_s2 + $0xca0] sm:$0xff]  ;;  %v1901_v14 = vld [vmem:[%s7561_s2 + $0xcd0] sm:$0xff] }
 0x174   :  { %4557 = vmatpush3.bf16.msra.mxu0 %v4556_v56  ;;  %v1855_v56 = vld [vmem:[%s7561_s2 + $0xb60] sm:$0xff]  ;;  %v4576_v1 = vpack.c.bf16 %v1824_v54, %v1823_v31  ;;  %v1880_v58 = vld [vmem:[%s7561_s2 + $0xc28] sm:$0xff]  ;;  %v1897_v31 = vld [vmem:[%s7561_s2 + $0xcb0] sm:$0xff]  ;;  %v4634_v20 = vpack.c.bf16 %v1902_v15, %v1901_v14  ;;  %v1485_v15 = vmax.f32 %v6746_v33, 0.0 }
 0x175   :  { %4589 = vmatpush3.bf16.msra.mxu1 %v4588_v45  ;;  %4559 = vmatprep.subr.bf16.mxu0 %v4558_v59  ;;  %v4606_v45 = vpack.c.bf16 %v1872_v47, %v1871_v46  ;;  %v1856_v59 = vld [vmem:[%s7561_s2 + $0xb68] sm:$0xff]  ;;  %v1879_v47 = vld [vmem:[%s7561_s2 + $0xc20] sm:$0xff]  ;;  %v1898_v54 = vld [vmem:[%s7561_s2 + $0xcb8] sm:$0xff] }
 0x176   :  { %4591 = vmatprep.subr.bf16.mxu1 %v4590_v0  ;;  %v1874_v0 = vld [vmem:[%s7561_s2 + $0xbf8] sm:$0xff]  ;;  %v4608_v28 = vpack.c.bf16 %v1856_v59, %v1855_v56  ;;  %v1929_v56 = vld [vmem:[%s7561_s2 + $0xdb0] sm:$0xff]  ;;  %v4624_v59 = vpack.c.bf16 %v1880_v58, %v1879_v47  ;;  %v4626_v61 = vpack.c.bf16 %v1898_v54, %v1897_v31  ;;  %v1971_v34 = vld [vmem:[%s7561_s2 + $0xf00] sm:$0xff] }
 0x177   :  { %v1921_v31 = vld [vmem:[%s7561_s2 + $0xd70] sm:$0xff]  ;;  %v1991_v33 = vld [vmem:[%s7561_s2 + $0xfa0] sm:$0xff] }
 0x178   :  { %4561 = vmatpush3.bf16.msra.mxu0 %v4560_v43  ;;  %v1857_v43 = vld [vmem:[%s7561_s2 + $0xb70] sm:$0xff] }
 0x179   :  { %4593 = vmatpush3.bf16.msra.mxu1 %v4592_v4  ;;  %4563 = vmatprep.subr.bf16.mxu0 %v4562_v5  ;;  %v4610_v4 = vpack.c.bf16 %v1874_v0, %v1873_v52  ;;  %v1858_v5 = vld [vmem:[%s7561_s2 + $0xb78] sm:$0xff]  ;;  %v1881_v52 = vld [vmem:[%s7561_s2 + $0xc30] sm:$0xff] }
 0x17a   :  { %4595 = vmatprep.subr.bf16.mxu1 %v4594_v10  ;;  %v1924_v10 = vld [vmem:[%s7561_s2 + $0xd88] sm:$0xff]  ;;  %v4612_v12 = vpack.c.bf16 %v1858_v5, %v1857_v43  ;;  %v1882_v0 = vld [vmem:[%s7561_s2 + $0xc38] sm:$0xff]  ;;  %v1931_v43 = vld [vmem:[%s7561_s2 + $0xdc0] sm:$0xff] }
 0x17b   :  { %v4628_v5 = vpack.c.bf16 %v1882_v0, %v1881_v52  ;;  %v1973_v14 = vld [vmem:[%s7561_s2 + $0xf10] sm:$0xff] }
 0x17c   :  { %4565 = vmatpush3.bf16.msra.mxu0 %v4564_v16  ;;  %v1907_v16 = vld [vmem:[%s7561_s2 + $0xd00] sm:$0xff] }
 0x17d   :  { %4597 = vmatpush3.bf16.msra.mxu1 %v4596_v17  ;;  %4567 = vmatprep.subr.bf16.mxu0 %v4566_v18  ;;  %v4646_v17 = vpack.c.bf16 %v1924_v10, %v1923_v9  ;;  %v1908_v18 = vld [vmem:[%s7561_s2 + $0xd08] sm:$0xff]  ;;  %v1883_v9 = vld [vmem:[%s7561_s2 + $0xc40] sm:$0xff] }
 0x17e   :  { %4599 = vmatprep.subr.bf16.mxu1 %v4598_v22  ;;  %v1926_v22 = vld [vmem:[%s7561_s2 + $0xd98] sm:$0xff]  ;;  %v4648_v63 = vpack.c.bf16 %v1908_v18, %v1907_v16  ;;  %v1884_v10 = vld [vmem:[%s7561_s2 + $0xc48] sm:$0xff]  ;;  %v1933_v16 = vld [vmem:[%s7561_s2 + $0xdd0] sm:$0xff] }
 0x17f   :  { %v4650_v32 = vpack.c.bf16 %v1926_v22, %v1925_v21  ;;  %v4632_v18 = vpack.c.bf16 %v1884_v10, %v1883_v9  ;;  %v1885_v21 = vld [vmem:[%s7561_s2 + $0xc50] sm:$0xff]  ;;  %v1886_v22 = vld [vmem:[%s7561_s2 + $0xc58] sm:$0xff]  ;;  %v1483_v10 = vmax.f32 %v6724_v42, 0.0 }
 0x180   :  { %4569 = vmatpush3.bf16.msra.mxu0 %v4568_v27  ;;  %v1878_v27 = vld [vmem:[%s7561_s2 + $0xc18] sm:$0xff] }
 0x181   :  { %4601 = vmatpush3.bf16.msra.mxu1 %v4600_v29  ;;  %4571 = vmatprep.subr.bf16.mxu0 %v4570_v30  ;;  %v1909_v29 = vld [vmem:[%s7561_s2 + $0xd10] sm:$0xff]  ;;  %v1481_v30 = vmax.f32 %v6621_v49, 0.0  ;;  %v1927_v49 = vld [vmem:[%s7561_s2 + $0xda0] sm:$0xff]  ;;  %v4620_v44 = vpack.c.bf16 %v1878_v27, %v1877_v26  ;;  %v1904_v26 = vld [vmem:[%s7561_s2 + $0xce8] sm:$0xff] }
 0x182   :  { %4603 = vmatprep.subr.bf16.mxu1 %v4602_v37  ;;  %v1896_v37 = vld [vmem:[%s7561_s2 + $0xca8] sm:$0xff]  ;;  %v4652_v40 = vpack.c.bf16 %v1910_v35, %v1909_v29  ;;  %v1935_v27 = vld [vmem:[%s7561_s2 + $0xde0] sm:$0xff]  ;;  %v1990_v9 = vld [vmem:[%s7561_s2 + $0xf98] sm:$0xff] }
 0x183   :  { %v4622_v46 = vpack.c.bf16 %v1896_v37, %v1895_v38  ;;  %v1936_v29 = vld [vmem:[%s7561_s2 + $0xde8] sm:$0xff]  ;;  %v1887_v35 = vld [vmem:[%s7561_s2 + $0xc60] sm:$0xff]  ;;  %v1974_v42 = vld [vmem:[%s7561_s2 + $0xf18] sm:$0xff] }
 0x184   :  { %4573 = vmatpush3.bf16.msra.mxu0 %v4572_v48  ;;  %v1911_v48 = vld [vmem:[%s7561_s2 + $0xd20] sm:$0xff]  ;;  %v1888_v38 = vld [vmem:[%s7561_s2 + $0xc68] sm:$0xff] }
 0x185   :  { %4605 = vmatpush3.bf16.msra.mxu1 %v4604_v50  ;;  %4575 = vmatprep.subr.bf16.mxu0 %v4574_v53  ;;  %v4654_v50 = vpack.c.bf16 %v1928_v51, %v1927_v49  ;;  %v1912_v53 = vld [vmem:[%s7561_s2 + $0xd28] sm:$0xff]  ;;  %v1919_v37 = vld [vmem:[%s7561_s2 + $0xd60] sm:$0xff]  ;;  %v1905_v51 = vld [vmem:[%s7561_s2 + $0xcf0] sm:$0xff]  ;;  %v4640_v47 = vpack.c.bf16 %v1888_v38, %v1887_v35 }
 0x186   :  { %4607 = vmatprep.subr.bf16.mxu1 %v4606_v45  ;;  %v1930_v45 = vld [vmem:[%s7561_s2 + $0xdb8] sm:$0xff]  ;;  %v4656_v60 = vpack.c.bf16 %v1912_v53, %v1911_v48  ;;  %v1920_v49 = vld [vmem:[%s7561_s2 + $0xd68] sm:$0xff] }
 0x187   :  { %v4672_v58 = vpack.c.bf16 %v1920_v49, %v1919_v37  ;;  %v1890_v53 = vld [vmem:[%s7561_s2 + $0xc78] sm:$0xff] }
 0x188   :  { %4577 = vmatpush3.bf16.msra.mxu0 %v4576_v1  ;;  %v1913_v1 = vld [vmem:[%s7561_s2 + $0xd30] sm:$0xff]  ;;  %v1946_v49 = vld [vmem:[%s7561_s2 + $0xe38] sm:$0xff] }
 0x189   :  { %4609 = vmatpush3.bf16.msra.mxu1 %v4608_v28  ;;  %4579 = vmatprep.subr.bf16.mxu0 %v4578_v2  ;;  %v4658_v28 = vpack.c.bf16 %v1930_v45, %v1929_v56  ;;  %v1914_v2 = vld [vmem:[%s7561_s2 + $0xd38] sm:$0xff]  ;;  %v1955_v45 = vld [vmem:[%s7561_s2 + $0xe80] sm:$0xff] }
 0x18a   :  { %4611 = vmatprep.subr.bf16.mxu1 %v4610_v4  ;;  %v1932_v4 = vld [vmem:[%s7561_s2 + $0xdc8] sm:$0xff]  ;;  %v4660_v6 = vpack.c.bf16 %v1914_v2, %v1913_v1  ;;  %v1922_v56 = vld [vmem:[%s7561_s2 + $0xd78] sm:$0xff] }
 0x18b   :  { %v4676_v0 = vpack.c.bf16 %v1922_v56, %v1921_v31  ;;  %v1940_v2 = vld [vmem:[%s7561_s2 + $0xe08] sm:$0xff] }
 0x18c   :  { %4581 = vmatpush3.bf16.msra.mxu0 %v4580_v11  ;;  %v1915_v11 = vld [vmem:[%s7561_s2 + $0xd40] sm:$0xff]  ;;  %v1948_v56 = vld [vmem:[%s7561_s2 + $0xe48] sm:$0xff] }
 0x18d   :  { %4613 = vmatpush3.bf16.msra.mxu1 %v4612_v12  ;;  %4615 = vmatprep.subr.bf16.mxu0 %v4614_v13  ;;  %v4662_v12 = vpack.c.bf16 %v1932_v4, %v1931_v43  ;;  %v1916_v13 = vld [vmem:[%s7561_s2 + $0xd48] sm:$0xff]  ;;  %v1957_v4 = vld [vmem:[%s7561_s2 + $0xe90] sm:$0xff] }
 0x18e   :  { %4647 = vmatprep.subr.bf16.mxu1 %v4646_v17  ;;  %v1934_v17 = vld [vmem:[%s7561_s2 + $0xdd8] sm:$0xff]  ;;  %v4664_v19 = vpack.c.bf16 %v1916_v13, %v1915_v11  ;;  %v1972_v43 = vld [vmem:[%s7561_s2 + $0xf08] sm:$0xff] }
 0x18f   :  { %2775 = vmatmul.mubr.f32.vlgmr.msra.gmra.mrb[26].mxu0 %v1479_v24  ;;  %v4666_v24 = vpack.c.bf16 %v1934_v17, %v1933_v16  ;;  %v4712_v11 = vpack.c.bf16 %v1972_v43, %v1971_v34  ;;  %v1942_v13 = vld [vmem:[%s7561_s2 + $0xe18] sm:$0xff]  ;;  %v1959_v17 = vld [vmem:[%s7561_s2 + $0xea0] sm:$0xff]  ;;  %v1949_v34 = vld [vmem:[%s7561_s2 + $0xe50] sm:$0xff] }
 0x190   :  { %2845 = vmatmul.mubr.f32.vlgmr.msra.gmra.mrb[26].mxu1 %v1481_v30  ;;  %4617 = vmatpush3.bf16.msra.mxu0 %v4616_v23  ;;  %v1917_v23 = vld [vmem:[%s7561_s2 + $0xd50] sm:$0xff]  ;;  %v4636_v30 = vpack.c.bf16 %v1886_v22, %v1885_v21  ;;  %v1992_v21 = vld [vmem:[%s7561_s2 + $0xfa8] sm:$0xff]  ;;  %v1490_v22 = vmax.f32 %v6880_v41, 0.0  ;;  %v1950_v43 = vld [vmem:[%s7561_s2 + $0xe58] sm:$0xff] }
 0x191   :  { %4649 = vmatpush3.bf16.msra.mxu1 %v4648_v63  ;;  %4619 = vmatprep.subr.bf16.mxu0 %v4618_v25  ;;  %v1918_v63 = vld [vmem:[%s7561_s2 + $0xd58] sm:$0xff]  ;;  %v1903_v25 = vld [vmem:[%s7561_s2 + $0xce0] sm:$0xff]  ;;  %v4718_v41 = vpack.c.bf16 %v1992_v21, %v1991_v33 }
 0x192   :  { %4651 = vmatprep.subr.bf16.mxu1 %v4650_v32  ;;  %2914 = vmatprep.mubr.f32.mxu0 %v1484_v36  ;;  %v4668_v36 = vpack.c.bf16 %v1918_v63, %v1917_v23  ;;  %v4638_v32 = vpack.c.bf16 %v1904_v26, %v1903_v25  ;;  %v1944_v25 = vld [vmem:[%s7561_s2 + $0xe28] sm:$0xff]  ;;  %v1975_v26 = vld [vmem:[%s7561_s2 + $0xf20] sm:$0xff]  ;;  %v1970_v33 = vld [vmem:[%s7561_s2 + $0xef8] sm:$0xff] }
 0x193   :  { %2984 = vmatprep.mubr.f32.mxu1 %v1486_v39  ;;  %v4670_v39 = vpack.c.bf16 %v1936_v29, %v1935_v27  ;;  %v1976_v27 = vld [vmem:[%s7561_s2 + $0xf28] sm:$0xff]  ;;  %v1961_v29 = vld [vmem:[%s7561_s2 + $0xeb0] sm:$0xff] }
 0x194   :  { %4621 = vmatpush3.bf16.msra.mxu0 %v4620_v44  ;;  %v1906_v44 = vld [vmem:[%s7561_s2 + $0xcf8] sm:$0xff]  ;;  %v4720_v38 = vpack.c.bf16 %v1976_v27, %v1975_v26 }
 0x195   :  { %4653 = vmatpush3.bf16.msra.mxu1 %v4652_v40  ;;  %4623 = vmatprep.subr.bf16.mxu0 %v4622_v46  ;;  %v1937_v40 = vld [vmem:[%s7561_s2 + $0xdf0] sm:$0xff]  ;;  %v1938_v46 = vld [vmem:[%s7561_s2 + $0xdf8] sm:$0xff]  ;;  %v4642_v48 = vpack.c.bf16 %v1906_v44, %v1905_v51 }
 0x196   :  { %4655 = vmatprep.subr.bf16.mxu1 %v4654_v50  ;;  %v1889_v50 = vld [vmem:[%s7561_s2 + $0xc70] sm:$0xff]  ;;  %v4674_v54 = vpack.c.bf16 %v1938_v46, %v1937_v40  ;;  %v1978_v40 = vld [vmem:[%s7561_s2 + $0xf38] sm:$0xff]  ;;  %v1963_v46 = vld [vmem:[%s7561_s2 + $0xec0] sm:$0xff] }
 0x197   :  { %v4644_v52 = vpack.c.bf16 %v1890_v53, %v1889_v50  ;;  %v1977_v51 = vld [vmem:[%s7561_s2 + $0xf30] sm:$0xff] }
 0x198   :  { %4625 = vmatpush3.bf16.msra.mxu0 %v4624_v59  ;;  %v1956_v59 = vld [vmem:[%s7561_s2 + $0xe88] sm:$0xff]  ;;  %v4724_v53 = vpack.c.bf16 %v1978_v40, %v1977_v51  ;;  %v1489_v40 = vmax.f32 %v6869_v62, 0.0 }
 0x199   :  { %4657 = vmatpush3.bf16.msra.mxu1 %v4656_v60  ;;  %4627 = vmatprep.subr.bf16.mxu0 %v4626_v61  ;;  %v1987_v60 = vld [vmem:[%s7561_s2 + $0xf80] sm:$0xff]  ;;  %v1988_v61 = vld [vmem:[%s7561_s2 + $0xf88] sm:$0xff]  ;;  %v4678_v1 = vpack.c.bf16 %v1956_v59, %v1955_v45 }
 0x19a   :  { %4659 = vmatprep.subr.bf16.mxu1 %v4658_v28  ;;  %v1939_v28 = vld [vmem:[%s7561_s2 + $0xe00] sm:$0xff]  ;;  %v4710_v3 = vpack.c.bf16 %v1988_v61, %v1987_v60  ;;  %v1980_v60 = vld [vmem:[%s7561_s2 + $0xf48] sm:$0xff]  ;;  %v1965_v61 = vld [vmem:[%s7561_s2 + $0xed0] sm:$0xff] }
 0x19b   :  { %v1979_v45 = vld [vmem:[%s7561_s2 + $0xf40] sm:$0xff] }
 0x19c   :  { %4629 = vmatpush3.bf16.msra.mxu0 %v4628_v5  ;;  %v1958_v5 = vld [vmem:[%s7561_s2 + $0xe98] sm:$0xff] }
 0x19d   :  { %4661 = vmatpush3.bf16.msra.mxu1 %v4660_v6  ;;  %4631 = vmatprep.subr.bf16.mxu0 %v4630_v8  ;;  %v4680_v6 = vpack.c.bf16 %v1940_v2, %v1939_v28  ;;  %v1989_v8 = vld [vmem:[%s7561_s2 + $0xf90] sm:$0xff]  ;;  %v4682_v16 = vpack.c.bf16 %v1958_v5, %v1957_v4  ;;  %v4728_v2 = vpack.c.bf16 %v1980_v60, %v1979_v45 }
 0x19e   :  { %4663 = vmatprep.subr.bf16.mxu1 %v4662_v12  ;;  %v1941_v12 = vld [vmem:[%s7561_s2 + $0xe10] sm:$0xff] }
 0x19f   :  { %v4684_v23 = vpack.c.bf16 %v1942_v13, %v1941_v12  ;;  %v1981_v4 = vld [vmem:[%s7561_s2 + $0xf50] sm:$0xff]  ;;  %v4700_v12 = vpack.c.bf16 %v1950_v43, %v1949_v34  ;;  %v3138_v34 = vld [vmem:[%s7563_s4 + $0x38] sm:$0xff] }
 0x1a0   :  { %4633 = vmatpush3.bf16.msra.mxu0 %v4632_v18  ;;  %v1960_v18 = vld [vmem:[%s7561_s2 + $0xea8] sm:$0xff] }
 0x1a1   :  { %4665 = vmatpush3.bf16.msra.mxu1 %v4664_v19  ;;  %4635 = vmatprep.subr.bf16.mxu0 %v4634_v20  ;;  %v1488_v19 = vmax.f32 %v6858_v57, 0.0  ;;  %v4714_v20 = vpack.c.bf16 %v1990_v9, %v1989_v8  ;;  %v4686_v63 = vpack.c.bf16 %v1960_v18, %v1959_v17  ;;  %v1943_v57 = vld [vmem:[%s7561_s2 + $0xe20] sm:$0xff]  ;;  %v1968_v9 = vld [vmem:[%s7561_s2 + $0xee8] sm:$0xff] }
 0x1a2   :  { %4667 = vmatprep.subr.bf16.mxu1 %v4666_v24  ;;  %v4716_v24 = vpack.c.bf16 %v1974_v42, %v1973_v14  ;;  %v4688_v35 = vpack.c.bf16 %v1944_v25, %v1943_v57  ;;  %v1967_v8 = vld [vmem:[%s7561_s2 + $0xee0] sm:$0xff] }
 0x1a3   :  { %v4702_v14 = vpack.c.bf16 %v1968_v9, %v1967_v8  ;;  %v1983_v42 = vld [vmem:[%s7561_s2 + $0xf60] sm:$0xff] }
 0x1a4   :  { %4637 = vmatpush3.bf16.msra.mxu0 %v4636_v30  ;;  %v1962_v30 = vld [vmem:[%s7561_s2 + $0xeb8] sm:$0xff] }
 0x1a5   :  { %4669 = vmatpush3.bf16.msra.mxu1 %v4668_v36  ;;  %4639 = vmatprep.subr.bf16.mxu0 %v4638_v32  ;;  %v1993_v36 = vld [vmem:[%s7561_s2 + $0xfb0] sm:$0xff]  ;;  %v1994_v32 = vld [vmem:[%s7561_s2 + $0xfb8] sm:$0xff]  ;;  %v4690_v37 = vpack.c.bf16 %v1962_v30, %v1961_v29 }
 0x1a6   :  { %4671 = vmatprep.subr.bf16.mxu1 %v4670_v39  ;;  %v1945_v39 = vld [vmem:[%s7561_s2 + $0xe30] sm:$0xff]  ;;  %v4722_v44 = vpack.c.bf16 %v1994_v32, %v1993_v36  ;;  %v1954_v36 = vld [vmem:[%s7561_s2 + $0xe78] sm:$0xff] }
 0x1a7   :  { %v4692_v50 = vpack.c.bf16 %v1946_v49, %v1945_v39  ;;  %v1953_v30 = vld [vmem:[%s7561_s2 + $0xe70] sm:$0xff] }
 0x1a8   :  { %4641 = vmatpush3.bf16.msra.mxu0 %v4640_v47  ;;  %v1964_v47 = vld [vmem:[%s7561_s2 + $0xec8] sm:$0xff]  ;;  %v4708_v49 = vpack.c.bf16 %v1954_v36, %v1953_v30  ;;  %v3254_v30 = vld [vmem:[%s7565_s6 + $0x90] sm:$0xff]  ;;  %v3255_v36 = vld [vmem:[%s7565_s6 + $0x98] sm:$0xff] }
 0x1a9   :  { %4673 = vmatpush3.bf16.msra.mxu1 %v4672_v58  ;;  %4643 = vmatprep.subr.bf16.mxu0 %v4642_v48  ;;  %v1995_v58 = vld [vmem:[%s7561_s2 + $0xfc0] sm:$0xff]  ;;  %v1996_v48 = vld [vmem:[%s7561_s2 + $0xfc8] sm:$0xff]  ;;  %v4694_v31 = vpack.c.bf16 %v1964_v47, %v1963_v46 }
 0x1aa   :  { %4675 = vmatprep.subr.bf16.mxu1 %v4674_v54  ;;  %v1947_v54 = vld [vmem:[%s7561_s2 + $0xe40] sm:$0xff]  ;;  %v4726_v59 = vpack.c.bf16 %v1996_v48, %v1995_v58 }
 0x1ab   :  { %v4696_v28 = vpack.c.bf16 %v1948_v56, %v1947_v54 }
 0x1ac   :  { %4645 = vmatpush3.bf16.msra.mxu0 %v4644_v52  ;;  %v1966_v52 = vld [vmem:[%s7561_s2 + $0xed8] sm:$0xff] }
 0x1ad   :  { %4677 = vmatpush3.bf16.msra.mxu1 %v4676_v0  ;;  %4679 = vmatprep.subr.bf16.mxu0 %v4678_v1  ;;  %v1997_v0 = vld [vmem:[%s7561_s2 + $0xfd0] sm:$0xff]  ;;  %v1998_v1 = vld [vmem:[%s7561_s2 + $0xfd8] sm:$0xff] }
 0x1ae   :  { %4711 = vmatprep.subr.bf16.mxu1 %v4710_v3  ;;  %v4698_v3 = vpack.c.bf16 %v1966_v52, %v1965_v61  ;;  %v4730_v5 = vpack.c.bf16 %v1998_v1, %v1997_v0  ;;  %v3134_v0 = vld [vmem:[%s7563_s4 + $0x18] sm:$0xff]  ;;  %v3131_v1 = vld [vmem:[%s7563_s4] sm:$0xff] }
 0x1af   :  { %2915 = vmatmul.mubr.f32.vlgmr.msra.gmra.mrb[28].mxu0 %v1483_v10  ;;  %v1999_v10 = vld [vmem:[%s7561_s2 + $0xfe0] sm:$0xff] }
 0x1b0   :  { %2985 = vmatmul.mubr.f32.vlgmr.msra.gmra.mrb[28].mxu1 %v1485_v15  ;;  %4681 = vmatpush3.bf16.msra.mxu0 %v4680_v6  ;;  %v1982_v6 = vld [vmem:[%s7561_s2 + $0xf58] sm:$0xff]  ;;  %v1951_v15 = vld [vmem:[%s7561_s2 + $0xe60] sm:$0xff] }
 0x1b1   :  { %3054 = vmatprep.mubr.f32.mxu0 %v1488_v19  ;;  %4713 = vmatpush3.bf16.msra.mxu1 %v4712_v11  ;;  %v2000_v11 = vld [vmem:[%s7561_s2 + $0xfe8] sm:$0xff]  ;;  %v4732_v13 = vpack.c.bf16 %v1982_v6, %v1981_v4  ;;  %v3137_v6 = vld [vmem:[%s7563_s4 + $0x30] sm:$0xff] }
 0x1b2   :  { %3124 = vmatprep.mubr.f32.mxu1 %v1490_v22  ;;  %4683 = vmatprep.subr.bf16.mxu0 %v4682_v16  ;;  %v1952_v16 = vld [vmem:[%s7561_s2 + $0xe68] sm:$0xff]  ;;  %v4734_v18 = vpack.c.bf16 %v2000_v11, %v1999_v10  ;;  %v3376_v22 = vld [vmem:[%s7562_s3] ss:$0 sm:$0xff]  ;;  %s3352_s3 = sshll.u32 %s4818_s24, 4  ;;  %s3353_s3 = int_to_ptr.vmem [resolvable:$true] %s3352_s3 }
 0x1b3   :  { %4715 = vmatprep.subr.bf16.mxu1 %v4714_v20  ;;  %v1984_v19 = vld [vmem:[%s7561_s2 + $0xf68] sm:$0xff]  ;;  %v1969_v20 = vld [vmem:[%s7561_s2 + $0xef0] sm:$0xff]  ;;  %v4704_v26 = vpack.c.bf16 %v1952_v16, %v1951_v15  ;;  %p4798_p1 = scmp.lt.s32.totalorder %s3353_s3, %s3353_s3 }
 0x1b4   :  { %4685 = vmatpush3.bf16.msra.mxu0 %v4684_v23  ;;  %v4736_v27 = vpack.c.bf16 %v1984_v19, %v1983_v42  ;;  %v4706_v29 = vpack.c.bf16 %v1970_v33, %v1969_v20  ;;  %v3139_v42 = vld [vmem:[%s7563_s4 + $0x40] sm:$0xff]  ;;  %v3144_v33 = vld [vmem:[%s7563_s4 + $0x68] sm:$0xff] }
 0x1b5   :  { %4717 = vmatpush3.bf16.msra.mxu1 %v4716_v24  ;;  %4687 = vmatprep.subr.bf16.mxu0 %v4686_v63  ;;  %v2001_v24 = vld [vmem:[%s7561_s2 + $0xff0] sm:$0xff]  ;;  %v2002_v63 = vld [vmem:[%s7561_s2 + $0xff8] sm:$0xff] }
 0x1b6   :  { %4719 = vmatprep.subr.bf16.mxu1 %v4718_v41 }
 0x1b8   :  { %4689 = vmatpush3.bf16.msra.mxu0 %v4688_v35  ;;  %v4738_v35 = vpack.c.bf16 %v2002_v63, %v2001_v24  ;;  %v3143_v24 = vld [vmem:[%s7563_s4 + $0x60] sm:$0xff]  ;;  %v3145_v63 = vld [vmem:[%s7563_s4 + $0x70] sm:$0xff] }
 0x1b9   :  { %4721 = vmatpush3.bf16.msra.mxu1 %v4720_v38  ;;  %4691 = vmatprep.subr.bf16.mxu0 %v4690_v37  ;;  %v1985_v38 = vld [vmem:[%s7561_s2 + $0xf70] sm:$0xff]  ;;  %v1986_v37 = vld [vmem:[%s7561_s2 + $0xf78] sm:$0xff] }
 0x1ba   :  { %4723 = vmatprep.subr.bf16.mxu1 %v4722_v44  ;;  %v4740_v51 = vpack.c.bf16 %v1986_v37, %v1985_v38  ;;  %v1487_v44 = vmax.f32 %v6856_v55, 0.0  ;;  %v3238_v38 = vld [vmem:[%s7565_s6 + $0x10] sm:$0xff]  ;;  %v3239_v37 = vld [vmem:[%s7565_s6 + $0x18] sm:$0xff] }
 0x1bc   :  { %4693 = vmatpush3.bf16.msra.mxu0 %v4692_v50 }
 0x1bd   :  { %4725 = vmatpush3.bf16.msra.mxu1 %v4724_v53  ;;  %4695 = vmatprep.subr.bf16.mxu0 %v4694_v31 }
 0x1be   :  { %4727 = vmatprep.subr.bf16.mxu1 %v4726_v59 }
 0x1c0   :  { %4697 = vmatpush3.bf16.msra.mxu0 %v4696_v28 }
 0x1c1   :  { %4729 = vmatpush3.bf16.msra.mxu1 %v4728_v2  ;;  %4699 = vmatprep.subr.bf16.mxu0 %v4698_v3  ;;  %v3133_v2 = vld [vmem:[%s7563_s4 + $0x10] sm:$0xff]  ;;  %v3136_v3 = vld [vmem:[%s7563_s4 + $0x28] sm:$0xff] }
 0x1c2   :  { %v3411_v17 = vpop.f32.mrb[16].mxu0  ;;  %4731 = vmatprep.subr.bf16.mxu1 %v4730_v5  ;;  %v4744_v43 = vpack.c.bf16 %v3133_v2, %v3131_v1  ;;  %v4746_v4 = vpack.c.bf16 %v3138_v34, %v3136_v3  ;;  %v3135_v5 = vld [vmem:[%s7563_s4 + $0x20] sm:$0xff]  ;;  %v3247_v1 = vld [vmem:[%s7565_s6 + $0x58] sm:$0xff]  ;;  %v3265_v2 = vld [vmem:[%s7565_s6 + $0xe8] sm:$0xff] }
 0x1c3   :  { %v3446_v21 = vpop.f32.mrb[16].mxu1  ;;  %v3412_v23 = vpop.f32.mrb[17].mxu0  ;;  %v4748_v8 = vpack.c.bf16 %v3137_v6, %v3135_v5 }
 0x1c4   :  { %v3413_v57 = vadd.f32 %v3412_v23, %v3411_v17  ;;  %v3447_v25 = vpop.f32.mrb[17].mxu1  ;;  %4701 = vmatpush3.bf16.msra.mxu0 %v4700_v12  ;;  %v3140_v12 = vld [vmem:[%s7563_s4 + $0x48] sm:$0xff]  ;;  %v3141_v17 = vld [vmem:[%s7563_s4 + $0x50] sm:$0xff] }
 0x1c5   :  { %v3448_v41 = vadd.f32 %v3447_v25, %v3446_v21  ;;  %4733 = vmatpush3.bf16.msra.mxu1 %v4732_v13  ;;  %4703 = vmatprep.subr.bf16.mxu0 %v4702_v14  ;;  %v3142_v13 = vld [vmem:[%s7563_s4 + $0x58] sm:$0xff]  ;;  %v4752_v19 = vpack.c.bf16 %v3141_v17, %v3139_v42  ;;  %v3252_v25 = vld [vmem:[%s7565_s6 + $0x80] sm:$0xff] }
 0x1c6   :  { %v2077_v32 = vadd.f32 %v3413_v57, %v3376_v22  ;;  %4735 = vmatprep.subr.bf16.mxu1 %v4734_v18  ;;  %v4750_v16 = vpack.c.bf16 %v3142_v13, %v3140_v12  ;;  %v3146_v21 = vld [vmem:[%s7563_s4 + $0x78] sm:$0xff]  ;;  %v4756_v57 = vpack.c.bf16 %v3145_v63, %v3143_v24 }
 0x1c7   :  { %v4754_v23 = vpack.c.bf16 %v3146_v21, %v3144_v33 }
 0x1c8   :  { %v2147_v39 = vadd.f32 %v3448_v41, %v2077_v32  ;;  %4705 = vmatpush3.bf16.msra.mxu0 %v4704_v26  ;;  %v3253_v26 = vld [vmem:[%s7565_s6 + $0x88] sm:$0xff]  ;;  %v3236_v41 = vld [vmem:[%s7565_s6] sm:$0xff] }
 0x1c9   :  { %4737 = vmatpush3.bf16.msra.mxu1 %v4736_v27  ;;  %4707 = vmatprep.subr.bf16.mxu0 %v4706_v29  ;;  %v4758_v27 = vpack.c.bf16 %v3253_v26, %v3252_v25  ;;  %v3237_v29 = vld [vmem:[%s7565_s6 + $0x8] sm:$0xff] }
 0x1ca   :  { %4739 = vmatprep.subr.bf16.mxu1 %v4738_v35  ;;  %v4760_v32 = vpack.c.bf16 %v3237_v29, %v3236_v41  ;;  %v4762_v35 = vpack.c.bf16 %v3255_v36, %v3254_v30 }
 0x1cc   :  { %4709 = vmatpush3.bf16.msra.mxu0 %v4708_v49  ;;  %v3257_v49 = vld [vmem:[%s7565_s6 + $0xa8] sm:$0xff] }
 0x1cd   :  { %4741 = vmatpush3.bf16.msra.mxu1 %v4740_v51  ;;  %v4764_v51 = vpack.c.bf16 %v3239_v37, %v3238_v38  ;;  %v3249_v38 = vld [vmem:[%s7565_s6 + $0x68] sm:$0xff] }
 0x1ce   :  { %4759 = vmatprep.subr.bf16.mxu1 %v4758_v27 }
 0x1cf   :  { %3055 = vmatmul.mubr.f32.vlgmr.msra.gmra.mrb[30].mxu0 %v1487_v44 }
 0x1d0   :  { %3125 = vmatmul.mubr.f32.vlgmr.msra.gmra.mrb[30].mxu1 %v1489_v40  ;;  %3227 = vmatprep.mubr.f32.mxu0 %v4817_v7  ;;  %v3132_v7 = vld [vmem:[%s7563_s4 + $0x8] sm:$0xff]  ;;  %v3240_v40 = vld [vmem:[%s7565_s6 + $0x20] sm:$0xff] }
 0x1d1   :  { %v4742_v28 = vpack.c.bf16 %v3134_v0, %v3132_v7  ;;  %4761 = vmatpush3.bf16.msra.mxu1 %v4760_v32  ;;  %v3246_v0 = vld [vmem:[%s7565_s6 + $0x50] sm:$0xff] }
 0x1d2   :  { %4763 = vmatprep.subr.bf16.mxu1 %v4762_v35  ;;  %v4780_v3 = vpack.c.bf16 %v3247_v1, %v3246_v0  ;;  %v3248_v35 = vld [vmem:[%s7565_s6 + $0x60] sm:$0xff] }
 0x1d3   :  { %4743 = vmatprep.subr.bf16.mxu0 %v4742_v28  ;;  %v3264_v28 = vld [vmem:[%s7565_s6 + $0xe0] sm:$0xff]  ;;  %v4784_v37 = vpack.c.bf16 %v3249_v38, %v3248_v35 }
 0x1d4   :  { %4745 = vmatpush1.bf16.msra.mxu0 %v4744_v43  ;;  %v4782_v34 = vpack.c.bf16 %v3265_v2, %v3264_v28 }
 0x1d5   :  { %4747 = vmatprep.subr.bf16.mxu0 %v4746_v4  ;;  %4765 = vmatpush3.bf16.msra.mxu1 %v4764_v51 }
 0x1d8   :  { %4749 = vmatpush1.bf16.msra.mxu0 %v4748_v8 }
 0x1d9   :  { %4751 = vmatprep.subr.bf16.mxu0 %v4750_v16 }
 0x1dc   :  { %4753 = vmatpush1.bf16.msra.mxu0 %v4752_v19 }
 0x1dd   :  { %4755 = vmatprep.subr.bf16.mxu0 %v4754_v23 }
 0x1e0   :  { %4757 = vmatpush1.bf16.msra.mxu0 %v4756_v57 }
 0x1e2   :  { %v3481_v46 = vpop.f32.mrb[18].mxu0 }
 0x1e3   :  { %v3516_v47 = vpop.f32.mrb[18].mxu1  ;;  %v3482_v58 = vpop.f32.mrb[19].mxu0 }
 0x1e4   :  { %v3483_v48 = vadd.f32 %v3482_v58, %v3481_v46  ;;  %v3517_v50 = vpop.f32.mrb[19].mxu1  ;;  %v3241_v46 = vld [vmem:[%s7565_s6 + $0x28] sm:$0xff]  ;;  %v3259_v58 = vld [vmem:[%s7565_s6 + $0xb8] sm:$0xff] }
 0x1e5   :  { %v3518_v53 = vadd.f32 %v3517_v50, %v3516_v47  ;;  %v3258_v47 = vld [vmem:[%s7565_s6 + $0xb0] sm:$0xff] }
 0x1e6   :  { %v2217_v31 = vadd.f32 %v3483_v48, %v2147_v39  ;;  %v3256_v39 = vld [vmem:[%s7565_s6 + $0xa0] sm:$0xff]  ;;  %v4768_v48 = vpack.c.bf16 %v3241_v46, %v3240_v40  ;;  %v4770_v50 = vpack.c.bf16 %v3259_v58, %v3258_v47  ;;  %v3251_v40 = vld [vmem:[%s7565_s6 + $0x78] sm:$0xff]  ;;  %v3149_v47 = vlaneseq }
 0x1e7   :  { %v4766_v44 = vpack.c.bf16 %v3257_v49, %v3256_v39  ;;  %v3266_v39 = vld [vmem:[%s7565_s6 + $0xf0] sm:$0xff]  ;;  %v3267_v49 = vld [vmem:[%s7565_s6 + $0xf8] sm:$0xff] }
 0x1e8   :  { %v2287_v54 = vadd.f32 %v3518_v53, %v2217_v31  ;;  %v3242_v53 = vld [vmem:[%s7565_s6 + $0x30] sm:$0xff]  ;;  %v3243_v31 = vld [vmem:[%s7565_s6 + $0x38] sm:$0xff]  ;;  %v4786_v51 = vpack.c.bf16 %v3267_v49, %v3266_v39  ;;  %v3150_v58 = vshrl.u32 %v3149_v47, 7 }
 0x1e9   :  { %4767 = vmatprep.subr.bf16.mxu1 %v4766_v44  ;;  %v3250_v44 = vld [vmem:[%s7565_s6 + $0x70] sm:$0xff] }
 0x1ea   :  { %4769 = vmatpush3.bf16.msra.mxu1 %v4768_v48  ;;  %v4788_v46 = vpack.c.bf16 %v3251_v40, %v3250_v44  ;;  %v3151_v48 = vsub.s32 0, %v3150_v58 }
 0x1eb   :  { %4771 = vmatprep.subr.bf16.mxu1 %v4770_v50  ;;  %v3147_v50 = vld [vmem:[%s7564_s5] sm:$0x3]  ;;  %s4793_s5 = scalar_lea.vmem %s3353_s3, 128 }
 0x1ec   :  { %p4794_p0 = scmp.ne.s32.totalorder %s3353_s3, %s4793_s5  ;;  %p4799_p2 = scmp.lt.s32.totalorder %s4793_s5, %s4793_s5 }
 0x1ee   :  { %p4800_p3 = por %p4799_p2, %p4798_p1 }
 0x1f0   :  { %p4801_p4 = pnand %p4800_p3, %p4794_p0 }
 0x202   :  { %v3551_v56 = vpop.f32.mrb[20].mxu0 }
 0x203   :  { %v3586_v45 = vpop.f32.mrb[20].mxu1  ;;  %v3552_v59 = vpop.f32.mrb[21].mxu0 }
 0x204   :  { %v3553_v60 = vadd.f32 %v3552_v59, %v3551_v56  ;;  %v3587_v55 = vpop.f32.mrb[21].mxu1  ;;  %v3261_v56 = vld [vmem:[%s7565_s6 + $0xc8] sm:$0xff] }
 0x205   :  { %v3588_v61 = vadd.f32 %v3587_v55, %v3586_v45  ;;  %v4772_v45 = vpack.c.bf16 %v3243_v31, %v3242_v53  ;;  %v3245_v55 = vld [vmem:[%s7565_s6 + $0x48] sm:$0xff]  ;;  %v3155_v53 = vsub.s32 1, %v3150_v58  ;;  %v3152_v31 = vrot.slane %v3147_v50, %v3151_v48 }
 0x206   :  { %v2357_v52 = vadd.f32 %v3553_v60, %v2287_v54  ;;  %v3260_v54 = vld [vmem:[%s7565_s6 + $0xc0] sm:$0xff] }
 0x207   :  { %v4774_v59 = vpack.c.bf16 %v3261_v56, %v3260_v54  ;;  %v3244_v60 = vld [vmem:[%s7565_s6 + $0x40] sm:$0xff]  ;;  %4773 = vmatpush3.bf16.msra.mxu1 %v4772_v45  ;;  %v3156_v54 = vrot.slane %v3147_v50, %v3155_v53 }
 0x208   :  { %v2427_v62 = vadd.f32 %v3588_v61, %v2357_v52  ;;  %v3262_v61 = vld [vmem:[%s7565_s6 + $0xd0] sm:$0xff]  ;;  %v3263_v52 = vld [vmem:[%s7565_s6 + $0xd8] sm:$0xff] }
 0x209   :  { %4775 = vmatprep.subr.bf16.mxu1 %v4774_v59  ;;  %v4778_v7 = vpack.c.bf16 %v3263_v52, %v3262_v61 }
 0x222   :  { %v3621_v9 = vpop.f32.mrb[22].mxu0 }
 0x223   :  { %v3656_v10 = vpop.f32.mrb[22].mxu1  ;;  %v3622_v11 = vpop.f32.mrb[23].mxu0 }
 0x224   :  { %v3623_v14 = vadd.f32 %v3622_v11, %v3621_v9  ;;  %v3657_v15 = vpop.f32.mrb[23].mxu1 }
 0x225   :  { %v3658_v18 = vadd.f32 %v3657_v15, %v3656_v10 }
 0x226   :  { %v2497_v20 = vadd.f32 %v3623_v14, %v2427_v62  ;;  %v4776_v62 = vpack.c.bf16 %v3245_v55, %v3244_v60 }
 0x228   :  { %v7436_v22 = vadd.f32 %v3658_v18, %v2497_v20  ;;  %4777 = vmatpush3.bf16.msra.mxu1 %v4776_v62 }
 0x229   :  { %4779 = vmatprep.subr.bf16.mxu1 %v4778_v7  ;;  %v3378_v7 = vld [vmem:[%s7566_s7] ss:$0 sm:$0xff] }
 0x22c   :  { %4781 = vmatpush3.bf16.msra.mxu1 %v4780_v3 }
 0x22d   :  { %4783 = vmatprep.subr.bf16.mxu1 %v4782_v34 }
 0x230   :  { %4785 = vmatpush3.bf16.msra.mxu1 %v4784_v37 }
 0x231   :  { %4787 = vmatprep.subr.bf16.mxu1 %v4786_v51 }
 0x234   :  { %4789 = vmatpush3.bf16.msra.mxu1 %v4788_v46 }
 0x242   :  { %v3691_v43 = vpop.f32.mrb[24].mxu0 }
 0x243   :  { %v3726_v4 = vpop.f32.mrb[24].mxu1  ;;  %v3692_v5 = vpop.f32.mrb[25].mxu0 }
 0x244   :  { %v3693_v6 = vadd.f32 %v3692_v5, %v3691_v43  ;;  %v3727_v8 = vpop.f32.mrb[25].mxu1 }
 0x245   :  { %v3728_v9 = vadd.f32 %v3727_v8, %v3726_v4 }
 0x246   :  { %v2637_v10 = vadd.f32 %v3693_v6, %v7436_v22 }
 0x248   :  { %v2707_v11 = vadd.f32 %v3728_v9, %v2637_v10 }
 0x262   :  { %v3761_v12 = vpop.f32.mrb[26].mxu0 }
 0x263   :  { %v3796_v13 = vpop.f32.mrb[26].mxu1  ;;  %v3762_v14 = vpop.f32.mrb[27].mxu0 }
 0x264   :  { %v3763_v15 = vadd.f32 %v3762_v14, %v3761_v12  ;;  %v3797_v16 = vpop.f32.mrb[27].mxu1 }
 0x265   :  { %v3798_v42 = vadd.f32 %v3797_v16, %v3796_v13 }
 0x266   :  { %v2777_v17 = vadd.f32 %v3763_v15, %v2707_v11 }
 0x268   :  { %v2847_v18 = vadd.f32 %v3798_v42, %v2777_v17 }
 0x282   :  { %v3831_v19 = vpop.f32.mrb[28].mxu0 }
 0x283   :  { %v3866_v20 = vpop.f32.mrb[28].mxu1  ;;  %v3832_v33 = vpop.f32.mrb[29].mxu0 }
 0x284   :  { %v3833_v21 = vadd.f32 %v3832_v33, %v3831_v19  ;;  %v3867_v23 = vpop.f32.mrb[29].mxu1 }
 0x285   :  { %v3868_v24 = vadd.f32 %v3867_v23, %v3866_v20 }
 0x286   :  { %v2917_v63 = vadd.f32 %v3833_v21, %v2847_v18 }
 0x288   :  { %v2987_v57 = vadd.f32 %v3868_v24, %v2917_v63 }
 0x2a2   :  { %v3901_v25 = vpop.f32.mrb[30].mxu0 }
 0x2a3   :  { %v3936_v26 = vpop.f32.mrb[30].mxu1  ;;  %v3902_v22 = vpop.f32.mrb[31].mxu0 }
 0x2a4   :  { %v3903_v41 = vadd.f32 %v3902_v22, %v3901_v25  ;;  %v3937_v27 = vpop.f32.mrb[31].mxu1 }
 0x2a5   :  { %v3938_v29 = vadd.f32 %v3937_v27, %v3936_v26 }
 0x2a6   :  { %v3057_v30 = vadd.f32 %v3903_v41, %v2987_v57 }
 0x2a8   :  { %v3127_v36 = vadd.f32 %v3938_v29, %v3057_v30 }
 0x2aa   :  { %v3130_v32 = vmax.f32 %v3127_v36, 0.0 }
 0x2ac   :  { %3377 = vmatmul.mubr.msk.f32.vlgmr.msra.gmra.mrb[32].mxu0 %vm3159_vm1, %v3130_v32 }
 0x37f   :  { %v3229_v56 = vpop.f32.mrb[32].mxu0 }
 0x380   :  { %v3230_v45 = vadd.f32 %v3229_v56, %v3152_v31  ;;  %v3231_v59 = vpop.f32.mrb[33].mxu0 }
 0x381   :  { %v3232_v60 = vadd.f32 %v3231_v59, %v3156_v54 }
 0x382   :  { %v3234_v61 = vmax.f32 %v3230_v45, 0.0 }
 0x383   :  { %v3235_v55 = vmax.f32 %v3232_v60, 0.0 }
 0x385   :  { %3339 = vmatprep.mubr.f32.mxu1 %v3235_v55 }
 0x386   :  { %3340 = vmatmul.mubr.f32.vlgmr.msra.gmra.mrb[32].mxu1 %v3234_v61 }
 0x459   :  { %v3971_v52 = vpop.f32.mrb[32].mxu1 }
 0x45a   :  { %v3972_v62 = vpop.f32.mrb[33].mxu1 }
 0x45b   :  { %v3973_v0 = vadd.f32 %v3972_v62, %v3971_v52 }
 0x45d   :  { %v3342_v1 = vadd.f32 %v3973_v0, %v3378_v7 }
 0x45f   :  { %3345 = vst [vmem:[#allocation2] sm:$0xff] %v3342_v1 }
 0x460   :  { %4804 = shalt.err (!%p4801_p4)
}
 0x461   :  { %s4805_s27 = scalar_lea.hbm %s7567_s8, 128 }
 0x462   :  { %p4806_p5 = scmp.ne.s32.totalorder %s7567_s8, %s4805_s27  ;;  %p4809_p6 = scmp.lt.u32.totalorder %s4805_s27, %s7567_s8 }
 0x464   :  { %p4811_p7 = pnand %p4809_p6, %p4806_p5 }
 0x466   :  { %4814 = shalt.err (!%p4811_p7)
}
 0x467   :  { %3355 = dma.vmem_to_hbm [thread:$0]  %s3353_s3, 128, %s7567_s8, [#allocation3]  }
 0x468   :  { %4815 = dma.done.wait [#allocation3], 128  }
 0x469   :  { %4816 = vsyncadd [#allocation3], 4294967168 }
 0x46a   :  { %3359 = vsyncpa [#allocation3], 1 }

</bundles_post_ra>
